<compile_context>
chip_gen: v7x
topology: tpu7x:2x2x1
jax: 0.10.0
libtpu: 0.0.40
codegen_flags: <defaults>
</compile_context>

<pallas_src>
import math
from functools import partial

import jax
import jax.numpy as jnp
from jax import lax
from jax.experimental import pallas as pl
from jax.experimental.pallas import tpu as pltpu

BN_EPS = 1e-5
LANE = 128
_VMEM_LIMIT = 48 * 1024 * 1024       # explicit scoped-VMEM request (safe on v5e/v6e/v7x)
_PASS1_BUDGET = 20 * 1024 * 1024     # working-set target used for pass-1 tile sizing
_ROW_TARGET_P1 = 1024                # ~matmul rows per pass-1 grid step
_ROW_TARGET_P2 = 4096                # rows per pass-2 grid step (elementwise)


def _round_up(a, b):
    return ((a + b - 1) // b) * b


def conv_stats_kernel(x_ref, w_ref, y_ref, sum_ref, sq_ref, *, kh, kw, stride, wo):
    """Pass 1: in-kernel per-tap conv matmul + per-channel partial batch stats.

    x_ref:   [kh, th, Wp, Ci_p] bf16  (kh shifted input-row views for th output rows)
    w_ref:   [kh, kw, Ci_p, Cp] bf16  (resident across the grid)
    y_ref:   [th*Wo, Cp]        bf16  conv output tile
    sum_ref/sq_ref: [1, Cp] f32 partial sum / sum-of-squares for this parallel slice
    """
    s = pl.program_id(1)

    @pl.when(s == 0)
    def _init():
        sum_ref[...] = jnp.zeros_like(sum_ref)
        sq_ref[...] = jnp.zeros_like(sq_ref)

    th = x_ref.shape[1]
    cp = w_ref.shape[-1]
    span = (wo - 1) * stride + 1

    w_full = w_ref[...]                                   # [kh, kw, Ci_p, Cp] bf16
    acc = jnp.zeros((th * wo, cp), jnp.float32)
    for ki in range(kh):
        xi = x_ref[ki]                                    # [th, Wp, Ci_p] bf16
        for kj in range(kw):
            lhs = xi[:, kj:kj + span:stride, :].reshape(th * wo, -1)
            acc = acc + jnp.dot(lhs, w_full[ki, kj],
                                preferred_element_type=jnp.float32)

    y_ref[...] = acc.astype(y_ref.dtype)                  # bf16 intermediate
    # Stats from the f32 accumulator (VPU/XLU reductions; MXU stays on the conv).
    # TODO(synk): single-pass E[x^2]-E[x]^2 can lose precision for huge M; switch
    # to per-tile mean/M2 (Chan) if strict PyTorch-BN parity is required.
    sum_ref[...] += jnp.sum(acc, axis=0, keepdims=True)
    sq_ref[...] += jnp.sum(acc * acc, axis=0, keepdims=True)


def bn_silu_kernel(y_ref, scale_ref, shift_ref, o_ref):
    """Pass 2: z = y*scale + shift (folded BN affine), then SiLU. Lane-dense Cp."""
    z = y_ref[...].astype(jnp.float32) * scale_ref[...] + shift_ref[...]
    # sigmoid = 1/(1+exp(-z)): exp on EUP, approx reciprocal on EUP (VALU stays free).
    o_ref[...] = (z * pl.reciprocal(1.0 + jnp.exp(-z), approx=True)).astype(o_ref.dtype)


def conv_bn_silu(x_nchw, weight, bias, gamma, beta, *, stride=1, padding=0):
    """x_nchw: [N, C_in, H, W]; weight: [C_out, C_in, kh, kw] (PyTorch layout).

    `bias` is accepted for API parity but intentionally unused: with
    training-mode BatchNorm the conv bias cancels out of the forward output.
    """
    del bias
    N, C_in, H, W = x_nchw.shape
    C_out, _, kh, kw = weight.shape

    Ho = (H + 2 * padding - kh) // stride + 1
    Wo = (W + 2 * padding - kw) // stride + 1
    Wp = W + 2 * padding
    R = N * Ho                      # real output rows (flattened N*Ho)
    M_real = R * Wo                 # real output pixels
    Cp = _round_up(C_out, LANE)     # lane-dense output channels
    Ci_p = _round_up(C_in, 8)       # sublane-friendly contraction dim (no 128 pad)

    # ---- pass-1 row-tile sizing (output rows per step), VMEM-budgeted ----
    g = 8 // math.gcd(Wo, 8)        # smallest th granule so th*Wo % 8 == 0

    def p1_bytes(th_):
        x_blk = kh * th_ * Wp * Ci_p * 2
        y_blk = th_ * Wo * Cp * 2
        w_all = kh * kw * Ci_p * Cp * 2
        acc = th_ * Wo * Cp * 4
        lhs = th_ * Wo * Ci_p * 2
        return 2 * x_blk + 2 * y_blk + 2 * w_all + acc + 2 * lhs + 8 * Cp * 4

    th = max(g, (_ROW_TARGET_P1 // max(Wo, 1)) // g * g)
    th = min(th, _round_up(R, g))
    while th > g and p1_bytes(th) > _PASS1_BUDGET:
        th = max(g, (th // 2) // g * g)

    n_tiles = (R + th - 1) // th
    g_par = 2 if n_tiles >= 2 else 1           # v7x: split conv+stats over both TCs
    n_tiles = _round_up(n_tiles, g_par)
    n_steps = n_tiles // g_par
    Rp = n_tiles * th
    Mp = Rp * Wo

    # ---- glue: NCHW -> NHWC bf16, channel+spatial pad, kh shifted row views ----
    x = jnp.transpose(x_nchw, (0, 2, 3, 1)).astype(jnp.bfloat16)
    xp = jnp.pad(x, ((0, 0), (padding, padding), (padding, padding),
                     (0, Ci_p - C_in)))
    # One shifted view per kernel row: tap ki picks input rows ki, ki+stride, ...
    views = [xp[:, ki:ki + stride * (Ho - 1) + 1:stride, :, :] for ki in range(kh)]
    x_taps = jnp.stack(views, axis=0).reshape(kh, R, Wp, Ci_p)
    x_taps = jnp.pad(x_taps, ((0, 0), (0, Rp - R), (0, 0), (0, 0)))
    # TODO(synk): replace the kh shifted views (kh x activation HBM traffic) with a
    # manual-DMA halo pipeline (pl.ANY + make_async_copy) to reach ~1x traffic.

    # weight [C_out,C_in,kh,kw] -> [kh,kw,Ci_p,Cp] bf16
    w4 = jnp.transpose(weight, (2, 3, 1, 0))
    w4 = jnp.pad(w4, ((0, 0), (0, 0), (0, Ci_p - C_in), (0, Cp - C_out))
                 ).astype(jnp.bfloat16)

    # ---- pass 1: per-tap conv matmul + partial per-channel stats ----
    y_bf16, psum, psq = pl.pallas_call(
        partial(conv_stats_kernel, kh=kh, kw=kw, stride=stride, wo=Wo),
        out_shape=(
            jax.ShapeDtypeStruct((Mp, Cp), jnp.bfloat16),
            jax.ShapeDtypeStruct((g_par, Cp), jnp.float32),
            jax.ShapeDtypeStruct((g_par, Cp), jnp.float32),
        ),
        grid=(g_par, n_steps),
        in_specs=[
            pl.BlockSpec((kh, th, Wp, Ci_p), lambda p, s: (0, p * n_steps + s, 0, 0)),
            # resident weight; TODO(synk): pipeline_mode=pl.Buffered(1) to drop its
            # second pipeline buffer once verified on the target jax revision.
            pl.BlockSpec((kh, kw, Ci_p, Cp), lambda p, s: (0, 0, 0, 0)),
        ],
        out_specs=(
            pl.BlockSpec((th * Wo, Cp), lambda p, s: (p * n_steps + s, 0)),
            pl.BlockSpec((1, Cp), lambda p, s: (p, 0)),
            pl.BlockSpec((1, Cp), lambda p, s: (p, 0)),
        ),
        compiler_params=pltpu.CompilerParams(
            dimension_semantics=("parallel", "arbitrary"),
            vmem_limit_bytes=_VMEM_LIMIT),
    )(x_taps, w4)

    # ---- tiny Cp-sized BN fold in XLA glue (combines the per-core partials) ----
    inv_m = 1.0 / float(M_real)
    total_sum = jnp.sum(psum, axis=0, keepdims=True)
    total_sq = jnp.sum(psq, axis=0, keepdims=True)
    mean = total_sum * inv_m
    var = jnp.maximum(total_sq * inv_m - mean * mean, 0.0)   # biased (training-mode BN)
    gamma_p = jnp.pad(gamma.reshape(1, C_out).astype(jnp.float32),
                      ((0, 0), (0, Cp - C_out)))
    beta_p = jnp.pad(beta.reshape(1, C_out).astype(jnp.float32),
                     ((0, 0), (0, Cp - C_out)))
    scale = gamma_p * lax.rsqrt(var + BN_EPS)
    shift = beta_p - mean * scale

    # ---- pass 2: lane-dense normalize + SiLU with large, decoupled tiles ----
    blk = th * Wo
    k_max = max(1, min(n_tiles, _ROW_TARGET_P2 // blk))
    k = 1
    for cand in range(k_max, 0, -1):
        if n_tiles % cand == 0:
            k = cand
            break
    tm2 = k * blk
    n2 = Mp // tm2

    out_bf16 = pl.pallas_call(
        bn_silu_kernel,
        out_shape=jax.ShapeDtypeStruct((Mp, Cp), jnp.bfloat16),
        grid=(n2,),
        in_specs=[
            pl.BlockSpec((tm2, Cp), lambda i: (i, 0)),
            pl.BlockSpec((1, Cp), lambda i: (0, 0)),
            pl.BlockSpec((1, Cp), lambda i: (0, 0)),
        ],
        out_specs=pl.BlockSpec((tm2, Cp), lambda i: (i, 0)),
        compiler_params=pltpu.CompilerParams(
            dimension_semantics=("parallel",),
            vmem_limit_bytes=_VMEM_LIMIT),
    )(y_bf16, scale, shift)

    # ---- glue: [Mp, Cp] bf16 -> [M, C_out] -> NHWC -> NCHW f32 ----
    out = out_bf16[:M_real, :C_out].astype(jnp.float32).reshape(N, Ho, Wo, C_out)
    return jnp.transpose(out, (0, 3, 1, 2))


if __name__ == "__main__":
    key = jax.random.PRNGKey(0)
    k_x, k_w, k_b = jax.random.split(key, 3)

    N, C_in, H, W = 2, 4, 16, 16
    C_out, kh, kw = 8, 3, 3
    stride, padding = 1, 1

    x = jax.random.normal(k_x, (N, C_in, H, W), dtype=jnp.float32)

    fan_in = C_in * kh * kw
    bound = 1.0 / math.sqrt(fan_in)
    conv_w = jax.random.uniform(k_w, (C_out, C_in, kh, kw),
                                minval=-bound, maxval=bound, dtype=jnp.float32)
    conv_b = jax.random.uniform(k_b, (C_out,),
                                minval=-bound, maxval=bound, dtype=jnp.float32)
    bn_gamma = jnp.ones((C_out,), dtype=jnp.float32)
    bn_beta = jnp.zeros((C_out,), dtype=jnp.float32)

    y = conv_bn_silu(x, conv_w, conv_b, bn_gamma, bn_beta,
                     stride=stride, padding=padding)
    jax.block_until_ready(y)

    # Pure-JAX f32 reference for a structural sanity check (bf16 tolerance).
    def reference(xr, wr, br, gr, betar):
        yc = lax.conv_general_dilated(
            xr, wr, (stride, stride), [(padding, padding), (padding, padding)],
            dimension_numbers=("NCHW", "OIHW", "NCHW")) + br[None, :, None, None]
        mu = yc.mean(axis=(0, 2, 3), keepdims=True)
        var = yc.var(axis=(0, 2, 3), keepdims=True)
        yn = (yc - mu) * lax.rsqrt(var + BN_EPS) * gr[None, :, None, None] \
            + betar[None, :, None, None]
        return yn * jax.nn.sigmoid(yn)

    ref = reference(x, conv_w, conv_b, bn_gamma, bn_beta)

    assert y.shape == (N, C_out, H, W), y.shape
    assert bool(jnp.all(jnp.isfinite(y)))
    assert float(jnp.max(jnp.abs(y - ref))) < 0.1, float(jnp.max(jnp.abs(y - ref)))
    print("KERNEL_OK")
</pallas_src>

<mosaic_0001>
module attributes {stable_mosaic.version = 11 : i64} {
  func.func @conv_stats_kernel(%arg0: i32, %arg1: i32, %arg2: memref<3x32x18x8xbf16, #tpu.memory_space<vmem>>, %arg3: memref<3x3x8x128xbf16, #tpu.memory_space<vmem>>, %arg4: memref<512x128xbf16, #tpu.memory_space<vmem>>, %arg5: memref<1x128xf32, #tpu.memory_space<vmem>>, %arg6: memref<1x128xf32, #tpu.memory_space<vmem>>) attributes {dimension_semantics = [#tpu.dimension_semantics<parallel>, #tpu.dimension_semantics<arbitrary>], iteration_bounds = array<i64: 1, 1>, scalar_prefetch = 0 : i64, scratch_operands = 0 : i64, tpu.core_type = #tpu.core_type<tc>, window_params = [{transform_indices = @transform_0, window_bounds = array<i64: 3, 32, 18, 8>}, {pipeline_mode = #tpu.pipeline_mode<synchronous>, transform_indices = @transform_1, window_bounds = array<i64: 3, 3, 8, 128>}, {transform_indices = @transform_2, window_bounds = array<i64: 512, 128>}, {transform_indices = @transform_3, window_bounds = array<i64: 1, 128>}, {transform_indices = @transform_4, window_bounds = array<i64: 1, 128>}]} {
    %c0_i32 = arith.constant 0 : i32
    %0 = arith.cmpi eq, %arg1, %c0_i32 : i32
    %1 = arith.extui %0 : i1 to i32
    %c0_i32_0 = arith.constant 0 : i32
    %2 = arith.cmpi ne, %1, %c0_i32_0 : i32
    scf.if %2 {
      %cst_35 = arith.constant 0.000000e+00 : f32
      %78 = vector.broadcast %cst_35 : f32 to vector<1x128xf32>
      %c0_36 = arith.constant 0 : index
      %c0_37 = arith.constant 0 : index
      %79 = vector.load %arg5[%c0_36, %c0_37] : memref<1x128xf32, #tpu.memory_space<vmem>>, vector<1x128xf32>
      tpu.vector_store %arg5[%c0_36, %c0_37], %78 {strides = array<i32>} : memref<1x128xf32, #tpu.memory_space<vmem>>, vector<1x128xf32>,
      %cst_38 = arith.constant 0.000000e+00 : f32
      %80 = vector.broadcast %cst_38 : f32 to vector<1x128xf32>
      %c0_39 = arith.constant 0 : index
      %c0_40 = arith.constant 0 : index
      %81 = vector.load %arg6[%c0_39, %c0_40] : memref<1x128xf32, #tpu.memory_space<vmem>>, vector<1x128xf32>
      tpu.vector_store %arg6[%c0_39, %c0_40], %80 {strides = array<i32>} : memref<1x128xf32, #tpu.memory_space<vmem>>, vector<1x128xf32>,
    } else {
    }
    %c0 = arith.constant 0 : index
    %c0_1 = arith.constant 0 : index
    %c0_2 = arith.constant 0 : index
    %c0_3 = arith.constant 0 : index
    %3 = vector.load %arg3[%c0, %c0_1, %c0_2, %c0_3] : memref<3x3x8x128xbf16, #tpu.memory_space<vmem>>, vector<3x3x8x128xbf16>
    %cst = arith.constant 0.000000e+00 : f32
    %4 = vector.broadcast %cst : f32 to vector<512x128xf32>
    %c0_4 = arith.constant 0 : index
    %c0_5 = arith.constant 0 : index
    %c0_6 = arith.constant 0 : index
    %c0_7 = arith.constant 0 : index
    %5 = vector.load %arg2[%c0_4, %c0_5, %c0_6, %c0_7] : memref<3x32x18x8xbf16, #tpu.memory_space<vmem>>, vector<1x32x18x8xbf16>
    %6 = vector.shape_cast %5 : vector<1x32x18x8xbf16> to vector<32x18x8xbf16>
    %7 = vector.extract_strided_slice %6 {offsets = [0, 0, 0], sizes = [32, 16, 8], strides = [1, 1, 1]} : vector<32x18x8xbf16> to vector<32x16x8xbf16>
    %8 = vector.shape_cast %7 : vector<32x16x8xbf16> to vector<512x8xbf16>
    %9 = vector.extract_strided_slice %3 {offsets = [0, 0, 0, 0], sizes = [1, 1, 8, 128], strides = [1, 1, 1, 1]} : vector<3x3x8x128xbf16> to vector<1x1x8x128xbf16>
    %10 = vector.shape_cast %9 : vector<1x1x8x128xbf16> to vector<8x128xbf16>
    %cst_8 = arith.constant dense<0.000000e+00> : vector<512x128xf32>
    %11 = tpu.matmul %8, %10, %cst_8 {dimension_numbers = #tpu.dot_dimension_numbers<[1], [0], [0], [1], [0, 0, 1, 1], [], []>} : vector<512x8xbf16>, vector<8x128xbf16>, vector<512x128xf32> -> vector<512x128xf32>
    %12 = arith.addf %4, %11 : vector<512x128xf32>
    %13 = vector.extract_strided_slice %6 {offsets = [0, 1, 0], sizes = [32, 16, 8], strides = [1, 1, 1]} : vector<32x18x8xbf16> to vector<32x16x8xbf16>
    %14 = vector.shape_cast %13 : vector<32x16x8xbf16> to vector<512x8xbf16>
    %15 = vector.extract_strided_slice %3 {offsets = [0, 1, 0, 0], sizes = [1, 1, 8, 128], strides = [1, 1, 1, 1]} : vector<3x3x8x128xbf16> to vector<1x1x8x128xbf16>
    %16 = vector.shape_cast %15 : vector<1x1x8x128xbf16> to vector<8x128xbf16>
    %cst_9 = arith.constant dense<0.000000e+00> : vector<512x128xf32>
    %17 = tpu.matmul %14, %16, %cst_9 {dimension_numbers = #tpu.dot_dimension_numbers<[1], [0], [0], [1], [0, 0, 1, 1], [], []>} : vector<512x8xbf16>, vector<8x128xbf16>, vector<512x128xf32> -> vector<512x128xf32>
    %18 = arith.addf %12, %17 : vector<512x128xf32>
    %19 = vector.extract_strided_slice %6 {offsets = [0, 2, 0], sizes = [32, 16, 8], strides = [1, 1, 1]} : vector<32x18x8xbf16> to vector<32x16x8xbf16>
    %20 = vector.shape_cast %19 : vector<32x16x8xbf16> to vector<512x8xbf16>
    %21 = vector.extract_strided_slice %3 {offsets = [0, 2, 0, 0], sizes = [1, 1, 8, 128], strides = [1, 1, 1, 1]} : vector<3x3x8x128xbf16> to vector<1x1x8x128xbf16>
    %22 = vector.shape_cast %21 : vector<1x1x8x128xbf16> to vector<8x128xbf16>
    %cst_10 = arith.constant dense<0.000000e+00> : vector<512x128xf32>
    %23 = tpu.matmul %20, %22, %cst_10 {dimension_numbers = #tpu.dot_dimension_numbers<[1], [0], [0], [1], [0, 0, 1, 1], [], []>} : vector<512x8xbf16>, vector<8x128xbf16>, vector<512x128xf32> -> vector<512x128xf32>
    %24 = arith.addf %18, %23 : vector<512x128xf32>
    %c1 = arith.constant 1 : index
    %c0_11 = arith.constant 0 : index
    %c0_12 = arith.constant 0 : index
    %c0_13 = arith.constant 0 : index
    %25 = vector.load %arg2[%c1, %c0_11, %c0_12, %c0_13] : memref<3x32x18x8xbf16, #tpu.memory_space<vmem>>, vector<1x32x18x8xbf16>
    %26 = vector.shape_cast %25 : vector<1x32x18x8xbf16> to vector<32x18x8xbf16>
    %27 = vector.extract_strided_slice %26 {offsets = [0, 0, 0], sizes = [32, 16, 8], strides = [1, 1, 1]} : vector<32x18x8xbf16> to vector<32x16x8xbf16>
    %28 = vector.shape_cast %27 : vector<32x16x8xbf16> to vector<512x8xbf16>
    %29 = vector.extract_strided_slice %3 {offsets = [1, 0, 0, 0], sizes = [1, 1, 8, 128], strides = [1, 1, 1, 1]} : vector<3x3x8x128xbf16> to vector<1x1x8x128xbf16>
    %30 = vector.shape_cast %29 : vector<1x1x8x128xbf16> to vector<8x128xbf16>
    %cst_14 = arith.constant dense<0.000000e+00> : vector<512x128xf32>
    %31 = tpu.matmul %28, %30, %cst_14 {dimension_numbers = #tpu.dot_dimension_numbers<[1], [0], [0], [1], [0, 0, 1, 1], [], []>} : vector<512x8xbf16>, vector<8x128xbf16>, vector<512x128xf32> -> vector<512x128xf32>
    %32 = arith.addf %24, %31 : vector<512x128xf32>
    %33 = vector.extract_strided_slice %26 {offsets = [0, 1, 0], sizes = [32, 16, 8], strides = [1, 1, 1]} : vector<32x18x8xbf16> to vector<32x16x8xbf16>
    %34 = vector.shape_cast %33 : vector<32x16x8xbf16> to vector<512x8xbf16>
    %35 = vector.extract_strided_slice %3 {offsets = [1, 1, 0, 0], sizes = [1, 1, 8, 128], strides = [1, 1, 1, 1]} : vector<3x3x8x128xbf16> to vector<1x1x8x128xbf16>
    %36 = vector.shape_cast %35 : vector<1x1x8x128xbf16> to vector<8x128xbf16>
    %cst_15 = arith.constant dense<0.000000e+00> : vector<512x128xf32>
    %37 = tpu.matmul %34, %36, %cst_15 {dimension_numbers = #tpu.dot_dimension_numbers<[1], [0], [0], [1], [0, 0, 1, 1], [], []>} : vector<512x8xbf16>, vector<8x128xbf16>, vector<512x128xf32> -> vector<512x128xf32>
    %38 = arith.addf %32, %37 : vector<512x128xf32>
    %39 = vector.extract_strided_slice %26 {offsets = [0, 2, 0], sizes = [32, 16, 8], strides = [1, 1, 1]} : vector<32x18x8xbf16> to vector<32x16x8xbf16>
    %40 = vector.shape_cast %39 : vector<32x16x8xbf16> to vector<512x8xbf16>
    %41 = vector.extract_strided_slice %3 {offsets = [1, 2, 0, 0], sizes = [1, 1, 8, 128], strides = [1, 1, 1, 1]} : vector<3x3x8x128xbf16> to vector<1x1x8x128xbf16>
    %42 = vector.shape_cast %41 : vector<1x1x8x128xbf16> to vector<8x128xbf16>
    %cst_16 = arith.constant dense<0.000000e+00> : vector<512x128xf32>
    %43 = tpu.matmul %40, %42, %cst_16 {dimension_numbers = #tpu.dot_dimension_numbers<[1], [0], [0], [1], [0, 0, 1, 1], [], []>} : vector<512x8xbf16>, vector<8x128xbf16>, vector<512x128xf32> -> vector<512x128xf32>
    %44 = arith.addf %38, %43 : vector<512x128xf32>
    %c2 = arith.constant 2 : index
    %c0_17 = arith.constant 0 : index
    %c0_18 = arith.constant 0 : index
    %c0_19 = arith.constant 0 : index
    %45 = vector.load %arg2[%c2, %c0_17, %c0_18, %c0_19] : memref<3x32x18x8xbf16, #tpu.memory_space<vmem>>, vector<1x32x18x8xbf16>
    %46 = vector.shape_cast %45 : vector<1x32x18x8xbf16> to vector<32x18x8xbf16>
    %47 = vector.extract_strided_slice %46 {offsets = [0, 0, 0], sizes = [32, 16, 8], strides = [1, 1, 1]} : vector<32x18x8xbf16> to vector<32x16x8xbf16>
    %48 = vector.shape_cast %47 : vector<32x16x8xbf16> to vector<512x8xbf16>
    %49 = vector.extract_strided_slice %3 {offsets = [2, 0, 0, 0], sizes = [1, 1, 8, 128], strides = [1, 1, 1, 1]} : vector<3x3x8x128xbf16> to vector<1x1x8x128xbf16>
    %50 = vector.shape_cast %49 : vector<1x1x8x128xbf16> to vector<8x128xbf16>
    %cst_20 = arith.constant dense<0.000000e+00> : vector<512x128xf32>
    %51 = tpu.matmul %48, %50, %cst_20 {dimension_numbers = #tpu.dot_dimension_numbers<[1], [0], [0], [1], [0, 0, 1, 1], [], []>} : vector<512x8xbf16>, vector<8x128xbf16>, vector<512x128xf32> -> vector<512x128xf32>
    %52 = arith.addf %44, %51 : vector<512x128xf32>
    %53 = vector.extract_strided_slice %46 {offsets = [0, 1, 0], sizes = [32, 16, 8], strides = [1, 1, 1]} : vector<32x18x8xbf16> to vector<32x16x8xbf16>
    %54 = vector.shape_cast %53 : vector<32x16x8xbf16> to vector<512x8xbf16>
    %55 = vector.extract_strided_slice %3 {offsets = [2, 1, 0, 0], sizes = [1, 1, 8, 128], strides = [1, 1, 1, 1]} : vector<3x3x8x128xbf16> to vector<1x1x8x128xbf16>
    %56 = vector.shape_cast %55 : vector<1x1x8x128xbf16> to vector<8x128xbf16>
    %cst_21 = arith.constant dense<0.000000e+00> : vector<512x128xf32>
    %57 = tpu.matmul %54, %56, %cst_21 {dimension_numbers = #tpu.dot_dimension_numbers<[1], [0], [0], [1], [0, 0, 1, 1], [], []>} : vector<512x8xbf16>, vector<8x128xbf16>, vector<512x128xf32> -> vector<512x128xf32>
    %58 = arith.addf %52, %57 : vector<512x128xf32>
    %59 = vector.extract_strided_slice %46 {offsets = [0, 2, 0], sizes = [32, 16, 8], strides = [1, 1, 1]} : vector<32x18x8xbf16> to vector<32x16x8xbf16>
    %60 = vector.shape_cast %59 : vector<32x16x8xbf16> to vector<512x8xbf16>
    %61 = vector.extract_strided_slice %3 {offsets = [2, 2, 0, 0], sizes = [1, 1, 8, 128], strides = [1, 1, 1, 1]} : vector<3x3x8x128xbf16> to vector<1x1x8x128xbf16>
    %62 = vector.shape_cast %61 : vector<1x1x8x128xbf16> to vector<8x128xbf16>
    %cst_22 = arith.constant dense<0.000000e+00> : vector<512x128xf32>
    %63 = tpu.matmul %60, %62, %cst_22 {dimension_numbers = #tpu.dot_dimension_numbers<[1], [0], [0], [1], [0, 0, 1, 1], [], []>} : vector<512x8xbf16>, vector<8x128xbf16>, vector<512x128xf32> -> vector<512x128xf32>
    %64 = arith.addf %58, %63 : vector<512x128xf32>
    %65 = arith.truncf %64 : vector<512x128xf32> to vector<512x128xbf16>
    %c0_23 = arith.constant 0 : index
    %c0_24 = arith.constant 0 : index
    %66 = vector.load %arg4[%c0_23, %c0_24] : memref<512x128xbf16, #tpu.memory_space<vmem>>, vector<512x128xbf16>
    tpu.vector_store %arg4[%c0_23, %c0_24], %65 {strides = array<i32>} : memref<512x128xbf16, #tpu.memory_space<vmem>>, vector<512x128xbf16>,
    %c0_25 = arith.constant 0 : index
    %c0_26 = arith.constant 0 : index
    %67 = vector.load %arg5[%c0_25, %c0_26] : memref<1x128xf32, #tpu.memory_space<vmem>>, vector<1x128xf32>
    %cst_27 = arith.constant dense<0.000000e+00> : vector<128xf32>
    %68 = vector.multi_reduction <add>, %64, %cst_27 [0] : vector<512x128xf32> to vector<128xf32>
    %69 = vector.shape_cast %68 : vector<128xf32> to vector<1x128xf32>
    %70 = arith.addf %67, %69 : vector<1x128xf32>
    %c0_28 = arith.constant 0 : index
    %c0_29 = arith.constant 0 : index
    %71 = vector.load %arg5[%c0_28, %c0_29] : memref<1x128xf32, #tpu.memory_space<vmem>>, vector<1x128xf32>
    tpu.vector_store %arg5[%c0_28, %c0_29], %70 {strides = array<i32>} : memref<1x128xf32, #tpu.memory_space<vmem>>, vector<1x128xf32>,
    %c0_30 = arith.constant 0 : index
    %c0_31 = arith.constant 0 : index
    %72 = vector.load %arg6[%c0_30, %c0_31] : memref<1x128xf32, #tpu.memory_space<vmem>>, vector<1x128xf32>
    %73 = arith.mulf %64, %64 : vector<512x128xf32>
    %cst_32 = arith.constant dense<0.000000e+00> : vector<128xf32>
    %74 = vector.multi_reduction <add>, %73, %cst_32 [0] : vector<512x128xf32> to vector<128xf32>
    %75 = vector.shape_cast %74 : vector<128xf32> to vector<1x128xf32>
    %76 = arith.addf %72, %75 : vector<1x128xf32>
    %c0_33 = arith.constant 0 : index
    %c0_34 = arith.constant 0 : index
    %77 = vector.load %arg6[%c0_33, %c0_34] : memref<1x128xf32, #tpu.memory_space<vmem>>, vector<1x128xf32>
    tpu.vector_store %arg6[%c0_33, %c0_34], %76 {strides = array<i32>} : memref<1x128xf32, #tpu.memory_space<vmem>>, vector<1x128xf32>,
    return
  }
  func.func @transform_0(%arg0: i32, %arg1: i32) -> (i32, i32, i32, i32) {
    %c1_i32 = arith.constant 1 : i32
    %0 = arith.muli %arg0, %c1_i32 : i32
    %1 = arith.addi %0, %arg1 : i32
    %c0_i32 = arith.constant 0 : i32
    %c0_i32_0 = arith.constant 0 : i32
    %c0_i32_1 = arith.constant 0 : i32
    %c0_i32_2 = arith.constant 0 : i32
    return %c0_i32, %1, %c0_i32_0, %c0_i32_1 : i32, i32, i32, i32
  }
  func.func @transform_1(%arg0: i32, %arg1: i32) -> (i32, i32, i32, i32) {
    %c0_i32 = arith.constant 0 : i32
    %c0_i32_0 = arith.constant 0 : i32
    %c0_i32_1 = arith.constant 0 : i32
    %c0_i32_2 = arith.constant 0 : i32
    %c0_i32_3 = arith.constant 0 : i32
    return %c0_i32, %c0_i32_0, %c0_i32_1, %c0_i32_2 : i32, i32, i32, i32
  }
  func.func @transform_2(%arg0: i32, %arg1: i32) -> (i32, i32) {
    %c1_i32 = arith.constant 1 : i32
    %0 = arith.muli %arg0, %c1_i32 : i32
    %1 = arith.addi %0, %arg1 : i32
    %c0_i32 = arith.constant 0 : i32
    %c0_i32_0 = arith.constant 0 : i32
    return %1, %c0_i32 : i32, i32
  }
  func.func @transform_3(%arg0: i32, %arg1: i32) -> (i32, i32) {
    %c0_i32 = arith.constant 0 : i32
    %c0_i32_0 = arith.constant 0 : i32
    return %arg0, %c0_i32 : i32, i32
  }
  func.func @transform_4(%arg0: i32, %arg1: i32) -> (i32, i32) {
    %c0_i32 = arith.constant 0 : i32
    %c0_i32_0 = arith.constant 0 : i32
    return %arg0, %c0_i32 : i32, i32
  }
}

</mosaic_0001>

<bundles_post_ra>
// kernel: tpu_custom_call.1
= control target key start
LH: loop header
LB: loop body
LE: loop exit
PB: predicated region body
PF: predicated region fallthrough
CT: control target
= control target key end

     0   :  { %10 = vsyncpa [#allocation3], 0  ;;  %vm1119_vm0 = vcmask 1043456   ;;  %vm155_vm1 = vsmask.f32 3328  ;;  %v17249_v31 = vmov 0  ;;  %s17113_s0 = inlined_call_operand.vmem [shape: bf16[3,32,18,8], index: 0, kind: input, shape index: {}]   ;;  %s17114_s1 = inlined_call_operand.vmem [shape: bf16[3,3,8,128], index: 1, kind: input, shape index: {}]   ;;  %s17115_s2 = inlined_call_operand.hbm [shape: bf16[512,128], index: 2, kind: output, shape index: {0}]   ;;  %s17116_s3 = inlined_call_operand.hbm [shape: f32[1,128], index: 3, kind: output, shape index: {1}]   ;;  %s17117_s4 = inlined_call_operand.hbm [shape: f32[1,128], index: 4, kind: output, shape index: {2}]  }
   0x1   :  { %v51_v0 = vld [vmem:[%s17114_s1 + $0x4] sm:$0xf]  ;;  %v54_v1 = vld [vmem:[%s17114_s1 + $0x10] sm:$0xf]  ;;  %v59_v4 = vld [vmem:[%s17113_s0] sm:$0xf] }
   0x2   :  { %11594 = vmatprep.subr.msk.bf16.mxu1 %vm1119_vm0, %v51_v0  ;;  %11598 = vmatprep.subr.msk.bf16.mxu0 %vm1119_vm0, %v54_v1  ;;  %v1121_v2 = vsel %vm1119_vm0, %v51_v0, 0  ;;  %v12148_v3 = vsel %vm1119_vm0, %v54_v1, 0  ;;  %v60_v5 = vld [vmem:[%s17113_s0 + $0x4] sm:$0xf]  ;;  %v61_v6 = vld [vmem:[%s17113_s0 + $0x8] sm:$0x1] }
   0x3   :  { %17248 = vst [vmem:[#allocation9_spill] sm:$0xff] %v12148_v3  ;;  %10487 = vmatpush3.bf16.msra.mxu1 %v1121_v2  ;;  %10751 = vmatpush3.bf16.msra.mxu0 %v12148_v3  ;;  %vm156_vm2 = vsmask.f32 7440  ;;  %v159_v7 = vshrl.u32 %v59_v4, 16  ;;  %v162_v8 = vshll.u32 %v59_v4, 16  ;;  %v168_v9 = vshll.u32 %v60_v5, 16 }
   0x4   :  { %v172_v10 = vshrl.u32 %v60_v5, 16  ;;  %v50_v11 = vld [vmem:[%s17114_s1] sm:$0xf]  ;;  %v178_v12 = vshll.u32 %v61_v6, 16  ;;  %v9231_v14 = vld [vmem:[%s17113_s0 + $0x184] sm:$0xf]  ;;  %vm12191_vm3 = vmor %vm155_vm1, %vm156_vm2 }
   0x5   :  { %11595 = vmatprep.subr.msk.bf16.mxu1 %vm1119_vm0, %v50_v11  ;;  %v9230_v13 = vld [vmem:[%s17113_s0 + $0x180] sm:$0xf]  ;;  %v161_v15 = vrot.slane %v159_v7, 4  ;;  %v164_v16 = vrot.slane %v162_v8, 5  ;;  %v170_v17 = vrot.slane %v168_v9, 5  ;;  %v3486_v23 = vshll.u32 %v9231_v14, 16 }
   0x6   :  { %v174_v18 = vrot.slane %v172_v10, 4  ;;  %v12173_v19 = vld [vmem:[%s17113_s0 + $0x188] sm:$0x1]  ;;  %v180_v20 = vrot.slane %v178_v12, 5  ;;  %v3477_v21 = vshrl.u32 %v9230_v13, 16  ;;  %v3480_v22 = vshll.u32 %v9230_v13, 16 }
   0x7   :  { %v12178_v24 = vld [vmem:[%s17114_s1 + $0x14] sm:$0xf]  ;;  %v165_v25 = vor.u32 %v164_v16, %v161_v15  ;;  %v3490_v27 = vshrl.u32 %v9231_v14, 16  ;;  %v3496_v28 = vshll.u32 %v12173_v19, 16  ;;  %v62_v29 = vld [vmem:[%s17113_s0 + $0xc] sm:$0xf] }
   0x8   :  { %v175_v26 = vor.u32 %v174_v18, %v170_v17  ;;  %11600 = vmatprep.subr.msk.bf16.mxu0 %vm1119_vm0, %v12178_v24  ;;  %v63_v30 = vld [vmem:[%s17113_s0 + $0x10] sm:$0xf]  ;;  %v17250_v31 = vsel %vm12191_vm3, 4294967295, %v17249_v31  ;;  %vm1022_vm4 = vcmask 64512   ;;  %v3479_v32 = vrot.slane %v3477_v21, 4 }
   0x9   :  { %17251 = vst [vmem:[#allocation10_spill] sm:$0xff] %v17250_v31  ;;  %v3482_v33 = vrot.slane %v3480_v22, 5  ;;  %v3488_v34 = vrot.slane %v3486_v23, 5  ;;  %v166_v35 = vrot.slane %v165_v25, 4  ;;  %v3492_v37 = vrot.slane %v3490_v27, 4 }
   0xa   :  { %v176_v36 = vrot.slane %v175_v26, 4  ;;  %v3498_v38 = vrot.slane %v3496_v28, 5  ;;  %v64_v40 = vld [vmem:[%s17113_s0 + $0x14] sm:$0x1]  ;;  %v183_v41 = vshrl.u32 %v62_v29, 16  ;;  %v186_v42 = vshll.u32 %v62_v29, 16 }
   0xb   :  { %v3483_v39 = vor.u32 %v3482_v33, %v3479_v32  ;;  %v192_v43 = vshll.u32 %v63_v30, 16  ;;  %v171_v44 = vsel %vm12191_vm3, %v166_v35, %v170_v17  ;;  %v3493_v46 = vor.u32 %v3492_v37, %v3488_v34  ;;  %v9233_v56 = vld [vmem:[%s17113_s0 + $0x18c] sm:$0xf]  ;;  %v12212_v60 = vld [vmem:[%s17113_s0 + $0x190] sm:$0xf] }
   0xc   :  { %v181_v45 = vsel %vm12191_vm3, %v176_v36, %v180_v20  ;;  %v196_v47 = vshrl.u32 %v63_v30, 16  ;;  %v185_v50 = vrot.slane %v183_v41, 4  ;;  %v188_v51 = vrot.slane %v186_v42, 5  ;;  %v12217_v61 = vld [vmem:[%s17113_s0 + $0x194] sm:$0x1] }
   0xd   :  { %v9006_v48 = vcombine.low %v171_v44, %v181_v45  ;;  %v3484_v49 = vrot.slane %v3483_v39, 4  ;;  %v3494_v52 = vrot.slane %v3493_v46, 4  ;;  %v194_v53 = vrot.slane %v192_v43, 5  ;;  %v65_v7 = vld [vmem:[%s17113_s0 + $0x18] sm:$0xf] }
   0xe   :  { %v198_v54 = vrot.slane %v196_v47, 4  ;;  %v202_v55 = vshll.u32 %v64_v40, 16  ;;  %v4829_v58 = vrot.slane %v12173_v19, 5  ;;  %v189_v59 = vor.u32 %v188_v51, %v185_v50  ;;  %v66_v13 = vld [vmem:[%s17113_s0 + $0x1c] sm:$0xf] }
   0xf   :  { %10488 = vmatprep.mubr.msk.bf16.mxu1 %vm1022_vm4, %v9006_v48  ;;  %v3489_v57 = vsel %vm12191_vm3, %v3484_v49, %v3488_v34  ;;  %v3499_v62 = vsel %vm12191_vm3, %v3494_v52, %v3498_v38  ;;  %v1669_v1 = vsel %vm1119_vm0, %v50_v11, 0  ;;  %v3501_v5 = vshrl.u32 %v9233_v56, 16  ;;  %v67_v17 = vld [vmem:[%s17113_s0 + $0x20] sm:$0x1]  ;;  %v9236_v23 = vld [vmem:[%s17113_s0 + $0x198] sm:$0xf] }
  0x10   :  { %v199_v63 = vor.u32 %v198_v54, %v194_v53  ;;  %v204_v0 = vrot.slane %v202_v55, 5  ;;  %v9390_v2 = vcombine.low %v3489_v57, %v3499_v62  ;;  %v190_v4 = vrot.slane %v189_v59, 4  ;;  %v9237_v37 = vld [vmem:[%s17113_s0 + $0x19c] sm:$0xf]  ;;  %v68_v47 = vld [vmem:[%s17113_s0 + $0x24] sm:$0xf] }
  0x11   :  { %v3504_v6 = vshll.u32 %v9233_v56, 16  ;;  %v3510_v9 = vshll.u32 %v12212_v60, 16  ;;  %v3514_v10 = vshrl.u32 %v12212_v60, 16  ;;  %v3520_v12 = vshll.u32 %v12217_v61, 16  ;;  %v69_v56 = vld [vmem:[%s17113_s0 + $0x28] sm:$0xf] }
  0x12   :  { %v200_v8 = vrot.slane %v199_v63, 4  ;;  %10752 = vmatprep.mubr.msk.bf16.mxu0 %vm1022_vm4, %v9390_v2  ;;  %v195_v11 = vsel %vm12191_vm3, %v190_v4, %v194_v53  ;;  %v3503_v14 = vrot.slane %v3501_v5, 4  ;;  %v4833_v16 = vrot.slane %v12212_v60, 5  ;;  %v70_v4 = vld [vmem:[%s17113_s0 + $0x2c] sm:$0x1] }
  0x13   :  { %v3506_v15 = vrot.slane %v3504_v6, 5  ;;  %v3512_v20 = vrot.slane %v3510_v9, 5  ;;  %v3516_v21 = vrot.slane %v3514_v10, 4  ;;  %v3522_v22 = vrot.slane %v3520_v12, 5  ;;  %v9239_v10 = vld [vmem:[%s17113_s0 + $0x1a4] sm:$0xf] }
  0x14   :  { %v205_v18 = vsel %vm12191_vm3, %v200_v8, %v204_v0  ;;  %v4836_v27 = vrot.slane %v12217_v61, 5  ;;  %v5241_v28 = vsel %vm1119_vm0, %v12178_v24, 0  ;;  %v207_v30 = vshrl.u32 %v65_v7, 16  ;;  %v9238_v24 = vld [vmem:[%s17113_s0 + $0x1a0] sm:$0x1] }
  0x15   :  { %v9007_v25 = vcombine.low %v195_v11, %v205_v18  ;;  %v3507_v26 = vor.u32 %v3506_v15, %v3503_v14  ;;  %v3517_v29 = vor.u32 %v3516_v21, %v3512_v20  ;;  %v210_v32 = vshll.u32 %v65_v7, 16  ;;  %v9240_v15 = vld [vmem:[%s17113_s0 + $0x1a8] sm:$0xf] }
  0x16   :  { %v216_v33 = vshll.u32 %v66_v13, 16  ;;  %v220_v35 = vshrl.u32 %v66_v13, 16  ;;  %v226_v36 = vshll.u32 %v67_v17, 16  ;;  %v3525_v38 = vshrl.u32 %v9236_v23, 16 }
  0x17   :  { %10489 = vmatmul.mubr.msk.bf16.vlgmr.msra.gmra.mrb[0].mxu1 %vm1022_vm4, %v9007_v25  ;;  %v3508_v34 = vrot.slane %v3507_v26, 4  ;;  %v3518_v39 = vrot.slane %v3517_v29, 4  ;;  %v209_v40 = vrot.slane %v207_v30, 4  ;;  %v212_v41 = vrot.slane %v210_v32, 5  ;;  %v9241_v26 = vld [vmem:[%s17113_s0 + $0x1ac] sm:$0x1] }
  0x18   :  { %10553 = vmatpush3.bf16.msra.mxu1 %v1669_v1  ;;  %v218_v42 = vrot.slane %v216_v33, 5  ;;  %v222_v44 = vrot.slane %v220_v35, 4  ;;  %v228_v45 = vrot.slane %v226_v36, 5  ;;  %v3527_v46 = vrot.slane %v3525_v38, 4 }
  0x19   :  { %v3513_v43 = vsel %vm12191_vm3, %v3508_v34, %v3512_v20  ;;  %v3523_v48 = vsel %vm12191_vm3, %v3518_v39, %v3522_v22  ;;  %v213_v49 = vor.u32 %v212_v41, %v209_v40  ;;  %v3528_v50 = vshll.u32 %v9236_v23, 16  ;;  %v71_v34 = vld [vmem:[%s17113_s0 + $0x30] sm:$0xf]  ;;  %v72_v39 = vld [vmem:[%s17113_s0 + $0x34] sm:$0xf] }
  0x1a   :  { %v3534_v51 = vshll.u32 %v9237_v37, 16  ;;  %v9391_v52 = vcombine.low %v3513_v43, %v3523_v48  ;;  %v223_v53 = vor.u32 %v222_v44, %v218_v42  ;;  %v3538_v54 = vshrl.u32 %v9237_v37, 16 }
  0x1b   :  { %v3544_v55 = vshll.u32 %v9238_v24, 16  ;;  %v214_v57 = vrot.slane %v213_v49, 4  ;;  %v3530_v59 = vrot.slane %v3528_v50, 5  ;;  %v231_v63 = vshrl.u32 %v68_v47, 16 }
  0x1c   :  { %v3536_v62 = vrot.slane %v3534_v51, 5  ;;  %10753 = vmatmul.mubr.msk.bf16.vlgmr.msra.gmra.mrb[0].mxu0 %vm1022_vm4, %v9391_v52  ;;  %v224_v0 = vrot.slane %v223_v53, 4  ;;  %v3540_v1 = vrot.slane %v3538_v54, 4  ;;  %v234_v5 = vshll.u32 %v68_v47, 16  ;;  %v9242_v52 = vld [vmem:[%s17113_s0 + $0x1b0] sm:$0xf] }
  0x1d   :  { %v3546_v2 = vrot.slane %v3544_v55, 5  ;;  %10817 = vmatpush3.bf16.msra.mxu0 %v5241_v28  ;;  %v219_v6 = vsel %vm12191_vm3, %v214_v57, %v218_v42  ;;  %v3531_v7 = vor.u32 %v3530_v59, %v3527_v46  ;;  %v233_v8 = vrot.slane %v231_v63, 4  ;;  %v73_v46 = vld [vmem:[%s17113_s0 + $0x38] sm:$0x1] }
  0x1e   :  { %v240_v9 = vshll.u32 %v69_v56, 16  ;;  %v229_v12 = vsel %vm12191_vm3, %v224_v0, %v228_v45  ;;  %v3541_v13 = vor.u32 %v3540_v1, %v3536_v62  ;;  %v236_v11 = vrot.slane %v234_v5, 5  ;;  %v9243_v0 = vld [vmem:[%s17113_s0 + $0x1b4] sm:$0xf] }
  0x1f   :  { %v244_v14 = vshrl.u32 %v69_v56, 16  ;;  %v9008_v17 = vcombine.low %v219_v6, %v229_v12  ;;  %v3532_v18 = vrot.slane %v3531_v7, 4  ;;  %v250_v21 = vshll.u32 %v70_v4, 16 }
  0x20   :  { %v242_v20 = vrot.slane %v240_v9, 5  ;;  %v3542_v22 = vrot.slane %v3541_v13, 4  ;;  %v237_v23 = vor.u32 %v236_v11, %v233_v8  ;;  %v3549_v28 = vshrl.u32 %v9239_v10, 16  ;;  %v9244_v9 = vld [vmem:[%s17113_s0 + $0x1b8] sm:$0x1] }
  0x21   :  { %v246_v25 = vrot.slane %v244_v14, 4  ;;  %10492 = vmatprep.mubr.msk.bf16.mxu1 %vm1022_vm4, %v9008_v17  ;;  %v3537_v29 = vsel %vm12191_vm3, %v3532_v18, %v3536_v62  ;;  %v252_v30 = vrot.slane %v250_v21, 5  ;;  %v3552_v32 = vshll.u32 %v9239_v10, 16 }
  0x22   :  { %v3558_v33 = vshll.u32 %v9240_v15, 16  ;;  %v3547_v35 = vsel %vm12191_vm3, %v3542_v22, %v3546_v2  ;;  %v238_v36 = vrot.slane %v237_v23, 4  ;;  %v3551_v38 = vrot.slane %v3549_v28, 4  ;;  %v75_v22 = vld [vmem:[%s17113_s0 + $0x40] sm:$0xf] }
  0x23   :  { %v247_v37 = vor.u32 %v246_v25, %v242_v20  ;;  %v9392_v40 = vcombine.low %v3537_v29, %v3547_v35  ;;  %v3554_v41 = vrot.slane %v3552_v32, 5  ;;  %v3562_v24 = vshrl.u32 %v9240_v15, 16  ;;  %v74_v15 = vld [vmem:[%s17113_s0 + $0x3c] sm:$0xf] }
  0x24   :  { %v3560_v42 = vrot.slane %v3558_v33, 5  ;;  %v243_v43 = vsel %vm12191_vm3, %v238_v36, %v242_v20  ;;  %v3568_v45 = vshll.u32 %v9241_v26, 16  ;;  %v255_v47 = vshrl.u32 %v71_v34, 16  ;;  %v76_v33 = vld [vmem:[%s17113_s0 + $0x44] sm:$0x1] }
  0x25   :  { %v248_v44 = vrot.slane %v247_v37, 4  ;;  %10756 = vmatprep.mubr.msk.bf16.mxu0 %vm1022_vm4, %v9392_v40  ;;  %v3555_v48 = vor.u32 %v3554_v41, %v3551_v38  ;;  %v3564_v49 = vrot.slane %v3562_v24, 4  ;;  %v258_v50 = vshll.u32 %v71_v34, 16 }
  0x26   :  { %v264_v51 = vshll.u32 %v72_v39, 16  ;;  %v3570_v54 = vrot.slane %v3568_v45, 5  ;;  %v257_v55 = vrot.slane %v255_v47, 4  ;;  %v268_v56 = vshrl.u32 %v72_v39, 16  ;;  %v9245_v39 = vld [vmem:[%s17113_s0 + $0x1bc] sm:$0xf] }
  0x27   :  { %v253_v53 = vsel %vm12191_vm3, %v248_v44, %v252_v30  ;;  %v3556_v59 = vrot.slane %v3555_v48, 4  ;;  %v3565_v62 = vor.u32 %v3564_v49, %v3560_v42  ;;  %v260_v63 = vrot.slane %v258_v50, 5  ;;  %v9247_v50 = vld [vmem:[%s17113_s0 + $0x1c4] sm:$0x1] }
  0x28   :  { %v9009_v57 = vcombine.low %v243_v43, %v253_v53  ;;  %v266_v1 = vrot.slane %v264_v51, 5  ;;  %v270_v2 = vrot.slane %v268_v56, 4  ;;  %v274_v4 = vshll.u32 %v73_v46, 16  ;;  %v9246_v43 = vld [vmem:[%s17113_s0 + $0x1c0] sm:$0xf] }
  0x29   :  { %v3573_v5 = vshrl.u32 %v9242_v52, 16  ;;  %v3561_v6 = vsel %vm12191_vm3, %v3556_v59, %v3560_v42  ;;  %v3566_v7 = vrot.slane %v3565_v62, 4  ;;  %v261_v8 = vor.u32 %v260_v63, %v257_v55 }
  0x2a   :  { %10493 = vmatmul.mubr.msk.bf16.gmra.mrb[4].mxu1 %vm1022_vm4, %v9009_v57  ;;  %v3576_v10 = vshll.u32 %v9242_v52, 16  ;;  %v271_v12 = vor.u32 %v270_v2, %v266_v1  ;;  %v276_v13 = vrot.slane %v274_v4, 5  ;;  %v3582_v14 = vshll.u32 %v9243_v0, 16  ;;  %v77_v57 = vld [vmem:[%s17113_s0 + $0x48] sm:$0xf] }
  0x2b   :  { %v3575_v11 = vrot.slane %v3573_v5, 4  ;;  %v3571_v17 = vsel %vm12191_vm3, %v3566_v7, %v3570_v54  ;;  %v262_v18 = vrot.slane %v261_v8, 4  ;;  %v3586_v21 = vshrl.u32 %v9243_v0, 16 }
  0x2c   :  { %v3578_v20 = vrot.slane %v3576_v10, 5  ;;  %v9393_v23 = vcombine.low %v3561_v6, %v3571_v17  ;;  %v272_v25 = vrot.slane %v271_v12, 4  ;;  %v3584_v26 = vrot.slane %v3582_v14, 5 }
  0x2d   :  { %v3592_v28 = vshll.u32 %v9244_v9, 16  ;;  %v267_v29 = vsel %vm12191_vm3, %v262_v18, %v266_v1  ;;  %v3588_v32 = vrot.slane %v3586_v21, 4  ;;  %v279_v34 = vshrl.u32 %v74_v15, 16  ;;  %v78_v1 = vld [vmem:[%s17113_s0 + $0x4c] sm:$0xf] }
  0x2e   :  { %v3579_v30 = vor.u32 %v3578_v20, %v3575_v11  ;;  %10757 = vmatmul.mubr.msk.bf16.gmra.mrb[4].mxu0 %vm1022_vm4, %v9393_v23  ;;  %v277_v35 = vsel %vm12191_vm3, %v272_v25, %v276_v13  ;;  %v282_v37 = vshll.u32 %v74_v15, 16  ;;  %v288_v38 = vshll.u32 %v75_v22, 16  ;;  %v79_v11 = vld [vmem:[%s17113_s0 + $0x50] sm:$0x1] }
  0x2f   :  { %v3594_v36 = vrot.slane %v3592_v28, 5  ;;  %v9010_v40 = vcombine.low %v267_v29, %v277_v35  ;;  %v3589_v42 = vor.u32 %v3588_v32, %v3584_v26  ;;  %v281_v24 = vrot.slane %v279_v34, 4  ;;  %v9249_v29 = vld [vmem:[%s17113_s0 + $0x1cc] sm:$0xf] }
  0x30   :  { %v3580_v41 = vrot.slane %v3579_v30, 4  ;;  %v284_v44 = vrot.slane %v282_v37, 5  ;;  %v290_v45 = vrot.slane %v288_v38, 5  ;;  %v292_v46 = vshrl.u32 %v75_v22, 16  ;;  %v9248_v22 = vld [vmem:[%s17113_s0 + $0x1c8] sm:$0xf] }
  0x31   :  { %v298_v47 = vshll.u32 %v76_v33, 16  ;;  %10496 = vmatprep.mubr.msk.bf16.mxu1 %vm1022_vm4, %v9010_v40  ;;  %v3590_v49 = vrot.slane %v3589_v42, 4  ;;  %v3597_v51 = vshrl.u32 %v9245_v39, 16  ;;  %v3600_v52 = vshll.u32 %v9245_v39, 16  ;;  %v9250_v37 = vld [vmem:[%s17113_s0 + $0x1d0] sm:$0x1] }
  0x32   :  { %v3585_v48 = vsel %vm12191_vm3, %v3580_v41, %v3584_v26  ;;  %v285_v53 = vor.u32 %v284_v44, %v281_v24  ;;  %v294_v54 = vrot.slane %v292_v46, 4  ;;  %v3606_v56 = vshll.u32 %v9246_v43, 16 }
  0x33   :  { %v300_v55 = vrot.slane %v298_v47, 5  ;;  %v3595_v59 = vsel %vm12191_vm3, %v3590_v49, %v3594_v36  ;;  %v3599_v62 = vrot.slane %v3597_v51, 4  ;;  %v3602_v63 = vrot.slane %v3600_v52, 5 }
  0x34   :  { %v3610_v0 = vshrl.u32 %v9246_v43, 16  ;;  %v9394_v2 = vcombine.low %v3585_v48, %v3595_v59  ;;  %v286_v4 = vrot.slane %v285_v53, 4  ;;  %v295_v5 = vor.u32 %v294_v54, %v290_v45  ;;  %v80_v43 = vld [vmem:[%s17113_s0 + $0x54] sm:$0xf]  ;;  %v81_v48 = vld [vmem:[%s17113_s0 + $0x58] sm:$0xf] }
  0x35   :  { %v3608_v6 = vrot.slane %v3606_v56, 5  ;;  %v3603_v7 = vor.u32 %v3602_v63, %v3599_v62  ;;  %v3616_v9 = vshll.u32 %v9247_v50, 16  ;;  %v303_v10 = vshrl.u32 %v77_v57, 16  ;;  %v82_v63 = vld [vmem:[%s17113_s0 + $0x5c] sm:$0x1] }
  0x36   :  { %v3612_v8 = vrot.slane %v3610_v0, 4  ;;  %10760 = vmatprep.mubr.msk.bf16.mxu0 %vm1022_vm4, %v9394_v2  ;;  %v291_v12 = vsel %vm12191_vm3, %v286_v4, %v290_v45  ;;  %v296_v13 = vrot.slane %v295_v5, 4  ;;  %v306_v14 = vshll.u32 %v77_v57, 16 }
  0x37   :  { %v312_v15 = vshll.u32 %v78_v1, 16  ;;  %v3604_v17 = vrot.slane %v3603_v7, 4  ;;  %v3618_v20 = vrot.slane %v3616_v9, 5  ;;  %v305_v21 = vrot.slane %v303_v10, 4  ;;  %v9252_v7 = vld [vmem:[%s17113_s0 + $0x1d8] sm:$0xf] }
  0x38   :  { %v3613_v18 = vor.u32 %v3612_v8, %v3608_v6  ;;  %v301_v23 = vsel %vm12191_vm3, %v296_v13, %v300_v55  ;;  %v308_v25 = vrot.slane %v306_v14, 5  ;;  %v316_v28 = vshrl.u32 %v78_v1, 16  ;;  %v9251_v1 = vld [vmem:[%s17113_s0 + $0x1d4] sm:$0xf] }
  0x39   :  { %v314_v26 = vrot.slane %v312_v15, 5  ;;  %v9011_v30 = vcombine.low %v291_v12, %v301_v23  ;;  %v3609_v32 = vsel %vm12191_vm3, %v3604_v17, %v3608_v6  ;;  %v322_v34 = vshll.u32 %v79_v11, 16  ;;  %v83_v23 = vld [vmem:[%s17113_s0 + $0x60] sm:$0xf] }
  0x3a   :  { %v3614_v33 = vrot.slane %v3613_v18, 4  ;;  %v309_v35 = vor.u32 %v308_v25, %v305_v21  ;;  %v318_v36 = vrot.slane %v316_v28, 4  ;;  %v3621_v38 = vshrl.u32 %v9248_v22, 16 }
  0x3b   :  { %v3624_v39 = vshll.u32 %v9248_v22, 16  ;;  %10497 = vmatmul.mubr.msk.bf16.gmra.mrb[8].mxu1 %vm1022_vm4, %v9011_v30  ;;  %v324_v41 = vrot.slane %v322_v34, 5  ;;  %v3630_v42 = vshll.u32 %v9249_v29, 16  ;;  %v3634_v24 = vshrl.u32 %v9249_v29, 16  ;;  %v84_v30 = vld [vmem:[%s17113_s0 + $0x64] sm:$0xf] }
  0x3c   :  { %v3619_v40 = vsel %vm12191_vm3, %v3614_v33, %v3618_v20  ;;  %v310_v45 = vrot.slane %v309_v35, 4  ;;  %v319_v46 = vor.u32 %v318_v36, %v314_v26  ;;  %v3623_v47 = vrot.slane %v3621_v38, 4  ;;  %v9253_v20 = vld [vmem:[%s17113_s0 + $0x1dc] sm:$0x1] }
  0x3d   :  { %v9395_v44 = vcombine.low %v3609_v32, %v3619_v40  ;;  %v3626_v49 = vrot.slane %v3624_v39, 5  ;;  %v3632_v50 = vrot.slane %v3630_v42, 5  ;;  %v3636_v51 = vrot.slane %v3634_v24, 4  ;;  %v85_v39 = vld [vmem:[%s17113_s0 + $0x68] sm:$0x1] }
  0x3e   :  { %v3640_v52 = vshll.u32 %v9250_v37, 16  ;;  %v315_v53 = vsel %vm12191_vm3, %v310_v45, %v314_v26  ;;  %v320_v54 = vrot.slane %v319_v46, 4  ;;  %v327_v55 = vshrl.u32 %v80_v43, 16 }
  0x3f   :  { %10761 = vmatmul.mubr.msk.bf16.gmra.mrb[8].mxu0 %vm1022_vm4, %v9395_v44  ;;  %v330_v56 = vshll.u32 %v80_v43, 16  ;;  %v3627_v57 = vor.u32 %v3626_v49, %v3623_v47  ;;  %v3637_v59 = vor.u32 %v3636_v51, %v3632_v50  ;;  %v336_v0 = vshll.u32 %v81_v48, 16  ;;  %v9254_v44 = vld [vmem:[%s17113_s0 + $0x1e0] sm:$0xf] }
  0x40   :  { %v3642_v62 = vrot.slane %v3640_v52, 5  ;;  %v325_v2 = vsel %vm12191_vm3, %v320_v54, %v324_v41  ;;  %v329_v4 = vrot.slane %v327_v55, 4  ;;  %v340_v6 = vshrl.u32 %v81_v48, 16 }
  0x41   :  { %v332_v5 = vrot.slane %v330_v56, 5  ;;  %v9012_v8 = vcombine.low %v315_v53, %v325_v2  ;;  %v3628_v9 = vrot.slane %v3627_v57, 4  ;;  %v3638_v10 = vrot.slane %v3637_v59, 4  ;;  %v9255_v53 = vld [vmem:[%s17113_s0 + $0x1e4] sm:$0xf] }
  0x42   :  { %v338_v12 = vrot.slane %v336_v0, 5  ;;  %v342_v11 = vrot.slane %v340_v6, 4  ;;  %v346_v14 = vshll.u32 %v82_v63, 16  ;;  %v3645_v15 = vshrl.u32 %v9251_v1, 16  ;;  %v9256_v0 = vld [vmem:[%s17113_s0 + $0x1e8] sm:$0x1] }
  0x43   :  { %v333_v13 = vor.u32 %v332_v5, %v329_v4  ;;  %10500 = vmatprep.mubr.msk.bf16.mxu1 %vm1022_vm4, %v9012_v8  ;;  %v3633_v17 = vsel %vm12191_vm3, %v3628_v9, %v3632_v50  ;;  %v3643_v18 = vsel %vm12191_vm3, %v3638_v10, %v3642_v62  ;;  %v3648_v21 = vshll.u32 %v9251_v1, 16 }
  0x44   :  { %v3654_v22 = vshll.u32 %v9252_v7, 16  ;;  %v9396_v25 = vcombine.low %v3633_v17, %v3643_v18  ;;  %v343_v28 = vor.u32 %v342_v11, %v338_v12  ;;  %v348_v29 = vrot.slane %v346_v14, 5  ;;  %v12434_v18 = vld [vmem:[%s17114_s1 + $0x18] sm:$0xf] }
  0x45   :  { %v334_v26 = vrot.slane %v333_v13, 4  ;;  %v3647_v32 = vrot.slane %v3645_v15, 4  ;;  %v3650_v33 = vrot.slane %v3648_v21, 5  ;;  %v3658_v35 = vshrl.u32 %v9252_v7, 16  ;;  %v86_v7 = vld [vmem:[%s17113_s0 + $0x6c] sm:$0xf]  ;;  %11601 = vmatprep.subr.msk.bf16.mxu0 %vm1119_vm0, %v12434_v18 }
  0x46   :  { %v3656_v34 = vrot.slane %v3654_v22, 5  ;;  %10764 = vmatprep.mubr.msk.bf16.mxu0 %vm1022_vm4, %v9396_v25  ;;  %v344_v37 = vrot.slane %v343_v28, 4  ;;  %v3664_v38 = vshll.u32 %v9253_v20, 16  ;;  %v351_v40 = vshrl.u32 %v83_v23, 16  ;;  %v87_v13 = vld [vmem:[%s17113_s0 + $0x70] sm:$0xf] }
  0x47   :  { %v339_v36 = vsel %vm12191_vm3, %v334_v26, %v338_v12  ;;  %v3651_v41 = vor.u32 %v3650_v33, %v3647_v32  ;;  %v3660_v42 = vrot.slane %v3658_v35, 4  ;;  %v354_v24 = vshll.u32 %v83_v23, 16  ;;  %v88_v23 = vld [vmem:[%s17113_s0 + $0x74] sm:$0x1]  ;;  %v9257_v32 = vld [vmem:[%s17113_s0 + $0x1ec] sm:$0xf] }
  0x48   :  { %v360_v43 = vshll.u32 %v84_v30, 16  ;;  %v349_v45 = vsel %vm12191_vm3, %v344_v37, %v348_v29  ;;  %v3666_v46 = vrot.slane %v3664_v38, 5  ;;  %v353_v47 = vrot.slane %v351_v40, 4  ;;  %v9258_v37 = vld [vmem:[%s17113_s0 + $0x1f0] sm:$0xf] }
  0x49   :  { %v364_v48 = vshrl.u32 %v84_v30, 16  ;;  %v9013_v49 = vcombine.low %v339_v36, %v349_v45  ;;  %v3652_v50 = vrot.slane %v3651_v41, 4  ;;  %v3661_v51 = vor.u32 %v3660_v42, %v3656_v34 }
  0x4a   :  { %v356_v52 = vrot.slane %v354_v24, 5  ;;  %v362_v54 = vrot.slane %v360_v43, 5  ;;  %v370_v56 = vshll.u32 %v85_v39, 16  ;;  %v3669_v57 = vshrl.u32 %v9254_v44, 16  ;;  %v9259_v43 = vld [vmem:[%s17113_s0 + $0x1f4] sm:$0x1] }
  0x4b   :  { %v366_v55 = vrot.slane %v364_v48, 4  ;;  %10501 = vmatmul.mubr.msk.bf16.gmra.mrb[12].mxu1 %vm1022_vm4, %v9013_v49  ;;  %v3657_v59 = vsel %vm12191_vm3, %v3652_v50, %v3656_v34  ;;  %v3662_v62 = vrot.slane %v3661_v51, 4  ;;  %v3672_v1 = vshll.u32 %v9254_v44, 16  ;;  %v89_v50 = vld [vmem:[%s17113_s0 + $0x78] sm:$0xf] }
  0x4c   :  { %v357_v63 = vor.u32 %v356_v52, %v353_v47  ;;  %v372_v4 = vrot.slane %v370_v56, 5  ;;  %v3671_v5 = vrot.slane %v3669_v57, 4  ;;  %v3678_v6 = vshll.u32 %v9255_v53, 16 }
  0x4d   :  { %v367_v2 = vor.u32 %v366_v55, %v362_v54  ;;  %v3667_v8 = vsel %vm12191_vm3, %v3662_v62, %v3666_v46  ;;  %v3674_v10 = vrot.slane %v3672_v1, 5  ;;  %v3682_v12 = vshrl.u32 %v9255_v53, 16  ;;  %v90_v55 = vld [vmem:[%s17113_s0 + $0x7c] sm:$0xf] }
  0x4e   :  { %v358_v9 = vrot.slane %v357_v63, 4  ;;  %v9397_v11 = vcombine.low %v3657_v59, %v3667_v8  ;;  %v3680_v15 = vrot.slane %v3678_v6, 5  ;;  %v3688_v17 = vshll.u32 %v9256_v0, 16  ;;  %v91_v6 = vld [vmem:[%s17113_s0 + $0x80] sm:$0x1] }
  0x4f   :  { %v368_v14 = vrot.slane %v367_v2, 4  ;;  %v3675_v21 = vor.u32 %v3674_v10, %v3671_v5  ;;  %v3684_v22 = vrot.slane %v3682_v12, 4  ;;  %v375_v25 = vshrl.u32 %v86_v7, 16 }
  0x50   :  { %v363_v20 = vsel %vm12191_vm3, %v358_v9, %v362_v54  ;;  %10765 = vmatmul.mubr.msk.bf16.gmra.mrb[12].mxu0 %vm1022_vm4, %v9397_v11  ;;  %v3690_v28 = vrot.slane %v3688_v17, 5  ;;  %v378_v29 = vshll.u32 %v86_v7, 16  ;;  %v384_v30 = vshll.u32 %v87_v13, 16  ;;  %v9260_v11 = vld [vmem:[%s17113_s0 + $0x1f8] sm:$0xf] }
  0x51   :  { %v373_v26 = vsel %vm12191_vm3, %v368_v14, %v372_v4  ;;  %v3676_v34 = vrot.slane %v3675_v21, 4  ;;  %v3685_v35 = vor.u32 %v3684_v22, %v3680_v15  ;;  %v377_v36 = vrot.slane %v375_v25, 4  ;;  %v9261_v21 = vld [vmem:[%s17113_s0 + $0x1fc] sm:$0xf] }
  0x52   :  { %v9014_v33 = vcombine.low %v363_v20, %v373_v26  ;;  %v380_v38 = vrot.slane %v378_v29, 5  ;;  %v386_v39 = vrot.slane %v384_v30, 5  ;;  %v388_v40 = vshrl.u32 %v87_v13, 16  ;;  %v9262_v30 = vld [vmem:[%s17113_s0 + $0x200] sm:$0x1] }
  0x53   :  { %v394_v41 = vshll.u32 %v88_v23, 16  ;;  %v3681_v42 = vsel %vm12191_vm3, %v3676_v34, %v3680_v15  ;;  %v3686_v24 = vrot.slane %v3685_v35, 4  ;;  %v3693_v44 = vshrl.u32 %v9257_v32, 16 }
  0x54   :  { %10504 = vmatprep.mubr.msk.bf16.mxu1 %vm1022_vm4, %v9014_v33  ;;  %v3696_v45 = vshll.u32 %v9257_v32, 16  ;;  %v381_v46 = vor.u32 %v380_v38, %v377_v36  ;;  %v390_v47 = vrot.slane %v388_v40, 4  ;;  %v3702_v49 = vshll.u32 %v9258_v37, 16  ;;  %v92_v38 = vld [vmem:[%s17113_s0 + $0x84] sm:$0xf] }
  0x55   :  { %v396_v48 = vrot.slane %v394_v41, 5  ;;  %v3691_v51 = vsel %vm12191_vm3, %v3686_v24, %v3690_v28  ;;  %v3695_v52 = vrot.slane %v3693_v44, 4  ;;  %v3706_v54 = vshrl.u32 %v9258_v37, 16  ;;  %v93_v24 = vld [vmem:[%s17113_s0 + $0x88] sm:$0xf] }
  0x56   :  { %v3698_v53 = vrot.slane %v3696_v45, 5  ;;  %v9398_v56 = vcombine.low %v3681_v42, %v3691_v51  ;;  %v382_v57 = vrot.slane %v381_v46, 4  ;;  %v391_v59 = vor.u32 %v390_v47, %v386_v39 }
  0x57   :  { %v3704_v62 = vrot.slane %v3702_v49, 5  ;;  %v3708_v0 = vrot.slane %v3706_v54, 4  ;;  %v3712_v1 = vshll.u32 %v9259_v43, 16  ;;  %v399_v2 = vshrl.u32 %v89_v50, 16  ;;  %v94_v54 = vld [vmem:[%s17113_s0 + $0x8c] sm:$0x1] }
  0x58   :  { %v3699_v63 = vor.u32 %v3698_v53, %v3695_v52  ;;  %10768 = vmatprep.mubr.msk.bf16.mxu0 %vm1022_vm4, %v9398_v56  ;;  %v387_v4 = vsel %vm12191_vm3, %v382_v57, %v386_v39  ;;  %v392_v5 = vrot.slane %v391_v59, 4  ;;  %v402_v7 = vshll.u32 %v89_v50, 16  ;;  %v9263_v56 = vld [vmem:[%s17113_s0 + $0x204] sm:$0xf] }
  0x59   :  { %v408_v8 = vshll.u32 %v90_v55, 16  ;;  %v3709_v10 = vor.u32 %v3708_v0, %v3704_v62  ;;  %v3714_v12 = vrot.slane %v3712_v1, 5  ;;  %v401_v13 = vrot.slane %v399_v2, 4  ;;  %v9264_v0 = vld [vmem:[%s17113_s0 + $0x208] sm:$0xf] }
  0x5a   :  { %v3700_v9 = vrot.slane %v3699_v63, 4  ;;  %v397_v14 = vsel %vm12191_vm3, %v392_v5, %v396_v48  ;;  %v404_v15 = vrot.slane %v402_v7, 5  ;;  %v412_v20 = vshrl.u32 %v90_v55, 16 }
  0x5b   :  { %v410_v17 = vrot.slane %v408_v8, 5  ;;  %v9015_v22 = vcombine.low %v387_v4, %v397_v14  ;;  %v3710_v25 = vrot.slane %v3709_v10, 4  ;;  %v418_v26 = vshll.u32 %v91_v6, 16 }
  0x5c   :  { %v3705_v23 = vsel %vm12191_vm3, %v3700_v9, %v3704_v62  ;;  %v405_v28 = vor.u32 %v404_v15, %v401_v13  ;;  %v414_v29 = vrot.slane %v412_v20, 4  ;;  %v3717_v32 = vshrl.u32 %v9260_v11, 16  ;;  %v9265_v13 = vld [vmem:[%s17113_s0 + $0x20c] sm:$0x1]  ;;  %v95_v15 = vld [vmem:[%s17113_s0 + $0x90] sm:$0xf] }
  0x5d   :  { %v3720_v33 = vshll.u32 %v9260_v11, 16  ;;  %10505 = vmatmul.mubr.msk.bf16.gmra.mrb[16].mxu1 %vm1022_vm4, %v9015_v22  ;;  %v3715_v34 = vsel %vm12191_vm3, %v3710_v25, %v3714_v12  ;;  %v420_v35 = vrot.slane %v418_v26, 5  ;;  %v3726_v36 = vshll.u32 %v9261_v21, 16 }
  0x5e   :  { %v3730_v37 = vshrl.u32 %v9261_v21, 16  ;;  %v9399_v39 = vcombine.low %v3705_v23, %v3715_v34  ;;  %v406_v40 = vrot.slane %v405_v28, 4  ;;  %v415_v41 = vor.u32 %v414_v29, %v410_v17  ;;  %v96_v23 = vld [vmem:[%s17113_s0 + $0x94] sm:$0xf]  ;;  %v97_v34 = vld [vmem:[%s17113_s0 + $0x98] sm:$0x1] }
  0x5f   :  { %v3719_v42 = vrot.slane %v3717_v32, 4  ;;  %v3722_v43 = vrot.slane %v3720_v33, 5  ;;  %v3728_v44 = vrot.slane %v3726_v36, 5  ;;  %v3736_v46 = vshll.u32 %v9262_v30, 16 }
  0x60   :  { %v3732_v45 = vrot.slane %v3730_v37, 4  ;;  %10769 = vmatmul.mubr.msk.bf16.gmra.mrb[16].mxu0 %vm1022_vm4, %v9399_v39  ;;  %v411_v47 = vsel %vm12191_vm3, %v406_v40, %v410_v17  ;;  %v416_v48 = vrot.slane %v415_v41, 4  ;;  %v423_v49 = vshrl.u32 %v92_v38, 16  ;;  %v9266_v40 = vld [vmem:[%s17113_s0 + $0x210] sm:$0xf] }
  0x61   :  { %v426_v50 = vshll.u32 %v92_v38, 16  ;;  %v3723_v51 = vor.u32 %v3722_v43, %v3719_v42  ;;  %v3738_v53 = vrot.slane %v3736_v46, 5  ;;  %v432_v55 = vshll.u32 %v93_v24, 16 }
  0x62   :  { %v3733_v52 = vor.u32 %v3732_v45, %v3728_v44  ;;  %v421_v57 = vsel %vm12191_vm3, %v416_v48, %v420_v35  ;;  %v425_v59 = vrot.slane %v423_v49, 4  ;;  %v436_v63 = vshrl.u32 %v93_v24, 16  ;;  %v9267_v48 = vld [vmem:[%s17113_s0 + $0x214] sm:$0xf] }
  0x63   :  { %v428_v62 = vrot.slane %v426_v50, 5  ;;  %v9016_v1 = vcombine.low %v411_v47, %v421_v57  ;;  %v3724_v2 = vrot.slane %v3723_v51, 4  ;;  %v434_v5 = vrot.slane %v432_v55, 5 }
  0x64   :  { %v3734_v4 = vrot.slane %v3733_v52, 4  ;;  %v438_v7 = vrot.slane %v436_v63, 4  ;;  %v442_v8 = vshll.u32 %v94_v54, 16  ;;  %v3741_v9 = vshrl.u32 %v9263_v56, 16 }
  0x65   :  { %v429_v6 = vor.u32 %v428_v62, %v425_v59  ;;  %10508 = vmatprep.mubr.msk.bf16.mxu1 %vm1022_vm4, %v9016_v1  ;;  %v3729_v10 = vsel %vm12191_vm3, %v3724_v2, %v3728_v44  ;;  %v3744_v11 = vshll.u32 %v9263_v56, 16  ;;  %v3750_v14 = vshll.u32 %v9264_v0, 16  ;;  %v9268_v56 = vld [vmem:[%s17113_s0 + $0x218] sm:$0x1]  ;;  %v98_v1 = vld [vmem:[%s17113_s0 + $0x9c] sm:$0xf] }
  0x66   :  { %v3739_v12 = vsel %vm12191_vm3, %v3734_v4, %v3738_v53  ;;  %v439_v21 = vor.u32 %v438_v7, %v434_v5  ;;  %v444_v22 = vrot.slane %v442_v8, 5  ;;  %v3743_v25 = vrot.slane %v3741_v9, 4  ;;  %v99_v7 = vld [vmem:[%s17113_s0 + $0xa0] sm:$0xf] }
  0x67   :  { %v9400_v17 = vcombine.low %v3729_v10, %v3739_v12  ;;  %v430_v20 = vrot.slane %v429_v6, 4  ;;  %v3746_v26 = vrot.slane %v3744_v11, 5  ;;  %v3752_v28 = vrot.slane %v3750_v14, 5 }
  0x68   :  { %v3754_v29 = vshrl.u32 %v9264_v0, 16  ;;  %v440_v32 = vrot.slane %v439_v21, 4  ;;  %v3760_v33 = vshll.u32 %v9265_v13, 16  ;;  %v447_v35 = vshrl.u32 %v95_v15, 16 }
  0x69   :  { %10772 = vmatprep.mubr.msk.bf16.mxu0 %vm1022_vm4, %v9400_v17  ;;  %v435_v30 = vsel %vm12191_vm3, %v430_v20, %v434_v5  ;;  %v3747_v36 = vor.u32 %v3746_v26, %v3743_v25  ;;  %v450_v38 = vshll.u32 %v95_v15, 16  ;;  %v456_v39 = vshll.u32 %v96_v23, 16  ;;  %v100_v15 = vld [vmem:[%s17113_s0 + $0xa4] sm:$0x1]  ;;  %v9269_v20 = vld [vmem:[%s17113_s0 + $0x21c] sm:$0xf] }
  0x6a   :  { %v3756_v37 = vrot.slane %v3754_v29, 4  ;;  %v445_v41 = vsel %vm12191_vm3, %v440_v32, %v444_v22  ;;  %v3762_v42 = vrot.slane %v3760_v33, 5  ;;  %v449_v24 = vrot.slane %v447_v35, 4  ;;  %v52_v26 = vld [vmem:[%s17114_s1 + $0x8] sm:$0xf] }
  0x6b   :  { %v460_v43 = vshrl.u32 %v96_v23, 16  ;;  %v9017_v44 = vcombine.low %v435_v30, %v445_v41  ;;  %v3748_v45 = vrot.slane %v3747_v36, 4  ;;  %v452_v47 = vrot.slane %v450_v38, 5  ;;  %v9270_v33 = vld [vmem:[%s17113_s0 + $0x220] sm:$0xf]  ;;  %11596 = vmatprep.subr.msk.bf16.mxu1 %vm1119_vm0, %v52_v26 }
  0x6c   :  { %v3757_v46 = vor.u32 %v3756_v37, %v3752_v28  ;;  %v458_v49 = vrot.slane %v456_v39, 5  ;;  %v466_v51 = vshll.u32 %v97_v34, 16  ;;  %v3765_v52 = vshrl.u32 %v9266_v40, 16  ;;  %v9271_v38 = vld [vmem:[%s17113_s0 + $0x224] sm:$0x1] }
  0x6d   :  { %v462_v50 = vrot.slane %v460_v43, 4  ;;  %10509 = vmatmul.mubr.msk.bf16.gmra.mrb[20].mxu1 %vm1022_vm4, %v9017_v44  ;;  %v3753_v53 = vsel %vm12191_vm3, %v3748_v45, %v3752_v28  ;;  %v453_v55 = vor.u32 %v452_v47, %v449_v24  ;;  %v3768_v57 = vshll.u32 %v9266_v40, 16  ;;  %v101_v24 = vld [vmem:[%s17113_s0 + $0xa8] sm:$0xf]  ;;  %v102_v47 = vld [vmem:[%s17113_s0 + $0xac] sm:$0xf] }
  0x6e   :  { %v3758_v54 = vrot.slane %v3757_v46, 4  ;;  %v468_v62 = vrot.slane %v466_v51, 5  ;;  %v3767_v63 = vrot.slane %v3765_v52, 4  ;;  %v3774_v0 = vshll.u32 %v9267_v48, 16 }
  0x6f   :  { %v463_v59 = vor.u32 %v462_v50, %v458_v49  ;;  %v454_v4 = vrot.slane %v453_v55, 4  ;;  %v3770_v5 = vrot.slane %v3768_v57, 5  ;;  %v3778_v6 = vshrl.u32 %v9267_v48, 16 }
  0x70   :  { %v3763_v2 = vsel %vm12191_vm3, %v3758_v54, %v3762_v42  ;;  %v3776_v10 = vrot.slane %v3774_v0, 5  ;;  %v3784_v12 = vshll.u32 %v9268_v56, 16  ;;  %v471_v17 = vshrl.u32 %v98_v1, 16 }
  0x71   :  { %v9401_v8 = vcombine.low %v3753_v53, %v3763_v2  ;;  %v464_v9 = vrot.slane %v463_v59, 4  ;;  %v459_v13 = vsel %vm12191_vm3, %v454_v4, %v458_v49  ;;  %v3771_v11 = vor.u32 %v3770_v5, %v3767_v63 }
  0x72   :  { %v3780_v14 = vrot.slane %v3778_v6, 4  ;;  %v3786_v22 = vrot.slane %v3784_v12, 5  ;;  %v474_v23 = vshll.u32 %v98_v1, 16  ;;  %v480_v25 = vshll.u32 %v99_v7, 16 }
  0x73   :  { %10773 = vmatmul.mubr.msk.bf16.gmra.mrb[20].mxu0 %vm1022_vm4, %v9401_v8  ;;  %v469_v21 = vsel %vm12191_vm3, %v464_v9, %v468_v62  ;;  %v3772_v29 = vrot.slane %v3771_v11, 4  ;;  %v473_v32 = vrot.slane %v471_v17, 4  ;;  %v484_v36 = vshrl.u32 %v99_v7, 16 }
  0x74   :  { %v9018_v28 = vcombine.low %v459_v13, %v469_v21  ;;  %v3781_v30 = vor.u32 %v3780_v14, %v3776_v10  ;;  %v476_v34 = vrot.slane %v474_v23, 5  ;;  %v482_v35 = vrot.slane %v480_v25, 5 }
  0x75   :  { %v490_v37 = vshll.u32 %v100_v15, 16  ;;  %v3777_v39 = vsel %vm12191_vm3, %v3772_v29, %v3776_v10  ;;  %v3789_v41 = vshrl.u32 %v9269_v20, 16  ;;  %v3792_v42 = vshll.u32 %v9269_v20, 16 }
  0x76   :  { %10512 = vmatprep.mubr.msk.bf16.mxu1 %vm1022_vm4, %v9018_v28  ;;  %v3782_v40 = vrot.slane %v3781_v30, 4  ;;  %v477_v43 = vor.u32 %v476_v34, %v473_v32  ;;  %v486_v44 = vrot.slane %v484_v36, 4  ;;  %v3798_v46 = vshll.u32 %v9270_v33, 16 }
  0x77   :  { %v492_v45 = vrot.slane %v490_v37, 5  ;;  %v3791_v49 = vrot.slane %v3789_v41, 4  ;;  %v3794_v50 = vrot.slane %v3792_v42, 5  ;;  %v3802_v51 = vshrl.u32 %v9270_v33, 16 }
  0x78   :  { %v3787_v48 = vsel %vm12191_vm3, %v3782_v40, %v3786_v22 }
  0x79   :  { %11 = vsyncpa [#allocation5], 0  ;;  %v9402_v52 = vcombine.low %v3777_v39, %v3787_v48  ;;  %v478_v53 = vrot.slane %v477_v43, 4  ;;  %v487_v54 = vor.u32 %v486_v44, %v482_v35  ;;  %v3800_v55 = vrot.slane %v3798_v46, 5  ;;  %v103_v1 = vld [vmem:[%s17113_s0 + $0xb0] sm:$0x1] }
  0x7a   :  { %v3795_v56 = vor.u32 %v3794_v50, %v3791_v49  ;;  %v3804_v57 = vrot.slane %v3802_v51, 4  ;;  %v3808_v59 = vshll.u32 %v9271_v38, 16  ;;  %v495_v62 = vshrl.u32 %v101_v24, 16  ;;  %v12591_v9 = vld [vmem:[%s17113_s0 + $0x228] sm:$0xf] }
  0x7b   :  { %10776 = vmatprep.mubr.msk.bf16.mxu0 %vm1022_vm4, %v9402_v52  ;;  %v483_v63 = vsel %vm12191_vm3, %v478_v53, %v482_v35  ;;  %v488_v0 = vrot.slane %v487_v54, 4  ;;  %v498_v2 = vshll.u32 %v101_v24, 16  ;;  %v504_v4 = vshll.u32 %v102_v47, 16  ;;  %v12598_v14 = vld [vmem:[%s17113_s0 + $0x22c] sm:$0xf] }
  0x7c   :  { %v3796_v5 = vrot.slane %v3795_v56, 4  ;;  %v3805_v6 = vor.u32 %v3804_v57, %v3800_v55  ;;  %v3810_v7 = vrot.slane %v3808_v59, 5  ;;  %v497_v8 = vrot.slane %v495_v62, 4  ;;  %v12605_v25 = vld [vmem:[%s17113_s0 + $0x230] sm:$0x1] }
  0x7d   :  { %v493_v10 = vsel %vm12191_vm3, %v488_v0, %v492_v45  ;;  %v500_v12 = vrot.slane %v498_v2, 5  ;;  %v506_v13 = vrot.slane %v504_v4, 5  ;;  %v508_v11 = vshrl.u32 %v102_v47, 16  ;;  %v104_v34 = vld [vmem:[%s17113_s0 + $0xb4] sm:$0xf] }
  0x7e   :  { %v9019_v15 = vcombine.low %v483_v63, %v493_v10  ;;  %v3801_v17 = vsel %vm12191_vm3, %v3796_v5, %v3800_v55  ;;  %v3806_v20 = vrot.slane %v3805_v6, 4  ;;  %v514_v21 = vshll.u32 %v103_v1, 16  ;;  %v105_v39 = vld [vmem:[%s17113_s0 + $0xb8] sm:$0xf]  ;;  %v106_v50 = vld [vmem:[%s17113_s0 + $0xbc] sm:$0x1] }
  0x7f   :  { %v501_v22 = vor.u32 %v500_v12, %v497_v8  ;;  %v510_v23 = vrot.slane %v508_v11, 4  ;;  %v3813_v26 = vshrl.u32 %v12591_v9, 16  ;;  %v3816_v28 = vshll.u32 %v12591_v9, 16  ;;  %v12630_v52 = vld [vmem:[%s17113_s0 + $0x234] sm:$0xf] }
  0x80   :  { %10513 = vmatmul.mubr.msk.bf16.gmra.mrb[24].mxu1 %vm1022_vm4, %v9019_v15  ;;  %v3811_v29 = vsel %vm12191_vm3, %v3806_v20, %v3810_v7  ;;  %v516_v30 = vrot.slane %v514_v21, 5  ;;  %v3822_v32 = vshll.u32 %v12598_v14, 16  ;;  %v3826_v33 = vshrl.u32 %v12598_v14, 16  ;;  %v12637_v57 = vld [vmem:[%s17113_s0 + $0x238] sm:$0xf] }
  0x81   :  { %v9403_v35 = vcombine.low %v3801_v17, %v3811_v29  ;;  %v502_v36 = vrot.slane %v501_v22, 4  ;;  %v511_v37 = vor.u32 %v510_v23, %v506_v13  ;;  %v3815_v38 = vrot.slane %v3813_v26, 4  ;;  %v12648_v8 = vld [vmem:[%s17113_s0 + $0x23c] sm:$0x1]  ;;  %v108_v21 = vld [vmem:[%s17113_s0 + $0xc4] sm:$0xf] }
  0x82   :  { %v3818_v40 = vrot.slane %v3816_v28, 5  ;;  %v3824_v41 = vrot.slane %v3822_v32, 5  ;;  %v3828_v42 = vrot.slane %v3826_v33, 4  ;;  %v3832_v24 = vshll.u32 %v12605_v25, 16  ;;  %v11708_v19 = vld [vmem:[%s17113_s0 + $0x18c] sm:$0xf] }
  0x83   :  { %10777 = vmatmul.mubr.msk.bf16.gmra.mrb[24].mxu0 %vm1022_vm4, %v9403_v35  ;;  %v507_v43 = vsel %vm12191_vm3, %v502_v36, %v506_v13  ;;  %v512_v44 = vrot.slane %v511_v37, 4  ;;  %v519_v45 = vshrl.u32 %v104_v34, 16  ;;  %v522_v46 = vshll.u32 %v104_v34, 16  ;;  %v107_v13 = vld [vmem:[%s17113_s0 + $0xc0] sm:$0xf] }
  0x84   :  { %v3819_v47 = vor.u32 %v3818_v40, %v3815_v38  ;;  %v3829_v48 = vor.u32 %v3828_v42, %v3824_v41  ;;  %v3834_v49 = vrot.slane %v3832_v24, 5  ;;  %v528_v51 = vshll.u32 %v105_v39, 16  ;;  %v109_v36 = vld [vmem:[%s17113_s0 + $0xc8] sm:$0x1]  ;;  %v11709_v61 = vld [vmem:[%s17113_s0 + $0x198] sm:$0xf] }
  0x85   :  { %v517_v53 = vsel %vm12191_vm3, %v512_v44, %v516_v30  ;;  %v521_v54 = vrot.slane %v519_v45, 4  ;;  %v524_v55 = vrot.slane %v522_v46, 5  ;;  %v532_v56 = vshrl.u32 %v105_v39, 16  ;;  %v13680_v3 = vld [vmem:[%s17113_s0 + $0xdc] sm:$0xf] }
  0x86   :  { %v9020_v59 = vcombine.low %v507_v43, %v517_v53  ;;  %v3820_v62 = vrot.slane %v3819_v47, 4  ;;  %v3830_v63 = vrot.slane %v3829_v48, 4  ;;  %v530_v0 = vrot.slane %v528_v51, 5  ;;  %17275 = vst [vmem:[#allocation32_spill] sm:$0xff] %v13680_v3 }
  0x87   :  { %v525_v1 = vor.u32 %v524_v55, %v521_v54  ;;  %v534_v2 = vrot.slane %v532_v56, 4  ;;  %v538_v4 = vshll.u32 %v106_v50, 16  ;;  %v3837_v5 = vshrl.u32 %v12630_v52, 16 }
  0x88   :  { %10516 = vmatprep.mubr.msk.bf16.mxu1 %vm1022_vm4, %v9020_v59  ;;  %v3825_v6 = vsel %vm12191_vm3, %v3820_v62, %v3824_v41  ;;  %v3835_v7 = vsel %vm12191_vm3, %v3830_v63, %v3834_v49  ;;  %v3840_v10 = vshll.u32 %v12630_v52, 16  ;;  %v3846_v12 = vshll.u32 %v12637_v57, 16  ;;  %v110_v49 = vld [vmem:[%s17113_s0 + $0xcc] sm:$0xf]  ;;  %v11706_v59 = vld [vmem:[%s17113_s0 + $0x180] sm:$0xf] }
  0x89   :  { %v9404_v11 = vcombine.low %v3825_v6, %v3835_v7  ;;  %v526_v15 = vrot.slane %v525_v1, 4  ;;  %v535_v17 = vor.u32 %v534_v2, %v530_v0  ;;  %v540_v20 = vrot.slane %v538_v4, 5  ;;  %v11707_v63 = vld [vmem:[%s17113_s0 + $0x184] sm:$0xf]  ;;  %v111_v1 = vld [vmem:[%s17113_s0 + $0xd0] sm:$0xf] }
  0x8a   :  { %v3839_v22 = vrot.slane %v3837_v5, 4  ;;  %v3842_v23 = vrot.slane %v3840_v10, 5  ;;  %v3848_v26 = vrot.slane %v3846_v12, 5  ;;  %v3850_v28 = vshrl.u32 %v12637_v57, 16  ;;  %v112_v5 = vld [vmem:[%s17113_s0 + $0xd4] sm:$0x1] }
  0x8b   :  { %10780 = vmatprep.mubr.msk.bf16.mxu0 %vm1022_vm4, %v9404_v11  ;;  %v531_v29 = vsel %vm12191_vm3, %v526_v15, %v530_v0  ;;  %v536_v30 = vrot.slane %v535_v17, 4  ;;  %v3856_v32 = vshll.u32 %v12648_v8, 16  ;;  %v543_v33 = vshrl.u32 %v107_v13, 16 }
  0x8c   :  { %v3843_v34 = vor.u32 %v3842_v23, %v3839_v22  ;;  %v3852_v35 = vrot.slane %v3850_v28, 4  ;;  %v546_v37 = vshll.u32 %v107_v13, 16  ;;  %v552_v38 = vshll.u32 %v108_v21, 16 }
  0x8d   :  { %v541_v39 = vsel %vm12191_vm3, %v536_v30, %v540_v20  ;;  %v3858_v40 = vrot.slane %v3856_v32, 5  ;;  %v545_v41 = vrot.slane %v543_v33, 4  ;;  %v556_v42 = vshrl.u32 %v108_v21, 16 }
  0x8e   :  { %v9021_v24 = vcombine.low %v531_v29, %v541_v39  ;;  %v3844_v43 = vrot.slane %v3843_v34, 4  ;;  %v3853_v44 = vor.u32 %v3852_v35, %v3848_v26  ;;  %v548_v45 = vrot.slane %v546_v37, 5  ;;  %v113_v29 = vld [vmem:[%s17113_s0 + $0xd8] sm:$0xf]  ;;  %v114_v35 = vld [vmem:[%s17113_s0 + $0xdc] sm:$0xf] }
  0x8f   :  { %v554_v46 = vrot.slane %v552_v38, 5  ;;  %v558_v47 = vrot.slane %v556_v42, 4  ;;  %v562_v48 = vshll.u32 %v109_v36, 16  ;;  %vm1992_vm5 = vcmask 1042432  }
  0x90   :  { %10517 = vmatmul.mubr.msk.bf16.gmra.mrb[28].mxu1 %vm1022_vm4, %v9021_v24  ;;  %v3849_v50 = vsel %vm12191_vm3, %v3844_v43, %v3848_v26  ;;  %v3854_v51 = vrot.slane %v3853_v44, 4  ;;  %v549_v53 = vor.u32 %v548_v45, %v545_v41  ;;  %vm1993_vm6 = vcmask 1046532   ;;  %v115_v41 = vld [vmem:[%s17113_s0 + $0xe0] sm:$0x1] }
  0x91   :  { %v559_v54 = vor.u32 %v558_v47, %v554_v46  ;;  %v564_v55 = vrot.slane %v562_v48, 5  ;;  %vm12674_vm7 = vmor %vm1992_vm5, %vm1993_vm6  ;;  %v9454_v62 = vrot.slane %v11706_v59, 9  ;;  %v4826_v0 = vrot.slane %v11707_v63, 5 }
  0x92   :  { %v3859_v2 = vsel %vm12191_vm3, %v3854_v51, %v3858_v40  ;;  %v550_v4 = vrot.slane %v549_v53, 4  ;;  %v567_v6 = vshrl.u32 %v110_v49, 16  ;;  %v570_v7 = vshll.u32 %v110_v49, 16 }
  0x93   :  { %v9405_v10 = vcombine.low %v3849_v50, %v3859_v2  ;;  %v560_v12 = vrot.slane %v559_v54, 4  ;;  %v4827_v13 = vsel %vm12674_vm7, %v9454_v62, %v4826_v0  ;;  %v4828_v11 = vrot.slane %v4826_v0, 4  ;;  %v116_v50 = vld [vmem:[%s17113_s0 + $0xe4] sm:$0xf]  ;;  %v11711_v62 = vld [vmem:[%s17113_s0 + $0x1a0] sm:$0x1] }
  0x94   :  { %v555_v15 = vsel %vm12191_vm3, %v550_v4, %v554_v46  ;;  %v569_v17 = vrot.slane %v567_v6, 4  ;;  %v572_v20 = vrot.slane %v570_v7, 5  ;;  %v576_v21 = vshll.u32 %v111_v1, 16  ;;  %v117_v0 = vld [vmem:[%s17113_s0 + $0xe8] sm:$0xf] }
  0x95   :  { %10781 = vmatmul.mubr.msk.bf16.gmra.mrb[28].mxu0 %vm1022_vm4, %v9405_v10  ;;  %v565_v22 = vsel %vm12191_vm3, %v560_v12, %v564_v55  ;;  %v4830_v23 = vsel %vm12674_vm7, %v4828_v11, %v4829_v58  ;;  %v580_v26 = vshrl.u32 %v111_v1, 16  ;;  %v586_v28 = vshll.u32 %v112_v5, 16  ;;  %v11710_v55 = vld [vmem:[%s17113_s0 + $0x19c] sm:$0xf]  ;;  %v118_v5 = vld [vmem:[%s17113_s0 + $0xec] sm:$0x1] }
  0x96   :  { %v9022_v30 = vcombine.low %v555_v15, %v565_v22  ;;  %v9486_v32 = vcombine.low %v4827_v13, %v4830_v23  ;;  %v573_v33 = vor.u32 %v572_v20, %v569_v17  ;;  %v578_v34 = vrot.slane %v576_v21, 5 }
  0x97   :  { %v582_v36 = vrot.slane %v580_v26, 4  ;;  %v588_v37 = vrot.slane %v586_v28, 5  ;;  %v9455_v58 = vrot.slane %v11708_v19, 9  ;;  %v4835_v38 = vrot.slane %v4833_v16, 4  ;;  %v119_v28 = vld [vmem:[%s17113_s0 + $0xf0] sm:$0xf] }
  0x98   :  { %10520 = vmatprep.mubr.msk.bf16.mxu1 %vm1022_vm4, %v9022_v30  ;;  %10818 = vmatprep.mubr.msk.bf16.mxu0 %vm1022_vm4, %v9486_v32  ;;  %v574_v39 = vrot.slane %v573_v33, 4  ;;  %v5950_v40 = vsel %vm1119_vm0, %v12434_v18, 0  ;;  %v591_v42 = vshrl.u32 %v113_v29, 16  ;;  %v594_v24 = vshll.u32 %v113_v29, 16  ;;  %v11713_v19 = vld [vmem:[%s17113_s0 + $0x1a8] sm:$0xf] }
  0x99   :  { %v583_v43 = vor.u32 %v582_v36, %v578_v34  ;;  %v4834_v44 = vsel %vm12674_vm7, %v9455_v58, %v4833_v16  ;;  %v4837_v45 = vsel %vm12674_vm7, %v4835_v38, %v4836_v27  ;;  %v600_v46 = vshll.u32 %v114_v35, 16  ;;  %v11712_v36 = vld [vmem:[%s17113_s0 + $0x1a4] sm:$0xf]  ;;  %v120_v38 = vld [vmem:[%s17113_s0 + $0xf4] sm:$0xf] }
  0x9a   :  { %v579_v18 = vsel %vm12191_vm3, %v574_v39, %v578_v34  ;;  %v9487_v47 = vcombine.low %v4834_v44, %v4837_v45  ;;  %v593_v48 = vrot.slane %v591_v42, 4  ;;  %v596_v49 = vrot.slane %v594_v24, 5  ;;  %v121_v24 = vld [vmem:[%s17113_s0 + $0xf8] sm:$0x1] }
  0x9b   :  { %v584_v60 = vrot.slane %v583_v43, 4  ;;  %v602_v51 = vrot.slane %v600_v46, 5  ;;  %v604_v53 = vshrl.u32 %v114_v35, 16  ;;  %v610_v16 = vshll.u32 %v115_v41, 16  ;;  %v11714_v41 = vld [vmem:[%s17113_s0 + $0x1ac] sm:$0x1] }
  0x9c   :  { %v597_v54 = vor.u32 %v596_v49, %v593_v48  ;;  %v9456_v27 = vrot.slane %v11709_v61, 9  ;;  %v4840_v59 = vrot.slane %v11710_v55, 5  ;;  %v4843_v63 = vrot.slane %v11711_v62, 5  ;;  %v123_v62 = vld [vmem:[%s17113_s0 + $0x100] sm:$0xf] }
  0x9d   :  { %v589_v1 = vsel %vm12191_vm3, %v584_v60, %v588_v37  ;;  %10819 = vmatmul.mubr.msk.bf16.vlgmr.msra.gmra.mrb[0].mxu0 %vm1022_vm4, %v9487_v47  ;;  %v606_v2 = vrot.slane %v604_v53, 4  ;;  %v612_v4 = vrot.slane %v610_v16, 5  ;;  %v615_v6 = vshrl.u32 %v116_v50, 16 }
  0x9e   :  { %v9023_v7 = vcombine.low %v579_v18, %v589_v1  ;;  %10883 = vmatpush3.bf16.msra.mxu0 %v5950_v40  ;;  %v598_v10 = vrot.slane %v597_v54, 4  ;;  %v4841_v12 = vsel %vm12674_vm7, %v9456_v27, %v4840_v59  ;;  %v4842_v13 = vrot.slane %v4840_v59, 4  ;;  %v122_v59 = vld [vmem:[%s17113_s0 + $0xfc] sm:$0xf] }
  0x9f   :  { %v607_v11 = vor.u32 %v606_v2, %v602_v51  ;;  %v617_v15 = vrot.slane %v615_v6, 4  ;;  %v618_v17 = vshll.u32 %v116_v50, 16  ;;  %v624_v20 = vshll.u32 %v117_v0, 16  ;;  %v11715_v2 = vld [vmem:[%s17113_s0 + $0x1b0] sm:$0xf] }
  0xa0   :  { %10521 = vmatmul.mubr.msk.bf16.gmra.mrb[32].mxu1 %vm1022_vm4, %v9023_v7  ;;  %v603_v21 = vsel %vm12191_vm3, %v598_v10, %v602_v51  ;;  %v4844_v22 = vsel %vm12674_vm7, %v4842_v13, %v4843_v63  ;;  %v628_v23 = vshrl.u32 %v117_v0, 16  ;;  %v634_v26 = vshll.u32 %v118_v5, 16  ;;  %v11716_v7 = vld [vmem:[%s17113_s0 + $0x1b4] sm:$0xf] }
  0xa1   :  { %v608_v29 = vrot.slane %v607_v11, 4  ;;  %v9488_v30 = vcombine.low %v4841_v12, %v4844_v22  ;;  %v620_v32 = vrot.slane %v618_v17, 5  ;;  %v626_v33 = vrot.slane %v624_v20, 5  ;;  %v11717_v12 = vld [vmem:[%s17113_s0 + $0x1b8] sm:$0x1] }
  0xa2   :  { %v630_v34 = vrot.slane %v628_v23, 4  ;;  %v636_v35 = vrot.slane %v634_v26, 5  ;;  %v9457_v37 = vrot.slane %v11712_v36, 9  ;;  %v4847_v58 = vrot.slane %v11713_v19, 5  ;;  %v125_v19 = vld [vmem:[%s17113_s0 + $0x108] sm:$0xf] }
  0xa3   :  { %v613_v39 = vsel %vm12191_vm3, %v608_v29, %v612_v4  ;;  %10822 = vmatprep.mubr.msk.bf16.mxu0 %vm1022_vm4, %v9488_v30  ;;  %v621_v40 = vor.u32 %v620_v32, %v617_v15  ;;  %v4850_v42 = vrot.slane %v11714_v41, 5  ;;  %v639_v43 = vshrl.u32 %v119_v28, 16  ;;  %v124_v15 = vld [vmem:[%s17113_s0 + $0x104] sm:$0x1] }
  0xa4   :  { %v9024_v44 = vcombine.low %v603_v21, %v613_v39  ;;  %v631_v45 = vor.u32 %v630_v34, %v626_v33  ;;  %v4848_v46 = vsel %vm12674_vm7, %v9457_v37, %v4847_v58  ;;  %v4849_v18 = vrot.slane %v4847_v58, 4 }
  0xa5   :  { %v622_v47 = vrot.slane %v621_v40, 4  ;;  %v641_v48 = vrot.slane %v639_v43, 4  ;;  %v642_v49 = vshll.u32 %v119_v28, 16  ;;  %v648_v50 = vshll.u32 %v120_v38, 16  ;;  %v11718_v40 = vld [vmem:[%s17113_s0 + $0x1bc] sm:$0xf] }
  0xa6   :  { %10524 = vmatprep.mubr.msk.bf16.mxu1 %vm1022_vm4, %v9024_v44  ;;  %v632_v60 = vrot.slane %v631_v45, 4  ;;  %v4851_v51 = vsel %vm12674_vm7, %v4849_v18, %v4850_v42  ;;  %v652_v53 = vshrl.u32 %v120_v38, 16  ;;  %v658_v16 = vshll.u32 %v121_v24, 16  ;;  %v126_v42 = vld [vmem:[%s17113_s0 + $0x10c] sm:$0xf] }
  0xa7   :  { %v627_v54 = vsel %vm12191_vm3, %v622_v47, %v626_v33  ;;  %v9489_v61 = vcombine.low %v4848_v46, %v4851_v51  ;;  %v644_v27 = vrot.slane %v642_v49, 5  ;;  %v650_v55 = vrot.slane %v648_v50, 5  ;;  %v11719_v45 = vld [vmem:[%s17113_s0 + $0x1c0] sm:$0xf]  ;;  %v11720_v47 = vld [vmem:[%s17113_s0 + $0x1c4] sm:$0x1] }
  0xa8   :  { %v637_v63 = vsel %vm12191_vm3, %v632_v60, %v636_v35  ;;  %v654_v0 = vrot.slane %v652_v53, 4  ;;  %v660_v1 = vrot.slane %v658_v16, 5  ;;  %v9458_v4 = vrot.slane %v11715_v2, 9  ;;  %v127_v49 = vld [vmem:[%s17113_s0 + $0x110] sm:$0x1] }
  0xa9   :  { %v9025_v5 = vcombine.low %v627_v54, %v637_v63  ;;  %10823 = vmatmul.mubr.msk.bf16.gmra.mrb[4].mxu0 %vm1022_vm4, %v9489_v61  ;;  %v645_v6 = vor.u32 %v644_v27, %v641_v48  ;;  %v4854_v10 = vrot.slane %v11716_v7, 5  ;;  %v4857_v13 = vrot.slane %v11717_v12, 5  ;;  %v128_v2 = vld [vmem:[%s17113_s0 + $0x114] sm:$0xf]  ;;  %v12854_v12 = vld [vmem:[%s17114_s1 + $0x1c] sm:$0xf] }
  0xaa   :  { %v655_v11 = vor.u32 %v654_v0, %v650_v55  ;;  %v663_v17 = vshrl.u32 %v122_v59, 16  ;;  %v666_v20 = vshll.u32 %v122_v59, 16  ;;  %v672_v21 = vshll.u32 %v123_v62, 16  ;;  %11602 = vmatprep.subr.msk.bf16.mxu0 %vm1119_vm0, %v12854_v12 }
  0xab   :  { %10525 = vmatmul.mubr.msk.bf16.gmra.mrb[36].mxu1 %vm1022_vm4, %v9025_v5  ;;  %v646_v22 = vrot.slane %v645_v6, 4  ;;  %v4855_v23 = vsel %vm12674_vm7, %v9458_v4, %v4854_v10  ;;  %v4856_v26 = vrot.slane %v4854_v10, 4  ;;  %v676_v28 = vshrl.u32 %v123_v62, 16  ;;  %v129_v10 = vld [vmem:[%s17113_s0 + $0x118] sm:$0xf] }
  0xac   :  { %v656_v29 = vrot.slane %v655_v11, 4  ;;  %v665_v30 = vrot.slane %v663_v17, 4  ;;  %v668_v32 = vrot.slane %v666_v20, 5  ;;  %v674_v33 = vrot.slane %v672_v21, 5  ;;  %v11721_v11 = vld [vmem:[%s17113_s0 + $0x1c8] sm:$0xf] }
  0xad   :  { %v651_v34 = vsel %vm12191_vm3, %v646_v22, %v650_v55  ;;  %v4858_v35 = vsel %vm12674_vm7, %v4856_v26, %v4857_v13  ;;  %v678_v36 = vrot.slane %v676_v28, 4  ;;  %v682_v37 = vshll.u32 %v124_v15, 16  ;;  %v11722_v17 = vld [vmem:[%s17113_s0 + $0x1cc] sm:$0xf]  ;;  %v11723_v21 = vld [vmem:[%s17113_s0 + $0x1d0] sm:$0x1] }
  0xae   :  { %v661_v58 = vsel %vm12191_vm3, %v656_v29, %v660_v1  ;;  %v9490_v38 = vcombine.low %v4855_v23, %v4858_v35  ;;  %v669_v39 = vor.u32 %v668_v32, %v665_v30  ;;  %v9459_v41 = vrot.slane %v11718_v40, 9  ;;  %v130_v28 = vld [vmem:[%s17113_s0 + $0x11c] sm:$0x1] }
  0xaf   :  { %v9026_v24 = vcombine.low %v651_v34, %v661_v58  ;;  %v679_v43 = vor.u32 %v678_v36, %v674_v33  ;;  %v684_v44 = vrot.slane %v682_v37, 5  ;;  %v4861_v46 = vrot.slane %v11719_v45, 5  ;;  %v11724_v45 = vld [vmem:[%s17113_s0 + $0x1d4] sm:$0xf] }
  0xb0   :  { %10826 = vmatprep.mubr.msk.bf16.mxu0 %vm1022_vm4, %v9490_v38  ;;  %v670_v18 = vrot.slane %v669_v39, 4  ;;  %v4864_v48 = vrot.slane %v11720_v47, 5  ;;  %v687_v50 = vshrl.u32 %v125_v19, 16  ;;  %v690_v60 = vshll.u32 %v125_v19, 16 }
  0xb1   :  { %10528 = vmatprep.mubr.msk.bf16.mxu1 %vm1022_vm4, %v9026_v24  ;;  %v680_v51 = vrot.slane %v679_v43, 4  ;;  %v4862_v53 = vsel %vm12674_vm7, %v9459_v41, %v4861_v46  ;;  %v4863_v16 = vrot.slane %v4861_v46, 4  ;;  %v696_v54 = vshll.u32 %v126_v42, 16 }
  0xb2   :  { %v675_v61 = vsel %vm12191_vm3, %v670_v18, %v674_v33  ;;  %v689_v27 = vrot.slane %v687_v50, 4  ;;  %v692_v55 = vrot.slane %v690_v60, 5  ;;  %v700_v59 = vshrl.u32 %v126_v42, 16  ;;  %v131_v42 = vld [vmem:[%s17113_s0 + $0x120] sm:$0xf] }
  0xb3   :  { %v685_v62 = vsel %vm12191_vm3, %v680_v51, %v684_v44  ;;  %v4865_v63 = vsel %vm12674_vm7, %v4863_v16, %v4864_v48  ;;  %v698_v0 = vrot.slane %v696_v54, 5  ;;  %v706_v1 = vshll.u32 %v127_v49, 16  ;;  %v132_v18 = vld [vmem:[%s17113_s0 + $0x124] sm:$0xf]  ;;  %v11725_v50 = vld [vmem:[%s17113_s0 + $0x1d8] sm:$0xf] }
  0xb4   :  { %v9027_v4 = vcombine.low %v675_v61, %v685_v62  ;;  %v9491_v5 = vcombine.low %v4862_v53, %v4865_v63  ;;  %v693_v6 = vor.u32 %v692_v55, %v689_v27  ;;  %v702_v7 = vrot.slane %v700_v59, 4  ;;  %v11726_v53 = vld [vmem:[%s17113_s0 + $0x1dc] sm:$0x1]  ;;  %v133_v54 = vld [vmem:[%s17113_s0 + $0x128] sm:$0x1] }
  0xb5   :  { %v708_v13 = vrot.slane %v706_v1, 5  ;;  %v9460_v15 = vrot.slane %v11721_v11, 9  ;;  %v4868_v20 = vrot.slane %v11722_v17, 5  ;;  %v4871_v22 = vrot.slane %v11723_v21, 5  ;;  %v12916_v21 = vld [vmem:[%s17113_s0 + $0x130] sm:$0xf] }
  0xb6   :  { %10529 = vmatmul.mubr.msk.bf16.gmra.mrb[40].mxu1 %vm1022_vm4, %v9027_v4  ;;  %10827 = vmatmul.mubr.msk.bf16.gmra.mrb[8].mxu0 %vm1022_vm4, %v9491_v5  ;;  %v694_v23 = vrot.slane %v693_v6, 4  ;;  %v703_v26 = vor.u32 %v702_v7, %v698_v0  ;;  %v711_v29 = vshrl.u32 %v128_v2, 16  ;;  %v714_v30 = vshll.u32 %v128_v2, 16 }
  0xb7   :  { %v4869_v32 = vsel %vm12674_vm7, %v9460_v15, %v4868_v20  ;;  %v4870_v33 = vrot.slane %v4868_v20, 4  ;;  %v720_v34 = vshll.u32 %v129_v10, 16  ;;  %v724_v35 = vshrl.u32 %v129_v10, 16 }
  0xb8   :  { %v699_v36 = vsel %vm12191_vm3, %v694_v23, %v698_v0  ;;  %v704_v37 = vrot.slane %v703_v26, 4  ;;  %v713_v19 = vrot.slane %v711_v29, 4  ;;  %v716_v58 = vrot.slane %v714_v30, 5  ;;  %v11727_v23 = vld [vmem:[%s17113_s0 + $0x1e0] sm:$0xf] }
  0xb9   :  { %v4872_v38 = vsel %vm12674_vm7, %v4870_v33, %v4871_v22  ;;  %v722_v39 = vrot.slane %v720_v34, 5  ;;  %v726_v40 = vrot.slane %v724_v35, 4  ;;  %v730_v41 = vshll.u32 %v130_v28, 16  ;;  %v11728_v28 = vld [vmem:[%s17113_s0 + $0x1e4] sm:$0xf] }
  0xba   :  { %v709_v24 = vsel %vm12191_vm3, %v704_v37, %v708_v13  ;;  %v9492_v43 = vcombine.low %v4869_v32, %v4872_v38  ;;  %v717_v44 = vor.u32 %v716_v58, %v713_v19  ;;  %v9461_v46 = vrot.slane %v11724_v45, 9  ;;  %v12911_v13 = vld [vmem:[%s17113_s0 + $0x12c] sm:$0xf]  ;;  %v11729_v30 = vld [vmem:[%s17113_s0 + $0x1e8] sm:$0x1] }
  0xbb   :  { %v9028_v47 = vcombine.low %v699_v36, %v709_v24  ;;  %v727_v48 = vor.u32 %v726_v40, %v722_v39  ;;  %v732_v49 = vrot.slane %v730_v41, 5  ;;  %v4875_v60 = vrot.slane %v11725_v50, 5  ;;  %v136_v35 = vld [vmem:[%s17113_s0 + $0x134] sm:$0x1]  ;;  %v11730_v50 = vld [vmem:[%s17113_s0 + $0x1ec] sm:$0xf] }
  0xbc   :  { %10830 = vmatprep.mubr.msk.bf16.mxu0 %vm1022_vm4, %v9492_v43  ;;  %v718_v51 = vrot.slane %v717_v44, 4  ;;  %v4878_v16 = vrot.slane %v11726_v53, 5  ;;  %v735_v61 = vshrl.u32 %v131_v42, 16  ;;  %v738_v27 = vshll.u32 %v131_v42, 16 }
  0xbd   :  { %10532 = vmatprep.mubr.msk.bf16.mxu1 %vm1022_vm4, %v9028_v47  ;;  %v728_v55 = vrot.slane %v727_v48, 4  ;;  %v4876_v59 = vsel %vm12674_vm7, %v9461_v46, %v4875_v60  ;;  %v4877_v62 = vrot.slane %v4875_v60, 4  ;;  %v744_v63 = vshll.u32 %v132_v18, 16 }
  0xbe   :  { %v723_v0 = vsel %vm12191_vm3, %v718_v51, %v722_v39  ;;  %v737_v1 = vrot.slane %v735_v61, 4  ;;  %v740_v2 = vrot.slane %v738_v27, 5  ;;  %v748_v4 = vshrl.u32 %v132_v18, 16  ;;  %v12945_v18 = vld [vmem:[%s17113_s0 + $0x138] sm:$0xf] }
  0xbf   :  { %v733_v5 = vsel %vm12191_vm3, %v728_v55, %v732_v49  ;;  %v4879_v6 = vsel %vm12674_vm7, %v4877_v62, %v4878_v16  ;;  %v746_v7 = vrot.slane %v744_v63, 5  ;;  %v754_v10 = vshll.u32 %v133_v54, 16  ;;  %v12955_v51 = vld [vmem:[%s17113_s0 + $0x13c] sm:$0xf]  ;;  %v11731_v61 = vld [vmem:[%s17113_s0 + $0x1f0] sm:$0xf] }
  0xc0   :  { %v9029_v11 = vcombine.low %v723_v0, %v733_v5  ;;  %v9493_v15 = vcombine.low %v4876_v59, %v4879_v6  ;;  %v741_v17 = vor.u32 %v740_v2, %v737_v1  ;;  %v750_v20 = vrot.slane %v748_v4, 4  ;;  %v11732_v59 = vld [vmem:[%s17113_s0 + $0x1f4] sm:$0x1]  ;;  %v139_v63 = vld [vmem:[%s17113_s0 + $0x140] sm:$0x1] }
  0xc1   :  { %v756_v22 = vrot.slane %v754_v10, 5  ;;  %v9462_v26 = vrot.slane %v11727_v23, 9  ;;  %v4882_v29 = vrot.slane %v11728_v28, 5  ;;  %v4885_v32 = vrot.slane %v11729_v30, 5 }
  0xc2   :  { %10533 = vmatmul.mubr.msk.bf16.gmra.mrb[44].mxu1 %vm1022_vm4, %v9029_v11  ;;  %10831 = vmatmul.mubr.msk.bf16.gmra.mrb[12].mxu0 %vm1022_vm4, %v9493_v15  ;;  %v742_v33 = vrot.slane %v741_v17, 4  ;;  %v751_v34 = vor.u32 %v750_v20, %v746_v7  ;;  %v759_v36 = vshrl.u32 %v12911_v13, 16  ;;  %v762_v37 = vshll.u32 %v12911_v13, 16 }
  0xc3   :  { %v4883_v19 = vsel %vm12674_vm7, %v9462_v26, %v4882_v29  ;;  %v4884_v58 = vrot.slane %v4882_v29, 4  ;;  %v768_v38 = vshll.u32 %v12916_v21, 16  ;;  %v772_v39 = vshrl.u32 %v12916_v21, 16  ;;  %v12983_v26 = vld [vmem:[%s17113_s0 + $0x144] sm:$0xf] }
  0xc4   :  { %v747_v40 = vsel %vm12191_vm3, %v742_v33, %v746_v7  ;;  %v752_v41 = vrot.slane %v751_v34, 4  ;;  %v761_v42 = vrot.slane %v759_v36, 4  ;;  %v764_v24 = vrot.slane %v762_v37, 5  ;;  %v12988_v33 = vld [vmem:[%s17113_s0 + $0x148] sm:$0xf] }
  0xc5   :  { %v4886_v43 = vsel %vm12674_vm7, %v4884_v58, %v4885_v32  ;;  %v770_v44 = vrot.slane %v768_v38, 5  ;;  %v774_v45 = vrot.slane %v772_v39, 4  ;;  %v778_v46 = vshll.u32 %v136_v35, 16  ;;  %v11733_v35 = vld [vmem:[%s17113_s0 + $0x1f8] sm:$0xf] }
  0xc6   :  { %v757_v47 = vsel %vm12191_vm3, %v752_v41, %v756_v22  ;;  %v9494_v48 = vcombine.low %v4883_v19, %v4886_v43  ;;  %v765_v49 = vor.u32 %v764_v24, %v761_v42  ;;  %v9463_v60 = vrot.slane %v11730_v50, 9  ;;  %v11734_v37 = vld [vmem:[%s17113_s0 + $0x1fc] sm:$0xf]  ;;  %v11735_v58 = vld [vmem:[%s17113_s0 + $0x200] sm:$0x1] }
  0xc7   :  { %v9030_v53 = vcombine.low %v747_v40, %v757_v47  ;;  %v775_v16 = vor.u32 %v774_v45, %v770_v44  ;;  %v780_v54 = vrot.slane %v778_v46, 5  ;;  %v4889_v27 = vrot.slane %v11731_v61, 5  ;;  %v142_v41 = vld [vmem:[%s17113_s0 + $0x14c] sm:$0x1]  ;;  %v13017_v61 = vld [vmem:[%s17113_s0 + $0x150] sm:$0xf] }
  0xc8   :  { %10834 = vmatprep.mubr.msk.bf16.mxu0 %vm1022_vm4, %v9494_v48  ;;  %v766_v55 = vrot.slane %v765_v49, 4  ;;  %v4892_v62 = vrot.slane %v11732_v59, 5  ;;  %v783_v0 = vshrl.u32 %v12945_v18, 16  ;;  %v786_v1 = vshll.u32 %v12945_v18, 16 }
  0xc9   :  { %10536 = vmatprep.mubr.msk.bf16.mxu1 %vm1022_vm4, %v9030_v53  ;;  %v776_v2 = vrot.slane %v775_v16, 4  ;;  %v4890_v4 = vsel %vm12674_vm7, %v9463_v60, %v4889_v27  ;;  %v4891_v5 = vrot.slane %v4889_v27, 4  ;;  %v792_v6 = vshll.u32 %v12955_v51, 16 }
  0xca   :  { %v771_v7 = vsel %vm12191_vm3, %v766_v55, %v770_v44  ;;  %v785_v10 = vrot.slane %v783_v0, 4  ;;  %v788_v11 = vrot.slane %v786_v1, 5  ;;  %v796_v15 = vshrl.u32 %v12955_v51, 16  ;;  %v13027_v0 = vld [vmem:[%s17113_s0 + $0x154] sm:$0xf] }
  0xcb   :  { %v781_v17 = vsel %vm12191_vm3, %v776_v2, %v780_v54  ;;  %v4893_v20 = vsel %vm12674_vm7, %v4891_v5, %v4892_v62  ;;  %v794_v22 = vrot.slane %v792_v6, 5  ;;  %v802_v23 = vshll.u32 %v139_v63, 16  ;;  %v11736_v62 = vld [vmem:[%s17113_s0 + $0x204] sm:$0xf]  ;;  %v11737_v5 = vld [vmem:[%s17113_s0 + $0x208] sm:$0xf] }
  0xcc   :  { %v9031_v28 = vcombine.low %v771_v7, %v781_v17  ;;  %v9495_v29 = vcombine.low %v4890_v4, %v4893_v20  ;;  %v789_v30 = vor.u32 %v788_v11, %v785_v10  ;;  %v798_v32 = vrot.slane %v796_v15, 4  ;;  %v11738_v10 = vld [vmem:[%s17113_s0 + $0x20c] sm:$0x1]  ;;  %v145_v15 = vld [vmem:[%s17113_s0 + $0x158] sm:$0x1] }
  0xcd   :  { %v804_v34 = vrot.slane %v802_v23, 5  ;;  %v9464_v36 = vrot.slane %v11733_v35, 9  ;;  %v4896_v19 = vrot.slane %v11734_v37, 5  ;;  %v4899_v38 = vrot.slane %v11735_v58, 5 }
  0xce   :  { %10537 = vmatmul.mubr.msk.bf16.gmra.mrb[48].mxu1 %vm1022_vm4, %v9031_v28  ;;  %10835 = vmatmul.mubr.msk.bf16.gmra.mrb[16].mxu0 %vm1022_vm4, %v9495_v29  ;;  %v790_v39 = vrot.slane %v789_v30, 4  ;;  %v799_v40 = vor.u32 %v798_v32, %v794_v22  ;;  %v807_v42 = vshrl.u32 %v12983_v26, 16  ;;  %v810_v24 = vshll.u32 %v12983_v26, 16 }
  0xcf   :  { %v4897_v43 = vsel %vm12674_vm7, %v9464_v36, %v4896_v19  ;;  %v4898_v44 = vrot.slane %v4896_v19, 4  ;;  %v816_v45 = vshll.u32 %v12988_v33, 16  ;;  %v820_v46 = vshrl.u32 %v12988_v33, 16 }
  0xd0   :  { %v795_v47 = vsel %vm12191_vm3, %v790_v39, %v794_v22  ;;  %v800_v48 = vrot.slane %v799_v40, 4  ;;  %v809_v49 = vrot.slane %v807_v42, 4  ;;  %v812_v50 = vrot.slane %v810_v24, 5  ;;  %v13060_v24 = vld [vmem:[%s17113_s0 + $0x160] sm:$0xf] }
  0xd1   :  { %v4900_v60 = vsel %vm12674_vm7, %v4898_v44, %v4899_v38  ;;  %v818_v53 = vrot.slane %v816_v45, 5  ;;  %v822_v16 = vrot.slane %v820_v46, 4  ;;  %v826_v54 = vshll.u32 %v142_v41, 16  ;;  %v13055_v38 = vld [vmem:[%s17113_s0 + $0x15c] sm:$0xf] }
  0xd2   :  { %v805_v27 = vsel %vm12191_vm3, %v800_v48, %v804_v34  ;;  %v9496_v55 = vcombine.low %v4897_v43, %v4900_v60  ;;  %v813_v59 = vor.u32 %v812_v50, %v809_v49  ;;  %v9465_v63 = vrot.slane %v11736_v62, 9  ;;  %v11739_v44 = vld [vmem:[%s17113_s0 + $0x210] sm:$0xf]  ;;  %v11740_v46 = vld [vmem:[%s17113_s0 + $0x214] sm:$0xf] }
  0xd3   :  { %v9032_v1 = vcombine.low %v795_v47, %v805_v27  ;;  %v823_v2 = vor.u32 %v822_v16, %v818_v53  ;;  %v828_v4 = vrot.slane %v826_v54, 5  ;;  %v4903_v6 = vrot.slane %v11737_v5, 5  ;;  %v11741_v48 = vld [vmem:[%s17113_s0 + $0x218] sm:$0x1] }
  0xd4   :  { %10838 = vmatprep.mubr.msk.bf16.mxu0 %vm1022_vm4, %v9496_v55  ;;  %v814_v7 = vrot.slane %v813_v59, 4  ;;  %v4906_v11 = vrot.slane %v11738_v10, 5  ;;  %v831_v17 = vshrl.u32 %v13017_v61, 16  ;;  %v834_v20 = vshll.u32 %v13017_v61, 16 }
  0xd5   :  { %10540 = vmatprep.mubr.msk.bf16.mxu1 %vm1022_vm4, %v9032_v1  ;;  %v824_v22 = vrot.slane %v823_v2, 4  ;;  %v4904_v23 = vsel %vm12674_vm7, %v9465_v63, %v4903_v6  ;;  %v4905_v28 = vrot.slane %v4903_v6, 4  ;;  %v840_v29 = vshll.u32 %v13027_v0, 16 }
  0xd6   :  { %v819_v30 = vsel %vm12191_vm3, %v814_v7, %v818_v53  ;;  %v833_v32 = vrot.slane %v831_v17, 4  ;;  %v836_v34 = vrot.slane %v834_v20, 5  ;;  %v844_v35 = vshrl.u32 %v13027_v0, 16  ;;  %v148_v53 = vld [vmem:[%s17113_s0 + $0x164] sm:$0x1] }
  0xd7   :  { %v829_v36 = vsel %vm12191_vm3, %v824_v22, %v828_v4  ;;  %v4907_v37 = vsel %vm12674_vm7, %v4905_v28, %v4906_v11  ;;  %v842_v19 = vrot.slane %v840_v29, 5  ;;  %v850_v58 = vshll.u32 %v145_v15, 16  ;;  %v13089_v11 = vld [vmem:[%s17113_s0 + $0x168] sm:$0xf]  ;;  %v11742_v22 = vld [vmem:[%s17113_s0 + $0x21c] sm:$0xf] }
  0xd8   :  { %v9033_v39 = vcombine.low %v819_v30, %v829_v36  ;;  %v9497_v40 = vcombine.low %v4904_v23, %v4907_v37  ;;  %v837_v41 = vor.u32 %v836_v34, %v833_v32  ;;  %v846_v42 = vrot.slane %v844_v35, 4  ;;  %v13099_v28 = vld [vmem:[%s17113_s0 + $0x16c] sm:$0xf]  ;;  %v11743_v34 = vld [vmem:[%s17113_s0 + $0x220] sm:$0xf] }
  0xd9   :  { %v852_v43 = vrot.slane %v850_v58, 5  ;;  %v9466_v45 = vrot.slane %v11739_v44, 9  ;;  %v4910_v47 = vrot.slane %v11740_v46, 5  ;;  %v4913_v49 = vrot.slane %v11741_v48, 5  ;;  %v11744_v37 = vld [vmem:[%s17113_s0 + $0x224] sm:$0x1] }
  0xda   :  { %10541 = vmatmul.mubr.msk.bf16.gmra.mrb[52].mxu1 %vm1022_vm4, %v9033_v39  ;;  %10839 = vmatmul.mubr.msk.bf16.gmra.mrb[20].mxu0 %vm1022_vm4, %v9497_v40  ;;  %v838_v50 = vrot.slane %v837_v41, 4  ;;  %v847_v60 = vor.u32 %v846_v42, %v842_v19  ;;  %v855_v16 = vshrl.u32 %v13055_v38, 16  ;;  %v858_v54 = vshll.u32 %v13055_v38, 16  ;;  %v151_v58 = vld [vmem:[%s17113_s0 + $0x170] sm:$0x1] }
  0xdb   :  { %v4911_v27 = vsel %vm12674_vm7, %v9466_v45, %v4910_v47  ;;  %v4912_v55 = vrot.slane %v4910_v47, 4  ;;  %v864_v59 = vshll.u32 %v13060_v24, 16  ;;  %v868_v62 = vshrl.u32 %v13060_v24, 16 }
  0xdc   :  { %v843_v63 = vsel %vm12191_vm3, %v838_v50, %v842_v19  ;;  %v848_v1 = vrot.slane %v847_v60, 4  ;;  %v857_v2 = vrot.slane %v855_v16, 4  ;;  %v860_v4 = vrot.slane %v858_v54, 5  ;;  %v13127_v16 = vld [vmem:[%s17113_s0 + $0x174] sm:$0xf] }
  0xdd   :  { %v4914_v5 = vsel %vm12674_vm7, %v4912_v55, %v4913_v49  ;;  %v866_v6 = vrot.slane %v864_v59, 5  ;;  %v870_v7 = vrot.slane %v868_v62, 4  ;;  %v874_v10 = vshll.u32 %v148_v53, 16  ;;  %v13132_v62 = vld [vmem:[%s17113_s0 + $0x178] sm:$0xf] }
  0xde   :  { %v853_v15 = vsel %vm12191_vm3, %v848_v1, %v852_v43  ;;  %v9498_v17 = vcombine.low %v4911_v27, %v4914_v5  ;;  %v861_v20 = vor.u32 %v860_v4, %v857_v2  ;;  %v9467_v23 = vrot.slane %v11742_v22, 9 }
  0xdf   :  { %v9034_v29 = vcombine.low %v843_v63, %v853_v15  ;;  %v871_v30 = vor.u32 %v870_v7, %v866_v6  ;;  %v876_v32 = vrot.slane %v874_v10, 5  ;;  %v4917_v35 = vrot.slane %v11743_v34, 5  ;;  %v154_v7 = vld [vmem:[%s17113_s0 + $0x17c] sm:$0x1] }
  0xe0   :  { %10842 = vmatprep.mubr.msk.bf16.mxu0 %vm1022_vm4, %v9498_v17  ;;  %v862_v36 = vrot.slane %v861_v20, 4  ;;  %v4920_v19 = vrot.slane %v11744_v37, 5  ;;  %v879_v39 = vshrl.u32 %v13089_v11, 16  ;;  %v882_v40 = vshll.u32 %v13089_v11, 16 }
  0xe1   :  { %10544 = vmatprep.mubr.msk.bf16.mxu1 %vm1022_vm4, %v9034_v29  ;;  %v872_v41 = vrot.slane %v871_v30, 4  ;;  %v4918_v42 = vsel %vm12674_vm7, %v9467_v23, %v4917_v35  ;;  %v4919_v43 = vrot.slane %v4917_v35, 4  ;;  %v888_v44 = vshll.u32 %v13099_v28, 16 }
  0xe2   :  { %v867_v45 = vsel %vm12191_vm3, %v862_v36, %v866_v6  ;;  %v881_v46 = vrot.slane %v879_v39, 4  ;;  %v884_v47 = vrot.slane %v882_v40, 5  ;;  %v892_v48 = vshrl.u32 %v13099_v28, 16  ;;  %v9278_v36 = vld [vmem:[%s17113_s0 + $0x240] sm:$0xf] }
  0xe3   :  { %v877_v49 = vsel %vm12191_vm3, %v872_v41, %v876_v32  ;;  %v4921_v50 = vsel %vm12674_vm7, %v4919_v43, %v4920_v19  ;;  %v890_v60 = vrot.slane %v888_v44, 5  ;;  %v898_v53 = vshll.u32 %v151_v58, 16  ;;  %v9279_v40 = vld [vmem:[%s17113_s0 + $0x244] sm:$0xf] }
  0xe4   :  { %v9035_v54 = vcombine.low %v867_v45, %v877_v49  ;;  %v9499_v27 = vcombine.low %v4918_v42, %v4921_v50  ;;  %v885_v55 = vor.u32 %v884_v47, %v881_v46  ;;  %v894_v59 = vrot.slane %v892_v48, 4  ;;  %v9280_v45 = vld [vmem:[%s17113_s0 + $0x248] sm:$0x1] }
  0xe5   :  { %v900_v63 = vrot.slane %v898_v53, 5  ;;  %v9468_v1 = vrot.slane %v12591_v9, 9  ;;  %v4924_v2 = vrot.slane %v12598_v14, 5  ;;  %v4927_v4 = vrot.slane %v12605_v25, 5  ;;  %v13175_v53 = vld [vmem:[%s17113_s0] sm:$0xf] }
  0xe6   :  { %10545 = vmatmul.mubr.msk.bf16.gmra.mrb[56].mxu1 %vm1022_vm4, %v9035_v54  ;;  %10843 = vmatmul.mubr.msk.bf16.gmra.mrb[24].mxu0 %vm1022_vm4, %v9499_v27  ;;  %v886_v5 = vrot.slane %v885_v55, 4  ;;  %v895_v6 = vor.u32 %v894_v59, %v890_v60  ;;  %v903_v10 = vshrl.u32 %v13127_v16, 16  ;;  %v906_v15 = vshll.u32 %v13127_v16, 16 }
  0xe7   :  { %v4925_v9 = vsel %vm12674_vm7, %v9468_v1, %v4924_v2  ;;  %v4926_v14 = vrot.slane %v4924_v2, 4  ;;  %v912_v25 = vshll.u32 %v13132_v62, 16  ;;  %v916_v17 = vshrl.u32 %v13132_v62, 16  ;;  %v9281_v2 = vld [vmem:[%s17113_s0 + $0x24c] sm:$0xf] }
  0xe8   :  { %v891_v20 = vsel %vm12191_vm3, %v886_v5, %v890_v60  ;;  %v896_v22 = vrot.slane %v895_v6, 4  ;;  %v905_v23 = vrot.slane %v903_v10, 4  ;;  %v908_v29 = vrot.slane %v906_v15, 5  ;;  %v9282_v6 = vld [vmem:[%s17113_s0 + $0x250] sm:$0xf] }
  0xe9   :  { %v4928_v30 = vsel %vm12674_vm7, %v4926_v14, %v4927_v4  ;;  %v914_v32 = vrot.slane %v912_v25, 5  ;;  %v918_v34 = vrot.slane %v916_v17, 4  ;;  %v922_v35 = vshll.u32 %v154_v7, 16  ;;  %v9283_v10 = vld [vmem:[%s17113_s0 + $0x254] sm:$0x1] }
  0xea   :  { %v901_v37 = vsel %vm12191_vm3, %v896_v22, %v900_v63  ;;  %v9500_v19 = vcombine.low %v4925_v9, %v4928_v30  ;;  %v909_v58 = vor.u32 %v908_v29, %v905_v23  ;;  %v9469_v39 = vrot.slane %v12630_v52, 9  ;;  %v9284_v15 = vld [vmem:[%s17113_s0 + $0x258] sm:$0xf]  ;;  %v9285_v9 = vld [vmem:[%s17113_s0 + $0x25c] sm:$0xf] }
  0xeb   :  { %v9036_v41 = vcombine.low %v891_v20, %v901_v37  ;;  %v919_v42 = vor.u32 %v918_v34, %v914_v32  ;;  %v924_v43 = vrot.slane %v922_v35, 5  ;;  %v4931_v44 = vrot.slane %v12637_v57, 5  ;;  %v9286_v17 = vld [vmem:[%s17113_s0 + $0x260] sm:$0x1]  ;;  %v9287_v22 = vld [vmem:[%s17113_s0 + $0x264] sm:$0xf] }
  0xec   :  { %10846 = vmatprep.mubr.msk.bf16.mxu0 %vm1022_vm4, %v9500_v19  ;;  %v910_v46 = vrot.slane %v909_v58, 4  ;;  %v4934_v47 = vrot.slane %v12648_v8, 5  ;;  %v9470_v48 = vrot.slane %v9278_v36, 9  ;;  %v4938_v60 = vrot.slane %v9279_v40, 5  ;;  %v13180_v8 = vld [vmem:[%s17113_s0 + $0x4] sm:$0xf] }
  0xed   :  { %10548 = vmatprep.mubr.msk.bf16.mxu1 %vm1022_vm4, %v9036_v41  ;;  %v920_v52 = vrot.slane %v919_v42, 4  ;;  %v4932_v49 = vsel %vm12674_vm7, %v9469_v39, %v4931_v44  ;;  %v4933_v50 = vrot.slane %v4931_v44, 4  ;;  %v9070_v54 = vcombine.low %v13175_v53, %v13180_v8  ;;  %v9288_v23 = vld [vmem:[%s17113_s0 + $0x268] sm:$0xf]  ;;  %v9289_v34 = vld [vmem:[%s17113_s0 + $0x26c] sm:$0x1] }
  0xee   :  { %v915_v57 = vsel %vm12191_vm3, %v910_v46, %v914_v32  ;;  %v4941_v27 = vrot.slane %v9280_v45, 5  ;;  %v4939_v63 = vsel %vm12674_vm7, %v9470_v48, %v4938_v60  ;;  %v4940_v1 = vrot.slane %v4938_v60, 4  ;;  %v13226_v35 = vld [vmem:[%s17113_s0 + $0xc] sm:$0xf]  ;;  %v13231_v36 = vld [vmem:[%s17113_s0 + $0x10] sm:$0xf] }
  0xef   :  { %v925_v55 = vsel %vm12191_vm3, %v920_v52, %v924_v43  ;;  %v4935_v59 = vsel %vm12674_vm7, %v4933_v50, %v4934_v47  ;;  %v9471_v25 = vrot.slane %v9281_v2, 9  ;;  %v4945_v20 = vrot.slane %v9282_v6, 5  ;;  %v9290_v40 = vld [vmem:[%s17113_s0 + $0x270] sm:$0xf]  ;;  %v9291_v41 = vld [vmem:[%s17113_s0 + $0x274] sm:$0xf] }
  0xf0   :  { %v9037_v4 = vcombine.low %v915_v57, %v925_v55  ;;  %v9501_v5 = vcombine.low %v4932_v49, %v4935_v59  ;;  %v4942_v7 = vsel %vm12674_vm7, %v4940_v1, %v4941_v27  ;;  %v4948_v29 = vrot.slane %v9283_v10, 5  ;;  %v11749_v42 = vld [vmem:[%s17114_s1 + $0x8] sm:$0xf]  ;;  %v9292_v47 = vld [vmem:[%s17113_s0 + $0x278] sm:$0x1] }
  0xf1   :  { %v9502_v14 = vcombine.low %v4939_v63, %v4942_v7  ;;  %v9472_v30 = vrot.slane %v9284_v15, 9  ;;  %v4952_v32 = vrot.slane %v9285_v9, 5  ;;  %v9071_v37 = vcombine.low %v13226_v35, %v13231_v36  ;;  %v13257_v52 = vld [vmem:[%s17113_s0 + $0x18] sm:$0xf]  ;;  %v13262_v49 = vld [vmem:[%s17113_s0 + $0x1c] sm:$0xf] }
  0xf2   :  { %10549 = vmatmul.mubr.msk.bf16.gmra.mrb[60].mxu1 %vm1022_vm4, %v9037_v4  ;;  %10847 = vmatmul.mubr.msk.bf16.gmra.mrb[28].mxu0 %vm1022_vm4, %v9501_v5  ;;  %v4946_v19 = vsel %vm12674_vm7, %v9471_v25, %v4945_v20  ;;  %v4947_v58 = vrot.slane %v4945_v20, 4  ;;  %v4955_v39 = vrot.slane %v9286_v17, 5  ;;  %v2412_v43 = vsel %vm1119_vm0, %v11749_v42, 0  ;;  %v9294_v63 = vld [vmem:[%s17113_s0 + $0x280] sm:$0xf] }
  0xf3   :  { %10554 = vmatprep.mubr.msk.bf16.mxu1 %vm1022_vm4, %v9070_v54  ;;  %10850 = vmatprep.mubr.msk.bf16.mxu0 %vm1022_vm4, %v9502_v14  ;;  %v4953_v44 = vsel %vm12674_vm7, %v9472_v30, %v4952_v32  ;;  %v4954_v45 = vrot.slane %v4952_v32, 4  ;;  %v4959_v46 = vrot.slane %v9288_v23, 5  ;;  %v9072_v50 = vcombine.low %v13257_v52, %v13262_v49  ;;  %v9297_v5 = vld [vmem:[%s17113_s0 + $0x28c] sm:$0xf]  ;;  %v9293_v25 = vld [vmem:[%s17113_s0 + $0x27c] sm:$0xf] }
  0xf4   :  { %v4949_v48 = vsel %vm12674_vm7, %v4947_v58, %v4948_v29  ;;  %v9473_v60 = vrot.slane %v9287_v22, 9  ;;  %v4962_v57 = vrot.slane %v9289_v34, 5  ;;  %v9474_v59 = vrot.slane %v9290_v40, 9  ;;  %v13277_v6 = vld [vmem:[%s17114_s1 + $0xc] sm:$0xf] }
  0xf5   :  { %v9503_v54 = vcombine.low %v4946_v19, %v4949_v48  ;;  %v4956_v27 = vsel %vm12674_vm7, %v4954_v45, %v4955_v39  ;;  %v4961_v55 = vrot.slane %v4959_v46, 4  ;;  %v4966_v2 = vrot.slane %v9291_v41, 5  ;;  %v9295_v17 = vld [vmem:[%s17113_s0 + $0x284] sm:$0x1]  ;;  %v9296_v23 = vld [vmem:[%s17113_s0 + $0x288] sm:$0xf] }
  0xf6   :  { %v9504_v1 = vcombine.low %v4953_v44, %v4956_v27  ;;  %v4969_v4 = vrot.slane %v9292_v47, 5  ;;  %v4960_v7 = vsel %vm12674_vm7, %v9473_v60, %v4959_v46  ;;  %v4973_v9 = vrot.slane %v9294_v63, 5  ;;  %v9298_v29 = vld [vmem:[%s17113_s0 + $0x290] sm:$0x1]  ;;  %v13308_v30 = vld [vmem:[%s17113_s0 + $0x24] sm:$0xf] }
  0xf7   :  { %v4963_v10 = vsel %vm12674_vm7, %v4961_v55, %v4962_v57  ;;  %v4968_v15 = vrot.slane %v4966_v2, 4  ;;  %v4967_v14 = vsel %vm12674_vm7, %v9474_v59, %v4966_v2  ;;  %v4980_v20 = vrot.slane %v9297_v5, 5  ;;  %v13313_v32 = vld [vmem:[%s17113_s0 + $0x28] sm:$0xf]  ;;  %v13320_v19 = vld [vmem:[%s17113_s0 + $0x30] sm:$0xf] }
  0xf8   :  { %v9073_v34 = vcombine.low %v13308_v30, %v13313_v32  ;;  %v13325_v58 = vld [vmem:[%s17113_s0 + $0x34] sm:$0xf]  ;;  %v9475_v41 = vrot.slane %v9293_v25, 9  ;;  %v4975_v42 = vrot.slane %v4973_v9, 4  ;;  %v9476_v44 = vrot.slane %v9296_v23, 9 }
  0xf9   :  { %v4970_v22 = vsel %vm12674_vm7, %v4968_v15, %v4969_v4  ;;  %v9074_v39 = vcombine.low %v13320_v19, %v13325_v58  ;;  %v4982_v45 = vrot.slane %v4980_v20, 4  ;;  %v4983_v46 = vrot.slane %v9298_v29, 5  ;;  %v9300_v47 = vld [vmem:[%s17113_s0 + $0x298] sm:$0xf]  ;;  %v9303_v48 = vld [vmem:[%s17113_s0 + $0x2a4] sm:$0xf] }
  0xfa   :  { %10555 = vmatmul.mubr.msk.bf16.vlgmr.msra.gmra.mrb[0].mxu1 %vm1022_vm4, %v9071_v37  ;;  %10851 = vmatmul.mubr.msk.bf16.gmra.mrb[32].mxu0 %vm1022_vm4, %v9503_v54  ;;  %v9505_v37 = vcombine.low %v4960_v7, %v4963_v10  ;;  %v9506_v40 = vcombine.low %v4967_v14, %v4970_v22  ;;  %v4987_v57 = vrot.slane %v9300_v47, 5  ;;  %v4981_v54 = vsel %vm12674_vm7, %v9476_v44, %v4980_v20  ;;  %v9299_v55 = vld [vmem:[%s17113_s0 + $0x294] sm:$0xf]  ;;  %v9301_v59 = vld [vmem:[%s17113_s0 + $0x29c] sm:$0x1] }
  0xfb   :  { %10619 = vmatpush3.bf16.msra.mxu1 %v2412_v43  ;;  %10558 = vmatprep.mubr.msk.bf16.mxu1 %vm1022_vm4, %v9072_v50  ;;  %v4976_v43 = vrot.slane %v9295_v17, 5  ;;  %v4974_v50 = vsel %vm12674_vm7, %v9475_v41, %v4973_v9  ;;  %v4984_v27 = vsel %vm12674_vm7, %v4982_v45, %v4983_v46  ;;  %v4994_v63 = vrot.slane %v9303_v48, 5  ;;  %v9304_v2 = vld [vmem:[%s17113_s0 + $0x2a8] sm:$0x1]  ;;  %v13362_v4 = vld [vmem:[%s17113_s0 + $0x3c] sm:$0xf] }
  0xfc   :  { %10854 = vmatprep.mubr.msk.bf16.mxu0 %vm1022_vm4, %v9504_v1  ;;  %11597 = vmatprep.subr.msk.bf16.mxu1 %vm1119_vm0, %v13277_v6  ;;  %v9302_v1 = vld [vmem:[%s17113_s0 + $0x2a0] sm:$0xf]  ;;  %v13374_v15 = vld [vmem:[%s17113_s0 + $0x48] sm:$0xf]  ;;  %v13379_v9 = vld [vmem:[%s17113_s0 + $0x4c] sm:$0xf]  ;;  %v9508_v25 = vcombine.low %v4981_v54, %v4984_v27 }
  0xfd   :  { %v4977_v60 = vsel %vm12674_vm7, %v4975_v42, %v4976_v43  ;;  %v13367_v5 = vld [vmem:[%s17113_s0 + $0x40] sm:$0xf]  ;;  %v9076_v14 = vcombine.low %v13374_v15, %v13379_v9  ;;  %v9477_v17 = vrot.slane %v9299_v55, 9  ;;  %v4989_v20 = vrot.slane %v4987_v57, 4  ;;  %v9305_v45 = vld [vmem:[%s17113_s0 + $0x2ac] sm:$0xf] }
  0xfe   :  { %v9075_v7 = vcombine.low %v13362_v4, %v13367_v5  ;;  %v9507_v10 = vcombine.low %v4974_v50, %v4977_v60  ;;  %v4990_v22 = vrot.slane %v9301_v59, 5  ;;  %v9478_v23 = vrot.slane %v9302_v1, 9  ;;  %v9307_v46 = vld [vmem:[%s17113_s0 + $0x2b4] sm:$0x1]  ;;  %v9308_v48 = vld [vmem:[%s17113_s0 + $0x2b8] sm:$0xf] }
  0xff   :  { %v4996_v29 = vrot.slane %v4994_v63, 4  ;;  %v9310_v50 = vld [vmem:[%s17113_s0 + $0x2c0] sm:$0x1]  ;;  %v13416_v60 = vld [vmem:[%s17113_s0 + $0x54] sm:$0xf] }
 0x100   :  { %v4991_v41 = vsel %vm12674_vm7, %v4989_v20, %v4990_v22  ;;  %v4995_v43 = vsel %vm12674_vm7, %v9478_v23, %v4994_v63  ;;  %v13428_v55 = vld [vmem:[%s17113_s0 + $0x60] sm:$0xf]  ;;  %v13433_v59 = vld [vmem:[%s17113_s0 + $0x64] sm:$0xf]  ;;  %v9312_v20 = vld [vmem:[%s17113_s0 + $0x2c8] sm:$0xf] }
 0x101   :  { %17254 = vst [vmem:[#allocation11_spill] sm:$0xff] %v13428_v55  ;;  %17255 = vst [vmem:[#allocation12_spill] sm:$0xff] %v13433_v59  ;;  %v9078_v63 = vcombine.low %v13428_v55, %v13433_v59  ;;  %v9315_v22 = vld [vmem:[%s17113_s0 + $0x2d4] sm:$0xf]  ;;  %v9097_v59 = vcombine.low %v12983_v26, %v12988_v33  ;;  %v13954_v33 = vld [vmem:[%s17113_s0 + $0x39c] sm:$0xf]  ;;  %v9100_v26 = vcombine.low %v13089_v11, %v13099_v28 }
 0x102   :  { %10559 = vmatmul.mubr.msk.bf16.gmra.mrb[4].mxu1 %vm1022_vm4, %v9073_v34  ;;  %10855 = vmatmul.mubr.msk.bf16.gmra.mrb[36].mxu0 %vm1022_vm4, %v9505_v37  ;;  %v4997_v34 = vrot.slane %v9304_v2, 5  ;;  %v9306_v37 = vld [vmem:[%s17113_s0 + $0x2b0] sm:$0xf]  ;;  %v9479_v2 = vrot.slane %v9305_v45, 9  ;;  %v13470_v45 = vld [vmem:[%s17113_s0 + $0x6c] sm:$0xf] }
 0x103   :  { %10562 = vmatprep.mubr.msk.bf16.mxu1 %vm1022_vm4, %v9074_v39  ;;  %10858 = vmatprep.mubr.msk.bf16.mxu0 %vm1022_vm4, %v9506_v40  ;;  %v9309_v39 = vld [vmem:[%s17113_s0 + $0x2bc] sm:$0xf]  ;;  %v4988_v40 = vsel %vm12674_vm7, %v9477_v17, %v4987_v57  ;;  %v5001_v42 = vrot.slane %v9306_v37, 5  ;;  %v13421_v57 = vld [vmem:[%s17113_s0 + $0x58] sm:$0xf]  ;;  %v5011_v17 = vrot.slane %v9310_v50, 5 }
 0x104   :  { %v4998_v44 = vsel %vm12674_vm7, %v4996_v29, %v4997_v34  ;;  %v5008_v47 = vrot.slane %v9309_v39, 5  ;;  %v9077_v54 = vcombine.low %v13416_v60, %v13421_v57  ;;  %v9509_v27 = vcombine.low %v4988_v40, %v4991_v41  ;;  %v9311_v40 = vld [vmem:[%s17113_s0 + $0x2c4] sm:$0xf]  ;;  %v9313_v41 = vld [vmem:[%s17113_s0 + $0x2cc] sm:$0x1]  ;;  %17256 = vst [vmem:[#allocation13_spill] sm:$0xff] %v13470_v45 }
 0x105   :  { %v9510_v1 = vcombine.low %v4995_v43, %v4998_v44  ;;  %v5002_v23 = vsel %vm12674_vm7, %v9479_v2, %v5001_v42  ;;  %v5015_v34 = vrot.slane %v9312_v20, 5  ;;  %v5022_v43 = vrot.slane %v9315_v22, 5  ;;  %v9316_v44 = vld [vmem:[%s17113_s0 + $0x2d8] sm:$0x1]  ;;  %v9321_v20 = vld [vmem:[%s17113_s0 + $0x2ec] sm:$0xf] }
 0x106   :  { %v13482_v50 = vld [vmem:[%s17113_s0 + $0x78] sm:$0xf]  ;;  %17304 = vst [vmem:[#allocation61_spill] sm:$0xff] %v13954_v33  ;;  %v14023_v11 = vld [vmem:[%s17113_s0 + $0x3c4] sm:$0xf]  ;;  %v9135_v28 = vrot.slane %v13226_v35, 9 }
 0x107   :  { %17258 = vst [vmem:[#allocation15_spill] sm:$0xff] %v13482_v50  ;;  %v5017_v2 = vrot.slane %v5015_v34, 4  ;;  %17311 = vst [vmem:[#allocation68_spill] sm:$0xff] %v14023_v11  ;;  %v14040_v35 = vld [vmem:[%s17113_s0 + $0x3cc] sm:$0xf] }
 0x108   :  { %17313 = vst [vmem:[#allocation69_spill] sm:$0xff] %v14040_v35 }
 0x10a   :  { %10563 = vmatmul.mubr.msk.bf16.gmra.mrb[8].mxu1 %vm1022_vm4, %v9075_v7  ;;  %10859 = vmatmul.mubr.msk.bf16.gmra.mrb[40].mxu0 %vm1022_vm4, %v9507_v10  ;;  %v5003_v7 = vrot.slane %v5001_v42, 4  ;;  %v5004_v10 = vrot.slane %v9307_v46, 5  ;;  %v9314_v42 = vld [vmem:[%s17113_s0 + $0x2d0] sm:$0xf] }
 0x10b   :  { %10566 = vmatprep.mubr.msk.bf16.mxu1 %vm1022_vm4, %v9076_v14  ;;  %10862 = vmatprep.mubr.msk.bf16.mxu0 %vm1022_vm4, %v9508_v25  ;;  %v9480_v14 = vrot.slane %v9308_v48, 9  ;;  %v5010_v25 = vrot.slane %v5008_v47, 4  ;;  %v13475_v46 = vld [vmem:[%s17113_s0 + $0x70] sm:$0xf] }
 0x10c   :  { %v5005_v29 = vsel %vm12674_vm7, %v5003_v7, %v5004_v10  ;;  %17257 = vst [vmem:[#allocation14_spill] sm:$0xff] %v13475_v46  ;;  %v5018_v7 = vrot.slane %v9313_v41, 5  ;;  %v9482_v10 = vrot.slane %v9314_v42, 9  ;;  %v9319_v41 = vld [vmem:[%s17113_s0 + $0x2e4] sm:$0x1]  ;;  %v5036_v42 = vrot.slane %v9321_v20, 5 }
 0x10d   :  { %v5009_v37 = vsel %vm12674_vm7, %v9480_v14, %v5008_v47  ;;  %v5012_v39 = vsel %vm12674_vm7, %v5010_v25, %v5011_v17  ;;  %v9079_v47 = vcombine.low %v13470_v45, %v13475_v46  ;;  %v9511_v48 = vcombine.low %v5002_v23, %v5005_v29  ;;  %v9318_v17 = vld [vmem:[%s17113_s0 + $0x2e0] sm:$0xf]  ;;  %v13886_v45 = vld [vmem:[%s17113_s0 + $0x8] sm:$0x1] }
 0x10e   :  { %v5024_v14 = vrot.slane %v5022_v43, 4  ;;  %v5025_v25 = vrot.slane %v9316_v44, 5  ;;  %v5019_v23 = vsel %vm12674_vm7, %v5017_v2, %v5018_v7  ;;  %v5029_v29 = vrot.slane %v9318_v17, 5  ;;  %v13524_v44 = vld [vmem:[%s17113_s0 + $0x84] sm:$0xf] }
 0x10f   :  { %17260 = vst [vmem:[#allocation17_spill] sm:$0xff] %v13524_v44  ;;  %v5038_v20 = vrot.slane %v5036_v42, 4 }
 0x112   :  { %10567 = vmatmul.mubr.msk.bf16.gmra.mrb[12].mxu1 %vm1022_vm4, %v9077_v54  ;;  %10863 = vmatmul.mubr.msk.bf16.gmra.mrb[44].mxu0 %vm1022_vm4, %v9509_v27  ;;  %v13487_v54 = vld [vmem:[%s17113_s0 + $0x7c] sm:$0xf] }
 0x113   :  { %10570 = vmatprep.mubr.msk.bf16.mxu1 %vm1022_vm4, %v9078_v63  ;;  %10866 = vmatprep.mubr.msk.bf16.mxu0 %vm1022_vm4, %v9510_v1  ;;  %17259 = vst [vmem:[#allocation16_spill] sm:$0xff] %v13487_v54  ;;  %v9080_v27 = vcombine.low %v13482_v50, %v13487_v54  ;;  %v9512_v63 = vcombine.low %v5009_v37, %v5012_v39  ;;  %v9481_v1 = vrot.slane %v9311_v40, 9  ;;  %v9317_v40 = vld [vmem:[%s17113_s0 + $0x2dc] sm:$0xf]  ;;  %v13909_v54 = vld [vmem:[%s17113_s0 + $0x388] sm:$0xf] }
 0x114   :  { %v5023_v37 = vsel %vm12674_vm7, %v9482_v10, %v5022_v43  ;;  %v5026_v39 = vsel %vm12674_vm7, %v5024_v14, %v5025_v25  ;;  %v9322_v43 = vld [vmem:[%s17113_s0 + $0x2f0] sm:$0x1]  ;;  %v9483_v10 = vrot.slane %v9317_v40, 9  ;;  %v5031_v14 = vrot.slane %v5029_v29, 4  ;;  %17301 = vst [vmem:[#allocation58_spill] sm:$0xff] %v13909_v54 }
 0x115   :  { %v5016_v22 = vsel %vm12674_vm7, %v9481_v1, %v5015_v34  ;;  %v9320_v34 = vld [vmem:[%s17113_s0 + $0x2e8] sm:$0xf]  ;;  %v13541_v1 = vld [vmem:[%s17113_s0 + $0x94] sm:$0xf]  ;;  %v9514_v7 = vcombine.low %v5023_v37, %v5026_v39  ;;  %v5032_v25 = vrot.slane %v9319_v41, 5 }
 0x116   :  { %17263 = vst [vmem:[#allocation20_spill] sm:$0xff] %v13541_v1  ;;  %v9484_v17 = vrot.slane %v9320_v34, 9  ;;  %v5030_v37 = vsel %vm12674_vm7, %v9483_v10, %v5029_v29  ;;  %v13569_v29 = vld [vmem:[%s17113_s0 + $0x9c] sm:$0xf]  ;;  %v13586_v10 = vld [vmem:[%s17113_s0 + $0xac] sm:$0xf] }
 0x117   :  { %v5033_v39 = vsel %vm12674_vm7, %v5031_v14, %v5032_v25  ;;  %17264 = vst [vmem:[#allocation21_spill] sm:$0xff] %v13569_v29  ;;  %17267 = vst [vmem:[#allocation24_spill] sm:$0xff] %v13586_v10 }
 0x118   :  { %v5037_v41 = vsel %vm12674_vm7, %v9484_v17, %v5036_v42  ;;  %v13574_v42 = vld [vmem:[%s17113_s0 + $0xa0] sm:$0xf] }
 0x119   :  { %17265 = vst [vmem:[#allocation22_spill] sm:$0xff] %v13574_v42 }
 0x11a   :  { %10571 = vmatmul.mubr.msk.bf16.gmra.mrb[16].mxu1 %vm1022_vm4, %v9079_v47  ;;  %10867 = vmatmul.mubr.msk.bf16.gmra.mrb[48].mxu0 %vm1022_vm4, %v9511_v48  ;;  %v13529_v47 = vld [vmem:[%s17113_s0 + $0x88] sm:$0xf] }
 0x11b   :  { %10574 = vmatprep.mubr.msk.bf16.mxu1 %vm1022_vm4, %v9080_v27  ;;  %10870 = vmatprep.mubr.msk.bf16.mxu0 %vm1022_vm4, %v9512_v63  ;;  %17261 = vst [vmem:[#allocation18_spill] sm:$0xff] %v13529_v47  ;;  %v9081_v48 = vcombine.low %v13524_v44, %v13529_v47  ;;  %v9513_v27 = vcombine.low %v5016_v22, %v5019_v23  ;;  %v13536_v63 = vld [vmem:[%s17113_s0 + $0x90] sm:$0xf]  ;;  %v5039_v22 = vrot.slane %v9322_v43, 5  ;;  %v9324_v23 = vld [vmem:[%s17113_s0 + $0x2f8] sm:$0xf] }
 0x11c   :  { %17262 = vst [vmem:[#allocation19_spill] sm:$0xff] %v13536_v63  ;;  %v9082_v2 = vcombine.low %v13536_v63, %v13541_v1  ;;  %v5043_v40 = vrot.slane %v9324_v23, 5  ;;  %v9323_v43 = vld [vmem:[%s17113_s0 + $0x2f4] sm:$0xf]  ;;  %v13840_v63 = vld [vmem:[%s17113_s0 + $0x120] sm:$0xf] }
 0x11d   :  { %v5040_v34 = vsel %vm12674_vm7, %v5038_v20, %v5039_v22  ;;  %v9485_v17 = vrot.slane %v9323_v43, 9  ;;  %17294 = vst [vmem:[#allocation51_spill] sm:$0xff] %v13840_v63  ;;  %v13845_v44 = vld [vmem:[%s17113_s0 + $0x124] sm:$0xf]  ;;  %v13963_v47 = vld [vmem:[%s17113_s0 + $0x3a0] sm:$0xf] }
 0x11e   :  { %v9516_v25 = vcombine.low %v5037_v41, %v5040_v34  ;;  %v5045_v20 = vrot.slane %v5043_v40, 4  ;;  %v13606_v41 = vld [vmem:[%s17113_s0 + $0x304] sm:$0xf]  ;;  %v13611_v34 = vld [vmem:[%s17113_s0 + $0xb4] sm:$0xf]  ;;  %17295 = vst [vmem:[#allocation52_spill] sm:$0xff] %v13845_v44  ;;  %v9094_v50 = vcombine.low %v13840_v63, %v13845_v44  ;;  %v9096_v44 = vcombine.low %v12945_v18, %v12955_v51 }
 0x11f   :  { %v5044_v23 = vsel %vm12674_vm7, %v9485_v17, %v5043_v40  ;;  %17268 = vst [vmem:[#allocation25_spill] sm:$0xff] %v13611_v34  ;;  %v13616_v40 = vld [vmem:[%s17113_s0 + $0xb8] sm:$0xf]  ;;  %v13641_v17 = vld [vmem:[%s17113_s0 + $0x30c] sm:$0xf]  ;;  %17305 = vst [vmem:[#allocation62_spill] sm:$0xff] %v13963_v47 }
 0x120   :  { %17269 = vst [vmem:[#allocation26_spill] sm:$0xff] %v13616_v40  ;;  %v9085_v43 = vcombine.low %v13611_v34, %v13616_v40  ;;  %v13863_v63 = vld [vmem:[%s17113_s0 + $0x370] sm:$0xf]  ;;  %v13929_v51 = vld [vmem:[%s17113_s0 + $0x394] sm:$0xf] }
 0x121   :  { %17297 = vst [vmem:[#allocation54_spill] sm:$0xff] %v13863_v63  ;;  %17303 = vst [vmem:[#allocation60_spill] sm:$0xff] %v13929_v51  ;;  %v14016_v18 = vld [vmem:[%s17113_s0 + $0x3c0] sm:$0xf] }
 0x122   :  { %10575 = vmatmul.mubr.msk.bf16.gmra.mrb[20].mxu1 %vm1022_vm4, %v9081_v48  ;;  %10871 = vmatmul.mubr.msk.bf16.gmra.mrb[52].mxu0 %vm1022_vm4, %v9513_v27  ;;  %v9325_v48 = vld [vmem:[%s17113_s0 + $0x2fc] sm:$0x1]  ;;  %v9083_v27 = vcombine.low %v13569_v29, %v13574_v42  ;;  %v13793_v29 = vld [vmem:[%s17113_s0 + $0x10c] sm:$0xf]  ;;  %17310 = vst [vmem:[#allocation67_spill] sm:$0xff] %v14016_v18 }
 0x123   :  { %10578 = vmatprep.mubr.msk.bf16.mxu1 %vm1022_vm4, %v9082_v2  ;;  %10874 = vmatprep.mubr.msk.bf16.mxu0 %vm1022_vm4, %v9514_v7  ;;  %v9515_v2 = vcombine.low %v5030_v37, %v5033_v39  ;;  %v13581_v7 = vld [vmem:[%s17113_s0 + $0xa8] sm:$0xf]  ;;  %v5046_v22 = vrot.slane %v9325_v48, 5  ;;  %v13601_v39 = vld [vmem:[%s17113_s0 + $0x300] sm:$0xf]  ;;  %17287 = vst [vmem:[#allocation44_spill] sm:$0xff] %v13793_v29 }
 0x124   :  { %17266 = vst [vmem:[#allocation23_spill] sm:$0xff] %v13581_v7  ;;  %v9084_v14 = vcombine.low %v13581_v7, %v13586_v10  ;;  %v13788_v7 = vld [vmem:[%s17113_s0 + $0x108] sm:$0xf] }
 0x125   :  { %v5047_v37 = vsel %vm12674_vm7, %v5045_v20, %v5046_v22  ;;  %v13646_v20 = vld [vmem:[%s17113_s0 + $0x310] sm:$0xf]  ;;  %v13651_v22 = vld [vmem:[%s17113_s0 + $0x318] sm:$0xf]  ;;  %17286 = vst [vmem:[#allocation43_spill] sm:$0xff] %v13788_v7  ;;  %v9092_v10 = vcombine.low %v13788_v7, %v13793_v29 }
 0x126   :  { %v9517_v48 = vcombine.low %v5044_v23, %v5047_v37  ;;  %v13656_v23 = vld [vmem:[%s17113_s0 + $0x31c] sm:$0xf]  ;;  %v13661_v37 = vld [vmem:[%s17113_s0 + $0xcc] sm:$0xf]  ;;  %v13811_v7 = vld [vmem:[%s17113_s0 + $0x358] sm:$0xf] }
 0x127   :  { %17272 = vst [vmem:[#allocation29_spill] sm:$0xff] %v13661_v37  ;;  %17289 = vst [vmem:[#allocation46_spill] sm:$0xff] %v13811_v7 }
 0x12a   :  { %10579 = vmatmul.mubr.msk.bf16.gmra.mrb[24].mxu1 %vm1022_vm4, %v9083_v27  ;;  %10875 = vmatmul.mubr.msk.bf16.gmra.mrb[56].mxu0 %vm1022_vm4, %v9515_v2  ;;  %v13623_v27 = vld [vmem:[%s17113_s0 + $0xc0] sm:$0xf]  ;;  %v13628_v2 = vld [vmem:[%s17113_s0 + $0xc4] sm:$0xf] }
 0x12b   :  { %10582 = vmatprep.mubr.msk.bf16.mxu1 %vm1022_vm4, %v9084_v14  ;;  %10878 = vmatprep.mubr.msk.bf16.mxu0 %vm1022_vm4, %v9516_v25  ;;  %17270 = vst [vmem:[#allocation27_spill] sm:$0xff] %v13623_v27  ;;  %17271 = vst [vmem:[#allocation28_spill] sm:$0xff] %v13628_v2  ;;  %v9086_v14 = vcombine.low %v13623_v27, %v13628_v2  ;;  %v9646_v25 = vcombine.low %v13601_v39, %v13606_v41  ;;  %v7266_v2 = vsel %vm1119_vm0, %v12854_v12, 0  ;;  %v13704_v12 = vld [vmem:[%s17113_s0 + $0x328] sm:$0xf] }
 0x12c   :  { %v13741_v27 = vld [vmem:[%s17113_s0 + $0xf4] sm:$0xf] }
 0x12d   :  { %17281 = vst [vmem:[#allocation38_spill] sm:$0xff] %v13741_v27 }
 0x132   :  { %10583 = vmatmul.mubr.msk.bf16.gmra.mrb[28].mxu1 %vm1022_vm4, %v9085_v43  ;;  %10879 = vmatmul.mubr.msk.bf16.gmra.mrb[60].mxu0 %vm1022_vm4, %v9517_v48  ;;  %v13666_v43 = vld [vmem:[%s17113_s0 + $0xd0] sm:$0xf] }
 0x133   :  { %10586 = vmatprep.mubr.msk.bf16.mxu1 %vm1022_vm4, %v9086_v14  ;;  %10884 = vmatprep.mubr.msk.bf16.mxu0 %vm1022_vm4, %v9646_v25  ;;  %17273 = vst [vmem:[#allocation30_spill] sm:$0xff] %v13666_v43  ;;  %v9087_v48 = vcombine.low %v13661_v37, %v13666_v43  ;;  %v9647_v14 = vcombine.low %v13641_v17, %v13646_v20  ;;  %v13675_v25 = vld [vmem:[%s17113_s0 + $0xd8] sm:$0xf]  ;;  %v13691_v43 = vld [vmem:[%s17114_s1 + $0x20] sm:$0xf] }
 0x134   :  { %17274 = vst [vmem:[#allocation31_spill] sm:$0xff] %v13675_v25  ;;  %v9088_v31 = vcombine.low %v13675_v25, %v13680_v3  ;;  %v9648_v37 = vcombine.low %v13651_v22, %v13656_v23  ;;  %17276 = vst [vmem:[#allocation33_spill] sm:$0xff] %v13691_v43  ;;  %v13699_v25 = vld [vmem:[%s17113_s0 + $0x324] sm:$0xf] }
 0x135   :  { %17277 = vst [vmem:[#allocation34_spill] sm:$0xff] %v13699_v25  ;;  %v9649_v3 = vcombine.low %v13699_v25, %v13704_v12  ;;  %v13974_v25 = vld [vmem:[%s17113_s0 + $0x3a8] sm:$0xf] }
 0x136   :  { %17306 = vst [vmem:[#allocation63_spill] sm:$0xff] %v13974_v25 }
 0x13a   :  { %10587 = vmatmul.mubr.msk.bf16.gmra.mrb[32].mxu1 %vm1022_vm4, %v9087_v48  ;;  %10885 = vmatmul.mubr.msk.bf16.vlgmr.msra.gmra.mrb[0].mxu0 %vm1022_vm4, %v9647_v14  ;;  %v13710_v48 = vld [vmem:[%s17113_s0 + $0x330] sm:$0xf] }
 0x13b   :  { %10949 = vmatpush3.bf16.msra.mxu0 %v7266_v2  ;;  %10590 = vmatprep.mubr.msk.bf16.mxu1 %vm1022_vm4, %v9088_v31  ;;  %v13715_v31 = vld [vmem:[%s17113_s0 + $0x334] sm:$0xf]  ;;  %v13722_v2 = vld [vmem:[%s17113_s0 + $0xe4] sm:$0xf] }
 0x13c   :  { %10888 = vmatprep.mubr.msk.bf16.mxu0 %vm1022_vm4, %v9648_v37  ;;  %11603 = vmatprep.subr.msk.bf16.mxu0 %vm1119_vm0, %v13691_v43  ;;  %17278 = vst [vmem:[#allocation35_spill] sm:$0xff] %v13722_v2  ;;  %v13727_v37 = vld [vmem:[%s17113_s0 + $0xe8] sm:$0xf]  ;;  %v13736_v43 = vld [vmem:[%s17113_s0 + $0xf0] sm:$0xf]  ;;  %v9650_v40 = vcombine.low %v13710_v48, %v13715_v31 }
 0x13d   :  { %17279 = vst [vmem:[#allocation36_spill] sm:$0xff] %v13727_v37  ;;  %v9089_v14 = vcombine.low %v13722_v2, %v13727_v37  ;;  %17280 = vst [vmem:[#allocation37_spill] sm:$0xff] %v13736_v43  ;;  %v9090_v34 = vcombine.low %v13736_v43, %v13741_v27  ;;  %v13754_v2 = vld [vmem:[%s17113_s0 + $0x33c] sm:$0xf]  ;;  %v13759_v43 = vld [vmem:[%s17113_s0 + $0x340] sm:$0xf] }
 0x13e   :  { %v9651_v37 = vcombine.low %v13754_v2, %v13759_v43 }
 0x142   :  { %10591 = vmatmul.mubr.msk.bf16.gmra.mrb[36].mxu1 %vm1022_vm4, %v9089_v14  ;;  %10889 = vmatmul.mubr.msk.bf16.gmra.mrb[4].mxu0 %vm1022_vm4, %v9649_v3  ;;  %v13764_v14 = vld [vmem:[%s17113_s0 + $0x348] sm:$0xf]  ;;  %v13769_v3 = vld [vmem:[%s17113_s0 + $0x34c] sm:$0xf] }
 0x143   :  { %10594 = vmatprep.mubr.msk.bf16.mxu1 %vm1022_vm4, %v9090_v34  ;;  %10892 = vmatprep.mubr.msk.bf16.mxu0 %vm1022_vm4, %v9650_v40  ;;  %17282 = vst [vmem:[#allocation39_spill] sm:$0xff] %v13764_v14  ;;  %17283 = vst [vmem:[#allocation40_spill] sm:$0xff] %v13769_v3  ;;  %v13774_v34 = vld [vmem:[%s17113_s0 + $0xfc] sm:$0xf]  ;;  %v13779_v40 = vld [vmem:[%s17113_s0 + $0x100] sm:$0xf]  ;;  %v9652_v42 = vcombine.low %v13764_v14, %v13769_v3 }
 0x144   :  { %17284 = vst [vmem:[#allocation41_spill] sm:$0xff] %v13774_v34  ;;  %17285 = vst [vmem:[#allocation42_spill] sm:$0xff] %v13779_v40  ;;  %v9091_v27 = vcombine.low %v13774_v34, %v13779_v40  ;;  %v13806_v34 = vld [vmem:[%s17113_s0 + $0x354] sm:$0xf]  ;;  %v9552_v3 = vld [vmem:[%s17113_s0 + $0x308] sm:$0x1] }
 0x145   :  { %17288 = vst [vmem:[#allocation45_spill] sm:$0xff] %v13806_v34  ;;  %v9653_v40 = vcombine.low %v13806_v34, %v13811_v7  ;;  %v9137_v34 = vrot.slane %v13308_v30, 9  ;;  %v17364_v7 = vld [vmem:[#allocation28_spill] sm:$0xff] }
 0x146   :  { %v2109_v14 = vrot.slane %v17364_v7, 5 }
 0x14a   :  { %10595 = vmatmul.mubr.msk.bf16.gmra.mrb[40].mxu1 %vm1022_vm4, %v9091_v27  ;;  %10893 = vmatmul.mubr.msk.bf16.gmra.mrb[8].mxu0 %vm1022_vm4, %v9651_v37  ;;  %v13816_v27 = vld [vmem:[%s17113_s0 + $0x360] sm:$0xf]  ;;  %v13831_v37 = vld [vmem:[%s17113_s0 + $0x118] sm:$0xf] }
 0x14b   :  { %10598 = vmatprep.mubr.msk.bf16.mxu1 %vm1022_vm4, %v9092_v10  ;;  %10896 = vmatprep.mubr.msk.bf16.mxu0 %vm1022_vm4, %v9652_v42  ;;  %17290 = vst [vmem:[#allocation47_spill] sm:$0xff] %v13816_v27  ;;  %v13821_v10 = vld [vmem:[%s17113_s0 + $0x364] sm:$0xf]  ;;  %v13826_v42 = vld [vmem:[%s17113_s0 + $0x114] sm:$0xf]  ;;  %17293 = vst [vmem:[#allocation50_spill] sm:$0xff] %v13831_v37 }
 0x14c   :  { %17291 = vst [vmem:[#allocation48_spill] sm:$0xff] %v13821_v10  ;;  %17292 = vst [vmem:[#allocation49_spill] sm:$0xff] %v13826_v42  ;;  %v9093_v29 = vcombine.low %v13826_v42, %v13831_v37  ;;  %v9654_v1 = vcombine.low %v13816_v27, %v13821_v10  ;;  %v13858_v42 = vld [vmem:[%s17113_s0 + $0x36c] sm:$0xf]  ;;  %v17363_v10 = vld [vmem:[#allocation27_spill] sm:$0xff] }
 0x14d   :  { %17296 = vst [vmem:[#allocation53_spill] sm:$0xff] %v13858_v42 }
 0x152   :  { %10599 = vmatmul.mubr.msk.bf16.gmra.mrb[44].mxu1 %vm1022_vm4, %v9093_v29  ;;  %10897 = vmatmul.mubr.msk.bf16.gmra.mrb[12].mxu0 %vm1022_vm4, %v9653_v40  ;;  %v13868_v29 = vld [vmem:[%s17113_s0 + $0x378] sm:$0xf]  ;;  %v9655_v40 = vcombine.low %v13858_v42, %v13863_v63 }
 0x153   :  { %10602 = vmatprep.mubr.msk.bf16.mxu1 %vm1022_vm4, %v9094_v50  ;;  %10900 = vmatprep.mubr.msk.bf16.mxu0 %vm1022_vm4, %v9654_v1  ;;  %17298 = vst [vmem:[#allocation55_spill] sm:$0xff] %v13868_v29  ;;  %v13873_v50 = vld [vmem:[%s17113_s0 + $0x37c] sm:$0xf]  ;;  %v9095_v1 = vcombine.low %v12911_v13, %v12916_v21  ;;  %v13893_v13 = vld [vmem:[%s17113_s0 + $0x384] sm:$0xf] }
 0x154   :  { %17299 = vst [vmem:[#allocation56_spill] sm:$0xff] %v13873_v50  ;;  %v9656_v37 = vcombine.low %v13868_v29, %v13873_v50  ;;  %17300 = vst [vmem:[#allocation57_spill] sm:$0xff] %v13893_v13  ;;  %v13898_v21 = vld [vmem:[%s17113_s0 + $0x14] sm:$0x1]  ;;  %v9657_v55 = vcombine.low %v13893_v13, %v13909_v54  ;;  %v14052_v54 = vld [vmem:[%s17113_s0 + $0x3d0] sm:$0xf] }
 0x155   :  { %17314 = vst [vmem:[#allocation70_spill] sm:$0xff] %v14052_v54  ;;  %v14406_v29 = vld [vmem:[%s17113_s0 + $0x450] sm:$0xf] }
 0x15a   :  { %10603 = vmatmul.mubr.msk.bf16.gmra.mrb[48].mxu1 %vm1022_vm4, %v9095_v1  ;;  %10901 = vmatmul.mubr.msk.bf16.gmra.mrb[16].mxu0 %vm1022_vm4, %v9655_v40  ;;  %v13920_v1 = vld [vmem:[%s17113_s0 + $0x390] sm:$0xf] }
 0x15b   :  { %10606 = vmatprep.mubr.msk.bf16.mxu1 %vm1022_vm4, %v9096_v44  ;;  %10904 = vmatprep.mubr.msk.bf16.mxu0 %vm1022_vm4, %v9656_v37  ;;  %17302 = vst [vmem:[#allocation59_spill] sm:$0xff] %v13920_v1  ;;  %v9098_v37 = vcombine.low %v13017_v61, %v13027_v0  ;;  %v9658_v46 = vcombine.low %v13920_v1, %v13929_v51  ;;  %v9134_v0 = vrot.slane %v13175_v53, 9  ;;  %v2011_v51 = vrot.slane %v13262_v49, 5 }
 0x15c   :  { %v9101_v53 = vcombine.low %v13127_v16, %v13132_v62  ;;  %v9662_v16 = vcombine.low %v14016_v18, %v14023_v11  ;;  %v9136_v1 = vrot.slane %v13257_v52, 9  ;;  %v14086_v52 = vld [vmem:[%s17113_s0 + $0x3dc] sm:$0xf] }
 0x15d   :  { %17319 = vst [vmem:[#allocation72_spill] sm:$0xff] %v14086_v52 }
 0x162   :  { %10607 = vmatmul.mubr.msk.bf16.gmra.mrb[52].mxu1 %vm1022_vm4, %v9097_v59  ;;  %10905 = vmatmul.mubr.msk.bf16.gmra.mrb[20].mxu0 %vm1022_vm4, %v9657_v55  ;;  %v13984_v59 = vld [vmem:[%s17113_s0 + $0x3ac] sm:$0xf]  ;;  %v1997_v55 = vrot.slane %v13180_v8, 5  ;;  %v14000_v8 = vld [vmem:[%s17113_s0 + $0x3b4] sm:$0xf] }
 0x163   :  { %10610 = vmatprep.mubr.msk.bf16.mxu1 %vm1022_vm4, %v9098_v37  ;;  %10908 = vmatprep.mubr.msk.bf16.mxu0 %vm1022_vm4, %v9658_v46  ;;  %17307 = vst [vmem:[#allocation64_spill] sm:$0xff] %v13984_v59  ;;  %v9099_v46 = vcombine.low %v13055_v38, %v13060_v24  ;;  %v9659_v37 = vcombine.low %v13954_v33, %v13963_v47  ;;  %17308 = vst [vmem:[#allocation65_spill] sm:$0xff] %v14000_v8  ;;  %v14011_v24 = vld [vmem:[%s17113_s0 + $0x3b8] sm:$0xf]  ;;  %v17312_v47 = vrot.slane %v13231_v36, 5 }
 0x164   :  { %v9660_v38 = vcombine.low %v13974_v25, %v13984_v59  ;;  %17309 = vst [vmem:[#allocation66_spill] sm:$0xff] %v14011_v24  ;;  %v1999_v61 = vrot.slane %v1997_v55, 4  ;;  %v9661_v40 = vcombine.low %v14000_v8, %v14011_v24  ;;  %v11798_v36 = vld [vmem:[%s17113_s0 + $0x20] sm:$0x1]  ;;  %v11806_v24 = vld [vmem:[%s17113_s0 + $0x74] sm:$0x1] }
 0x165   :  { %v2006_v33 = vrot.slane %v17312_v47, 4  ;;  %v17316_v62 = vmov %v17312_v47  ;;  %v17340_v8 = vld [vmem:[#allocation20_spill] sm:$0xff]  ;;  %v17347_v25 = vld [vmem:[#allocation22_spill] sm:$0xff] }
 0x166   :  { %v14066_v47 = vsel %vm12674_vm7, %v9135_v28, %v17316_v62  ;;  %v2025_v62 = vrot.slane %v13325_v58, 5  ;;  %v14104_v28 = vsel %vm12674_vm7, %v9136_v1, %v2011_v51  ;;  %v14112_v58 = vld [vmem:[%s17113_s0 + $0x3e4] sm:$0xf]  ;;  %v11799_v1 = vld [vmem:[%s17113_s0 + $0x2c] sm:$0x1]  ;;  %v2081_v59 = vrot.slane %v17340_v8, 5 }
 0x167   :  { %17320 = vst [vmem:[#allocation73_spill] sm:$0xff] %v14112_v58  ;;  %v2021_v30 = vrot.slane %v11799_v1, 5  ;;  %v14141_v1 = vld [vmem:[%s17113_s0 + $0x3f0] sm:$0xf]  ;;  %v14342_v8 = vld [vmem:[%s17113_s0 + $0x438] sm:$0xf] }
 0x168   :  { %v2027_v44 = vrot.slane %v2025_v62, 4  ;;  %17322 = vst [vmem:[#allocation75_spill] sm:$0xff] %v14141_v1  ;;  %v2088_v13 = vrot.slane %v17347_v25, 5  ;;  %v17348_v25 = vld [vmem:[#allocation24_spill] sm:$0xff] }
 0x16a   :  { %10611 = vmatmul.mubr.msk.bf16.gmra.mrb[56].mxu1 %vm1022_vm4, %v9099_v46  ;;  %10909 = vmatmul.mubr.msk.bf16.gmra.mrb[24].mxu0 %vm1022_vm4, %v9659_v37  ;;  %v1998_v46 = vsel %vm12674_vm7, %v9134_v0, %v1997_v55  ;;  %v17315_v37 = vrot.slane %v13886_v45, 5  ;;  %v17318_v0 = vrot.slane %v13898_v21, 5  ;;  %v2014_v55 = vrot.slane %v11798_v36, 5  ;;  %v11800_v36 = vld [vmem:[%s17113_s0 + $0x38] sm:$0x1] }
 0x16b   :  { %10614 = vmatprep.mubr.msk.bf16.mxu1 %vm1022_vm4, %v9100_v26  ;;  %10912 = vmatprep.mubr.msk.bf16.mxu0 %vm1022_vm4, %v9660_v38  ;;  %v14072_v26 = vld [vmem:[%s17113_s0 + $0x3d8] sm:$0xf]  ;;  %v2018_v38 = vrot.slane %v13313_v32, 5  ;;  %v14092_v21 = vsel %vm1119_vm0, %v13277_v6, 0  ;;  %v2032_v6 = vrot.slane %v13367_v5, 5 }
 0x16c   :  { %v2001_v49 = vsel %vm12674_vm7, %v1999_v61, %v17315_v37  ;;  %17317 = vst [vmem:[#allocation71_spill] sm:$0xff] %v14072_v26  ;;  %v14078_v45 = vsel %vm12674_vm7, %v2006_v33, %v17318_v0  ;;  %v2013_v61 = vrot.slane %v2011_v51, 4  ;;  %v2028_v0 = vrot.slane %v11800_v36, 5 }
 0x16d   :  { %v9166_v37 = vcombine.low %v1998_v46, %v2001_v49  ;;  %v9167_v32 = vcombine.low %v14066_v47, %v14078_v45  ;;  %v14117_v49 = vld [vmem:[%s17113_s0 + $0x3e8] sm:$0xf]  ;;  %v2020_v51 = vrot.slane %v2018_v38, 4  ;;  %v9138_v46 = vrot.slane %v13320_v19, 9  ;;  %v14230_v45 = vld [vmem:[%s17113_s0 + $0x414] sm:$0xf] }
 0x16e   :  { %17321 = vst [vmem:[#allocation74_spill] sm:$0xff] %v14117_v49  ;;  %v14121_v47 = vsel %vm12674_vm7, %v2013_v61, %v2014_v55  ;;  %v2039_v36 = vrot.slane %v13379_v9, 5  ;;  %v14154_v61 = vld [vmem:[%s17113_s0 + $0x3f4] sm:$0xf]  ;;  %v14158_v9 = vsel %vm12674_vm7, %v9137_v34, %v2018_v38  ;;  %v14176_v55 = vsel %vm12674_vm7, %v2027_v44, %v2028_v0  ;;  %v11801_v38 = vld [vmem:[%s17113_s0 + $0x44] sm:$0x1] }
 0x16f   :  { %v9168_v5 = vcombine.low %v14104_v28, %v14121_v47  ;;  %17323 = vst [vmem:[#allocation76_spill] sm:$0xff] %v14154_v61  ;;  %v14166_v28 = vsel %vm12674_vm7, %v9138_v46, %v2025_v62  ;;  %v14172_v47 = vld [vmem:[%s17113_s0 + $0x3fc] sm:$0xf]  ;;  %v2034_v34 = vrot.slane %v2032_v6, 4  ;;  %v14184_v62 = vld [vmem:[%s17113_s0 + $0x400] sm:$0xf]  ;;  %v17332_v19 = vcombine.low %v14072_v26, %v14086_v52 }
 0x170   :  { %17324 = vst [vmem:[#allocation77_spill] sm:$0xff] %v14172_v47  ;;  %17325 = vst [vmem:[#allocation78_spill] sm:$0xff] %v14184_v62  ;;  %v2041_v46 = vrot.slane %v2039_v36, 4  ;;  %v11802_v44 = vld [vmem:[%s17113_s0 + $0x50] sm:$0x1]  ;;  %v9141_v33 = vrot.slane %v13416_v60, 9 }
 0x171   :  { %v2042_v0 = vrot.slane %v11802_v44, 5  ;;  %17328 = vst [vmem:[#allocation81_spill] sm:$0xff] %v14230_v45 }
 0x172   :  { %10615 = vmatmul.mubr.msk.bf16.gmra.mrb[60].mxu1 %vm1022_vm4, %v9101_v53  ;;  %10913 = vmatmul.mubr.msk.bf16.gmra.mrb[28].mxu0 %vm1022_vm4, %v9661_v40  ;;  %v2046_v53 = vrot.slane %v13421_v57, 5  ;;  %v14207_v57 = vld [vmem:[%s17113_s0 + $0x408] sm:$0xf] }
 0x173   :  { %10620 = vmatprep.mubr.msk.bf16.mxu1 %vm1022_vm4, %v9166_v37  ;;  %10916 = vmatprep.mubr.msk.bf16.mxu0 %vm1022_vm4, %v9662_v16  ;;  %v14162_v16 = vsel %vm12674_vm7, %v2020_v51, %v2021_v30  ;;  %v9139_v37 = vrot.slane %v13362_v4, 9  ;;  %v2035_v51 = vrot.slane %v11801_v38, 5  ;;  %v9140_v4 = vrot.slane %v13374_v15, 9  ;;  %17326 = vst [vmem:[#allocation79_spill] sm:$0xff] %v14207_v57 }
 0x174   :  { %v9169_v38 = vcombine.low %v14158_v9, %v14162_v16  ;;  %v14212_v9 = vld [vmem:[%s17113_s0 + $0x40c] sm:$0xf]  ;;  %v14244_v60 = vsel %vm12674_vm7, %v2041_v46, %v2042_v0  ;;  %v14270_v46 = vld [vmem:[%s17113_s0 + $0x420] sm:$0xf]  ;;  %v14275_v0 = vld [vmem:[%s17113_s0 + $0x424] sm:$0xf] }
 0x175   :  { %17327 = vst [vmem:[#allocation80_spill] sm:$0xff] %v14212_v9  ;;  %v14216_v16 = vsel %vm12674_vm7, %v9139_v37, %v2032_v6  ;;  %v14220_v15 = vsel %vm12674_vm7, %v2034_v34, %v2035_v51  ;;  %v14224_v44 = vsel %vm12674_vm7, %v9140_v4, %v2039_v36  ;;  %v14235_v6 = vld [vmem:[%s17113_s0 + $0x418] sm:$0xf]  ;;  %v17330_v37 = vcombine.low %v14040_v35, %v14052_v54  ;;  %v11803_v34 = vld [vmem:[%s17113_s0 + $0x5c] sm:$0x1] }
 0x176   :  { %17329 = vst [vmem:[#allocation82_spill] sm:$0xff] %v14235_v6  ;;  %v2048_v36 = vrot.slane %v2046_v53, 4  ;;  %v2049_v51 = vrot.slane %v11803_v34, 5  ;;  %v17331_v4 = vld [vmem:[#allocation12_spill] sm:$0xff]  ;;  %v14288_v34 = vsel %vm12674_vm7, %v9141_v33, %v2046_v53  ;;  %v17336_v53 = vld [vmem:[#allocation14_spill] sm:$0xff]  ;;  %v17339_v33 = vld [vmem:[#allocation13_spill] sm:$0xff]  ;;  %v17352_v63 = vcombine.low %v14216_v16, %v14220_v15 }
 0x177   :  { %v2053_v40 = vrot.slane %v17331_v4, 5  ;;  %v17333_v4 = vld [vmem:[#allocation11_spill] sm:$0xff]  ;;  %17334 = vst [vmem:[#allocation12_spill] sm:$0xff] %v14270_v46  ;;  %v9143_v18 = vrot.slane %v17339_v33, 9  ;;  %v14465_v15 = vld [vmem:[%s17113_s0 + $0x46c] sm:$0xf] }
 0x178   :  { %17335 = vst [vmem:[#allocation11_spill] sm:$0xff] %v14275_v0  ;;  %v14292_v30 = vsel %vm12674_vm7, %v2048_v36, %v2049_v51  ;;  %v14309_v36 = vld [vmem:[%s17113_s0 + $0x430] sm:$0xf]  ;;  %v17337_v51 = vld [vmem:[#allocation16_spill] sm:$0xff] }
 0x179   :  { %v2055_v52 = vrot.slane %v2053_v40, 4  ;;  %v2067_v26 = vrot.slane %v17337_v51, 5  ;;  %v2063_v51 = vrot.slane %v11806_v24, 5  ;;  %v11807_v24 = vld [vmem:[%s17113_s0 + $0x80] sm:$0x1]  ;;  %17354 = vst [vmem:[#allocation16_spill] sm:$0xff] %v14465_v15 }
 0x17a   :  { %10621 = vmatmul.mubr.msk.bf16.vlgmr.msra.gmra.mrb[0].mxu1 %vm1022_vm4, %v9167_v32  ;;  %10917 = vmatmul.mubr.msk.bf16.gmra.mrb[32].mxu0 %vm1022_vm4, %v17330_v37  ;;  %v9142_v32 = vrot.slane %v17333_v4, 9  ;;  %v2060_v4 = vrot.slane %v17336_v53, 5  ;;  %v17338_v37 = vld [vmem:[#allocation18_spill] sm:$0xff]  ;;  %v2070_v54 = vrot.slane %v11807_v24, 5  ;;  %v11809_v24 = vld [vmem:[%s17113_s0 + $0x98] sm:$0x1] }
 0x17b   :  { %10685 = vmatpush3.bf16.msra.mxu1 %v14092_v21  ;;  %10624 = vmatprep.mubr.msk.bf16.mxu1 %vm1022_vm4, %v9168_v5  ;;  %v14300_v5 = vld [vmem:[%s17113_s0 + $0x42c] sm:$0xf]  ;;  %v2074_v11 = vrot.slane %v17338_v37, 5  ;;  %v2069_v35 = vrot.slane %v2067_v26, 4  ;;  %v17365_v15 = vshrl.u32 %v13641_v17, 16 }
 0x17c   :  { %10920 = vmatprep.mubr.msk.bf16.mxu0 %vm1022_vm4, %v17332_v19  ;;  %v11804_v19 = vld [vmem:[%s17114_s1 + $0x10] sm:$0xf] }
 0x17d   :  { %11599 = vmatprep.subr.msk.bf16.mxu1 %vm1119_vm0, %v11804_v19  ;;  %v11805_v19 = vld [vmem:[%s17113_s0 + $0x68] sm:$0x1]  ;;  %v2076_v37 = vrot.slane %v2074_v11, 4  ;;  %v14400_v50 = vsel %vm12674_vm7, %v2069_v35, %v2070_v54 }
 0x17e   :  { %v2056_v21 = vrot.slane %v11805_v19, 5  ;;  %v14314_v19 = vsel %vm12674_vm7, %v9142_v32, %v2053_v40  ;;  %v17341_v40 = vcombine.low %v14112_v58, %v14117_v49  ;;  %v2083_v49 = vrot.slane %v2081_v59, 4 }
 0x17f   :  { %v2084_v58 = vrot.slane %v11809_v24, 5  ;;  %v14387_v24 = vld [vmem:[%s17113_s0 + $0x448] sm:$0xf] }
 0x180   :  { %v14333_v32 = vsel %vm12674_vm7, %v2055_v52, %v2056_v21  ;;  %v17343_v52 = vcombine.low %v14141_v1, %v14154_v61  ;;  %v2062_v21 = vrot.slane %v2060_v4, 4  ;;  %v2095_v1 = vrot.slane %v17348_v25, 5  ;;  %v14429_v25 = vld [vmem:[%s17113_s0 + $0x45c] sm:$0xf] }
 0x182   :  { %10625 = vmatmul.mubr.msk.bf16.gmra.mrb[4].mxu1 %vm1022_vm4, %v9169_v38  ;;  %10921 = vmatmul.mubr.msk.bf16.gmra.mrb[36].mxu0 %vm1022_vm4, %v17341_v40  ;;  %v17342_v38 = vcombine.low %v14166_v28, %v14176_v55  ;;  %v17344_v40 = vld [vmem:[#allocation15_spill] sm:$0xff]  ;;  %v14359_v55 = vld [vmem:[%s17113_s0 + $0x43c] sm:$0xf]  ;;  %v17345_v28 = vld [vmem:[#allocation17_spill] sm:$0xff] }
 0x183   :  { %10924 = vmatprep.mubr.msk.bf16.mxu0 %vm1022_vm4, %v17343_v52  ;;  %v9144_v33 = vrot.slane %v17344_v40, 9  ;;  %v11808_v52 = vld [vmem:[%s17113_s0 + $0x8c] sm:$0x1]  ;;  %v17346_v40 = vld [vmem:[#allocation19_spill] sm:$0xff] }
 0x184   :  { %10628 = vmatprep.mubr.msk.bf16.mxu1 %vm1022_vm4, %v17342_v38  ;;  %v9145_v38 = vrot.slane %v17345_v28, 9  ;;  %v2077_v53 = vrot.slane %v11808_v52, 5  ;;  %v9146_v61 = vrot.slane %v17346_v40, 9  ;;  %v14374_v28 = vsel %vm12674_vm7, %v9143_v18, %v2060_v4  ;;  %v14382_v40 = vld [vmem:[%s17113_s0 + $0x444] sm:$0xf] }
 0x185   :  { %v14392_v18 = vsel %vm12674_vm7, %v2062_v21, %v2063_v51  ;;  %v14396_v4 = vsel %vm12674_vm7, %v9144_v33, %v2067_v26  ;;  %v14411_v51 = vld [vmem:[%s17113_s0 + $0x454] sm:$0xf]  ;;  %v17349_v33 = vld [vmem:[#allocation21_spill] sm:$0xff] }
 0x186   :  { %v14415_v26 = vsel %vm12674_vm7, %v9145_v38, %v2074_v11  ;;  %v14419_v54 = vsel %vm12674_vm7, %v2076_v37, %v2077_v53  ;;  %v14423_v35 = vsel %vm12674_vm7, %v9146_v61, %v2081_v59  ;;  %v9147_v21 = vrot.slane %v17349_v33, 9  ;;  %v14434_v11 = vld [vmem:[%s17113_s0 + $0x460] sm:$0xf]  ;;  %v11810_v59 = vld [vmem:[%s17113_s0 + $0xa4] sm:$0x1]  ;;  %v17350_v38 = vld [vmem:[#allocation23_spill] sm:$0xff] }
 0x187   :  { %v14438_v53 = vsel %vm12674_vm7, %v2083_v49, %v2084_v58  ;;  %v2090_v37 = vrot.slane %v2088_v13, 4  ;;  %v2091_v61 = vrot.slane %v11810_v59, 5  ;;  %v9148_v33 = vrot.slane %v17350_v38, 9  ;;  %v14447_v52 = vld [vmem:[%s17113_s0 + $0x468] sm:$0xf] }
 0x188   :  { %17351 = vst [vmem:[#allocation14_spill] sm:$0xff] %v14447_v52  ;;  %v17353_v58 = vcombine.low %v14172_v47, %v14184_v62  ;;  %v2097_v59 = vrot.slane %v2095_v1, 4  ;;  %v11811_v38 = vld [vmem:[%s17113_s0 + $0xb0] sm:$0x1]  ;;  %v17356_v62 = vcombine.low %v14224_v44, %v14244_v60  ;;  %v14489_v60 = vsel %vm12674_vm7, %v9147_v21, %v2088_v13  ;;  %v14507_v13 = vld [vmem:[%s17113_s0 + $0x474] sm:$0xf] }
 0x189   :  { %v2098_v42 = vrot.slane %v11811_v38, 5  ;;  %v14495_v49 = vsel %vm12674_vm7, %v2090_v37, %v2091_v61  ;;  %v14499_v47 = vsel %vm12674_vm7, %v9148_v33, %v2095_v1  ;;  %v17358_v38 = vld [vmem:[#allocation25_spill] sm:$0xff]  ;;  %v11812_v1 = vld [vmem:[%s17113_s0 + $0xbc] sm:$0x1]  ;;  %v14519_v33 = vld [vmem:[%s17113_s0 + $0x478] sm:$0xf] }
 0x18a   :  { %10629 = vmatmul.mubr.msk.bf16.gmra.mrb[8].mxu1 %vm1022_vm4, %v17352_v63  ;;  %10925 = vmatmul.mubr.msk.bf16.gmra.mrb[40].mxu0 %vm1022_vm4, %v17353_v58  ;;  %v17355_v63 = vld [vmem:[#allocation26_spill] sm:$0xff]  ;;  %v17357_v58 = vcombine.low %v14207_v57, %v14212_v9  ;;  %v2105_v61 = vrot.slane %v11812_v1, 5  ;;  %17359 = vst [vmem:[#allocation18_spill] sm:$0xff] %v14519_v33  ;;  %v17360_v44 = vshrl.u32 %v13601_v39, 16  ;;  %v17361_v9 = vshll.u32 %v13601_v39, 16 }
 0x18b   :  { %v2102_v16 = vrot.slane %v17355_v63, 5  ;;  %10632 = vmatprep.mubr.msk.bf16.mxu1 %vm1022_vm4, %v17356_v62  ;;  %v6315_v63 = vshll.u32 %v13606_v41, 16  ;;  %v9149_v62 = vrot.slane %v17358_v38, 9  ;;  %v14511_v21 = vsel %vm12674_vm7, %v2097_v59, %v2098_v42 }
 0x18c   :  { %10928 = vmatprep.mubr.msk.bf16.mxu0 %vm1022_vm4, %v17357_v58  ;;  %v6339_v38 = vshll.u32 %v13646_v20, 16  ;;  %v6308_v58 = vrot.slane %v17360_v44, 4  ;;  %v6311_v42 = vrot.slane %v17361_v9, 5  ;;  %v17362_v57 = vshrl.u32 %v13606_v41, 16 }
 0x18d   :  { %v2104_v37 = vrot.slane %v2102_v16, 4  ;;  %v14526_v59 = vrot.slane %v6315_v63, 5  ;;  %v9150_v1 = vrot.slane %v17363_v10, 9  ;;  %v6332_v52 = vrot.slane %v17365_v15, 4 }
 0x18e   :  { %v6321_v27 = vrot.slane %v17362_v57, 4  ;;  %v17366_v44 = vshll.u32 %v13641_v17, 16  ;;  %v14545_v10 = vsel %vm12674_vm7, %v9149_v62, %v2102_v16  ;;  %v17367_v57 = vcombine.low %v14288_v34, %v14292_v30  ;;  %v11813_v16 = vld [vmem:[%s17113_s0 + $0xc8] sm:$0x1] }
 0x18f   :  { %v17368_v17 = vcombine.low %v14230_v45, %v14235_v6  ;;  %v14559_v15 = vsel %vm12674_vm7, %v2104_v37, %v2105_v61  ;;  %v2112_v63 = vrot.slane %v11813_v16, 5  ;;  %v14564_v62 = vrot.slane %v6339_v38, 5  ;;  %v17372_v16 = vld [vmem:[#allocation30_spill] sm:$0xff]  ;;  %v17377_v6 = vld [vmem:[#allocation31_spill] sm:$0xff] }
 0x190   :  { %v6335_v39 = vrot.slane %v17366_v44, 5  ;;  %v17369_v30 = vshrl.u32 %v13646_v20, 16  ;;  %v17370_v44 = vcombine.low %v14314_v19, %v14333_v32  ;;  %v6312_v37 = vor.u32 %v6311_v42, %v6308_v58  ;;  %v9555_v20 = vld [vmem:[%s17113_s0 + $0x314] sm:$0x1]  ;;  %v17374_v42 = vld [vmem:[#allocation29_spill] sm:$0xff] }
 0x191   :  { %v6322_v61 = vor.u32 %v6321_v27, %v14526_v59  ;;  %v2116_v38 = vrot.slane %v17372_v16, 5  ;;  %v14583_v19 = vsel %vm12674_vm7, %v9150_v1, %v2109_v14  ;;  %v2111_v32 = vrot.slane %v2109_v14, 4 }
 0x192   :  { %10633 = vmatmul.mubr.msk.bf16.gmra.mrb[12].mxu1 %vm1022_vm4, %v17367_v57  ;;  %10929 = vmatmul.mubr.msk.bf16.gmra.mrb[44].mxu0 %vm1022_vm4, %v17368_v17  ;;  %v6345_v34 = vrot.slane %v17369_v30, 4  ;;  %v17371_v57 = vcombine.low %v14270_v46, %v14275_v0  ;;  %v6325_v17 = vshll.u32 %v9552_v3, 16  ;;  %v6336_v30 = vor.u32 %v6335_v39, %v6332_v52  ;;  %v11814_v3 = vld [vmem:[%s17113_s0 + $0xd4] sm:$0x1] }
 0x193   :  { %10636 = vmatprep.mubr.msk.bf16.mxu1 %vm1022_vm4, %v17370_v44  ;;  %v17373_v44 = vld [vmem:[#allocation32_spill] sm:$0xff]  ;;  %v9151_v27 = vrot.slane %v17374_v42, 9  ;;  %v6363_v16 = vshll.u32 %v13656_v23, 16  ;;  %v6349_v1 = vshll.u32 %v9555_v20, 16  ;;  %v17375_v14 = vshrl.u32 %v13651_v22, 16 }
 0x194   :  { %10932 = vmatprep.mubr.msk.bf16.mxu0 %vm1022_vm4, %v17371_v57  ;;  %v2123_v7 = vrot.slane %v17373_v44, 5  ;;  %v2119_v57 = vrot.slane %v11814_v3, 5  ;;  %v6346_v41 = vor.u32 %v6345_v34, %v14564_v62  ;;  %v17376_v39 = vshll.u32 %v13651_v22, 16  ;;  %v11815_v3 = vld [vmem:[%s17113_s0 + $0xe0] sm:$0x1] }
 0x195   :  { %v6356_v52 = vrot.slane %v17375_v14, 4  ;;  %v6313_v9 = vrot.slane %v6312_v37, 4  ;;  %v6323_v58 = vrot.slane %v6322_v61, 4  ;;  %v6327_v0 = vrot.slane %v6325_v17, 5  ;;  %v9558_v37 = vld [vmem:[%s17113_s0 + $0x320] sm:$0x1] }
 0x196   :  { %v6359_v44 = vrot.slane %v17376_v39, 5  ;;  %v2118_v42 = vrot.slane %v2116_v38, 4  ;;  %v6337_v46 = vrot.slane %v6336_v30, 4  ;;  %v9152_v45 = vrot.slane %v17377_v6, 9  ;;  %v17381_v14 = vld [vmem:[#allocation36_spill] sm:$0xff] }
 0x197   :  { %v2125_v33 = vrot.slane %v2123_v7, 4  ;;  %v2126_v34 = vrot.slane %v11815_v3, 5  ;;  %v14604_v20 = vsel %vm12674_vm7, %v2111_v32, %v2112_v63  ;;  %v14608_v22 = vsel %vm12674_vm7, %v9151_v27, %v2116_v38 }
 0x198   :  { %v14613_v61 = vrot.slane %v6363_v16, 5  ;;  %v17378_v6 = vshrl.u32 %v13656_v23, 16  ;;  %v17379_v30 = vcombine.low %v14374_v28, %v14392_v18  ;;  %v17380_v63 = vcombine.low %v14300_v5, %v14309_v36 }
 0x199   :  { %v6347_v38 = vrot.slane %v6346_v41, 4  ;;  %v6351_v32 = vrot.slane %v6349_v1, 5  ;;  %v6360_v27 = vor.u32 %v6359_v44, %v6356_v52  ;;  %v2130_v39 = vrot.slane %v17381_v14, 5  ;;  %v17386_v52 = vld [vmem:[#allocation34_spill] sm:$0xff] }
 0x19a   :  { %v6369_v17 = vrot.slane %v17378_v6, 4  ;;  %10637 = vmatmul.mubr.msk.bf16.gmra.mrb[16].mxu1 %vm1022_vm4, %v17379_v30  ;;  %10933 = vmatmul.mubr.msk.bf16.gmra.mrb[48].mxu0 %vm1022_vm4, %v17380_v63  ;;  %v17382_v16 = vcombine.low %v14396_v4, %v14400_v50  ;;  %v17383_v23 = vcombine.low %v14342_v8, %v14359_v55  ;;  %v6318_v18 = vsel %vm12191_vm3, %v6313_v9, %v14526_v59 }
 0x19b   :  { %v6328_v41 = vsel %vm12191_vm3, %v6323_v58, %v6327_v0  ;;  %v14641_v1 = vsel %vm12674_vm7, %v2118_v42, %v2119_v57  ;;  %v6387_v50 = vshll.u32 %v13704_v12, 16  ;;  %v6342_v4 = vsel %vm12191_vm3, %v6337_v46, %v14564_v62  ;;  %v17385_v58 = vld [vmem:[#allocation35_spill] sm:$0xff] }
 0x19c   :  { %10640 = vmatprep.mubr.msk.bf16.mxu1 %vm1022_vm4, %v17382_v16  ;;  %10936 = vmatprep.mubr.msk.bf16.mxu0 %vm1022_vm4, %v17383_v23  ;;  %v14649_v55 = vsel %vm12674_vm7, %v9152_v45, %v2123_v7  ;;  %v14653_v59 = vsel %vm12674_vm7, %v2125_v33, %v2126_v34  ;;  %v6373_v9 = vshll.u32 %v9558_v37, 16  ;;  %v6370_v0 = vor.u32 %v6369_v17, %v14613_v61  ;;  %v11816_v33 = vld [vmem:[%s17113_s0 + $0xec] sm:$0x1]  ;;  %v17389_v37 = vld [vmem:[#allocation33_spill] sm:$0xff] }
 0x19d   :  { %v9153_v57 = vrot.slane %v17385_v58, 9  ;;  %v17387_v44 = vshrl.u32 %v17386_v52, 16  ;;  %v17388_v3 = vshll.u32 %v17386_v52, 16  ;;  %v6352_v46 = vsel %vm12191_vm3, %v6347_v38, %v6351_v32  ;;  %v9561_v16 = vld [vmem:[%s17113_s0 + $0x32c] sm:$0x1] }
 0x19e   :  { %v6361_v45 = vrot.slane %v6360_v27, 4  ;;  %v2132_v7 = vrot.slane %v2130_v39, 4  ;;  %v2133_v62 = vrot.slane %v11816_v33, 5  ;;  %v9182_v34 = vcombine.low %v14583_v19, %v14604_v20  ;;  %v9573_v19 = vld [vmem:[%s17113_s0 + $0x35c] sm:$0x1]  ;;  %v17425_v20 = vld [vmem:[#allocation45_spill] sm:$0xff] }
 0x19f   :  { %v6380_v42 = vrot.slane %v17387_v44, 4  ;;  %v6383_v6 = vrot.slane %v17388_v3, 5  ;;  %v14670_v17 = vsel %vm1119_vm0, %v17389_v37, 0  ;;  %v14672_v30 = vrot.slane %v6387_v50, 5 }
 0x1a0   :  { %v17390_v63 = vshrl.u32 %v13704_v12, 16  ;;  %v14676_v38 = vcombine.low %v6318_v18, %v6328_v41  ;;  %v9183_v32 = vcombine.low %v14608_v22, %v14641_v1  ;;  %v9184_v27 = vcombine.low %v14649_v55, %v14653_v59  ;;  %v11822_v55 = vld [vmem:[%s17113_s0 + $0x128] sm:$0x1] }
 0x1a1   :  { %v6411_v23 = vshll.u32 %v13715_v31, 16  ;;  %v14686_v58 = vcombine.low %v6342_v4, %v6352_v46  ;;  %v6371_v50 = vrot.slane %v6370_v0, 4  ;;  %v6375_v52 = vrot.slane %v6373_v9, 5 }
 0x1a2   :  { %v6393_v14 = vrot.slane %v17390_v63, 4  ;;  %v6384_v12 = vor.u32 %v6383_v6, %v6380_v42  ;;  %v17391_v18 = vcombine.low %v14415_v26, %v14419_v54  ;;  %v17392_v41 = vcombine.low %v14382_v40, %v14387_v24  ;;  %v17393_v26 = vld [vmem:[#allocation38_spill] sm:$0xff]  ;;  %v9564_v6 = vld [vmem:[%s17113_s0 + $0x338] sm:$0x1] }
 0x1a3   :  { %v6366_v44 = vsel %vm12191_vm3, %v6361_v45, %v14613_v61  ;;  %v14701_v4 = vsel %vm12674_vm7, %v9153_v57, %v2130_v39  ;;  %v14705_v9 = vsel %vm12674_vm7, %v2132_v7, %v2133_v62  ;;  %v2137_v54 = vrot.slane %v17393_v26, 5  ;;  %v17396_v57 = vld [vmem:[#allocation37_spill] sm:$0xff]  ;;  %v17400_v63 = vld [vmem:[#allocation42_spill] sm:$0xff] }
 0x1a4   :  { %10641 = vmatmul.mubr.msk.bf16.gmra.mrb[20].mxu1 %vm1022_vm4, %v17391_v18  ;;  %10937 = vmatmul.mubr.msk.bf16.gmra.mrb[52].mxu0 %vm1022_vm4, %v17392_v41  ;;  %v17394_v0 = vcombine.low %v14423_v35, %v14438_v53  ;;  %v17395_v24 = vcombine.low %v14406_v29, %v14411_v51  ;;  %v6394_v61 = vor.u32 %v6393_v14, %v14672_v30  ;;  %v6397_v39 = vshll.u32 %v9561_v16, 16 }
 0x1a5   :  { %v9154_v42 = vrot.slane %v17396_v57, 9  ;;  %v6435_v3 = vshll.u32 %v13759_v43, 16  ;;  %v17397_v35 = vshrl.u32 %v13710_v48, 16  ;;  %v17398_v46 = vshll.u32 %v13710_v48, 16  ;;  %v11817_v48 = vld [vmem:[%s17113_s0 + $0xf8] sm:$0x1] }
 0x1a6   :  { %10644 = vmatprep.mubr.msk.bf16.mxu1 %vm1022_vm4, %v17394_v0  ;;  %10940 = vmatprep.mubr.msk.bf16.mxu0 %vm1022_vm4, %v17395_v24  ;;  %v14726_v29 = vrot.slane %v6411_v23, 5  ;;  %v17399_v51 = vshrl.u32 %v13715_v31, 16  ;;  %v6376_v33 = vsel %vm12191_vm3, %v6371_v50, %v6375_v52  ;;  %v9185_v62 = vcombine.low %v14701_v4, %v14705_v9  ;;  %v9567_v52 = vld [vmem:[%s17113_s0 + $0x344] sm:$0x1] }
 0x1a7   :  { %v6404_v53 = vrot.slane %v17397_v35, 4  ;;  %v6407_v45 = vrot.slane %v17398_v46, 5  ;;  %v6385_v37 = vrot.slane %v6384_v12, 4  ;;  %v2144_v14 = vrot.slane %v17400_v63, 5  ;;  %v17404_v63 = vld [vmem:[#allocation41_spill] sm:$0xff] }
 0x1a8   :  { %v6417_v7 = vrot.slane %v17399_v51, 4  ;;  %v2139_v16 = vrot.slane %v2137_v54, 4  ;;  %v2140_v18 = vrot.slane %v11817_v48, 5  ;;  %v17401_v23 = vshrl.u32 %v13754_v2, 16 }
 0x1a9   :  { %v17402_v31 = vshll.u32 %v13754_v2, 16  ;;  %v6399_v0 = vrot.slane %v6397_v39, 5  ;;  %v6421_v50 = vshll.u32 %v9564_v6, 16  ;;  %v14745_v12 = vrot.slane %v6435_v3, 5  ;;  %v11818_v3 = vld [vmem:[%s17113_s0 + $0x104] sm:$0x1] }
 0x1aa   :  { %v6428_v41 = vrot.slane %v17401_v23, 4  ;;  %v17403_v24 = vshrl.u32 %v13759_v43, 16  ;;  %v6395_v35 = vrot.slane %v6394_v61, 4  ;;  %v6408_v46 = vor.u32 %v6407_v45, %v6404_v53  ;;  %v17409_v45 = vld [vmem:[#allocation16_spill] sm:$0xff] }
 0x1ab   :  { %v6431_v26 = vrot.slane %v17402_v31, 5  ;;  %v6418_v51 = vor.u32 %v6417_v7, %v14726_v29  ;;  %v9155_v48 = vrot.slane %v17404_v63, 9  ;;  %v14751_v23 = vcombine.low %v6366_v44, %v6376_v33 }
 0x1ac   :  { %v6441_v57 = vrot.slane %v17403_v24, 4  ;;  %v14755_v2 = vsel %vm12674_vm7, %v9154_v42, %v2137_v54  ;;  %v2146_v39 = vrot.slane %v2144_v14, 4  ;;  %v2147_v6 = vrot.slane %v11818_v3, 5 }
 0x1ad   :  { %v17405_v43 = vcombine.low %v14489_v60, %v14495_v49  ;;  %v17406_v61 = vcombine.low %v14429_v25, %v14434_v11  ;;  %v6390_v44 = vsel %vm12191_vm3, %v6385_v37, %v14672_v30  ;;  %v14773_v54 = vsel %vm12674_vm7, %v2139_v16, %v2140_v18  ;;  %v17408_v60 = vld [vmem:[#allocation14_spill] sm:$0xff]  ;;  %v17411_v30 = vld [vmem:[#allocation44_spill] sm:$0xff] }
 0x1ae   :  { %v6432_v42 = vor.u32 %v6431_v26, %v6428_v41  ;;  %v6445_v53 = vshll.u32 %v9567_v52, 16  ;;  %v17407_v49 = vcombine.low %v14499_v47, %v14511_v21  ;;  %v17410_v25 = vcombine.low %v17408_v60, %v17409_v45  ;;  %v17412_v37 = vld [vmem:[#allocation40_spill] sm:$0xff]  ;;  %v17413_v26 = vld [vmem:[#allocation43_spill] sm:$0xff]  ;;  %v17418_v45 = vld [vmem:[#allocation46_spill] sm:$0xff] }
 0x1af   :  { %10645 = vmatmul.mubr.msk.bf16.gmra.mrb[24].mxu1 %vm1022_vm4, %v17405_v43  ;;  %10941 = vmatmul.mubr.msk.bf16.gmra.mrb[56].mxu0 %vm1022_vm4, %v17406_v61  ;;  %v6423_v11 = vrot.slane %v6421_v50, 5  ;;  %v6442_v7 = vor.u32 %v6441_v57, %v14745_v12  ;;  %v2151_v33 = vrot.slane %v17411_v30, 5  ;;  %v6459_v16 = vshll.u32 %v17412_v37, 16  ;;  %v17414_v52 = vld [vmem:[#allocation39_spill] sm:$0xff] }
 0x1b0   :  { %10648 = vmatprep.mubr.msk.bf16.mxu1 %vm1022_vm4, %v17407_v49  ;;  %10944 = vmatprep.mubr.msk.bf16.mxu0 %vm1022_vm4, %v17410_v25  ;;  %v6400_v18 = vsel %vm12191_vm3, %v6395_v35, %v6399_v0  ;;  %v6409_v41 = vrot.slane %v6408_v46, 4  ;;  %v6419_v31 = vrot.slane %v6418_v51, 4  ;;  %v14790_v47 = vsel %vm12674_vm7, %v9155_v48, %v2144_v14  ;;  %v11819_v14 = vld [vmem:[%s17113_s0 + $0x110] sm:$0x1] }
 0x1b1   :  { %v14794_v21 = vsel %vm12674_vm7, %v2146_v39, %v2147_v6  ;;  %v9156_v50 = vrot.slane %v17413_v26, 9  ;;  %v17415_v24 = vshrl.u32 %v17414_v52, 16  ;;  %v17416_v63 = vshll.u32 %v17414_v52, 16  ;;  %v9570_v6 = vld [vmem:[%s17113_s0 + $0x350] sm:$0x1] }
 0x1b2   :  { %v9186_v0 = vcombine.low %v14755_v2, %v14773_v54  ;;  %v6433_v35 = vrot.slane %v6432_v42, 4  ;;  %v6447_v46 = vrot.slane %v6445_v53, 5  ;;  %v2154_v51 = vrot.slane %v11819_v14, 5  ;;  %v11828_v54 = vld [vmem:[%s17113_s0 + $0x140] sm:$0x1] }
 0x1b3   :  { %v6452_v57 = vrot.slane %v17415_v24, 4  ;;  %v6455_v3 = vrot.slane %v17416_v63, 5  ;;  %v6443_v48 = vrot.slane %v6442_v7, 4  ;;  %v2153_v39 = vrot.slane %v2151_v33, 4 }
 0x1b4   :  { %v14809_v43 = vrot.slane %v6459_v16, 5  ;;  %v17417_v61 = vshrl.u32 %v17412_v37, 16  ;;  %v14813_v60 = vcombine.low %v6390_v44, %v6400_v18  ;;  %v6414_v42 = vsel %vm12191_vm3, %v6409_v41, %v14726_v29  ;;  %v17419_v16 = vld [vmem:[#allocation50_spill] sm:$0xff] }
 0x1b5   :  { %v9187_v53 = vcombine.low %v14790_v47, %v14794_v21  ;;  %v6483_v25 = vshll.u32 %v17418_v45, 16  ;;  %v6424_v7 = vsel %vm12191_vm3, %v6419_v31, %v6423_v11  ;;  %v14825_v30 = vsel %vm12674_vm7, %v9156_v50, %v2151_v33  ;;  %v17421_v29 = vld [vmem:[#allocation18_spill] sm:$0xff]  ;;  %v17423_v33 = vld [vmem:[#allocation49_spill] sm:$0xff]  ;;  %v17424_v50 = vld [vmem:[#allocation48_spill] sm:$0xff] }
 0x1b6   :  { %v6465_v49 = vrot.slane %v17417_v61, 4  ;;  %v6456_v37 = vor.u32 %v6455_v3, %v6452_v57  ;;  %v2158_v44 = vrot.slane %v17419_v16, 5  ;;  %v17420_v18 = vcombine.low %v14545_v10, %v14559_v15 }
 0x1b7   :  { %v17422_v41 = vcombine.low %v14507_v13, %v17421_v29  ;;  %v6438_v11 = vsel %vm12191_vm3, %v6433_v35, %v14745_v12  ;;  %v6469_v31 = vshll.u32 %v9570_v6, 16  ;;  %v9157_v26 = vrot.slane %v17423_v33, 9  ;;  %v11820_v12 = vld [vmem:[%s17113_s0 + $0x11c] sm:$0x1] }
 0x1b8   :  { %10649 = vmatmul.mubr.msk.bf16.gmra.mrb[28].mxu1 %vm1022_vm4, %v17420_v18  ;;  %v6507_v52 = vshll.u32 %v17424_v50, 16  ;;  %v6448_v13 = vsel %vm12191_vm3, %v6443_v48, %v6447_v46  ;;  %v14851_v10 = vsel %vm12674_vm7, %v2153_v39, %v2154_v51  ;;  %v6466_v15 = vor.u32 %v6465_v49, %v14809_v43  ;;  %v17429_v48 = vld [vmem:[#allocation47_spill] sm:$0xff] }
 0x1b9   :  { %10945 = vmatmul.mubr.msk.bf16.gmra.mrb[60].mxu0 %vm1022_vm4, %v17422_v41  ;;  %10652 = vmatprep.mubr.msk.bf16.mxu1 %vm1022_vm4, %v9182_v34  ;;  %v2161_v24 = vrot.slane %v11820_v12, 5  ;;  %v17426_v34 = vshrl.u32 %v17425_v20, 16  ;;  %v17427_v57 = vshll.u32 %v17425_v20, 16  ;;  %v14864_v3 = vrot.slane %v6483_v25, 5 }
 0x1ba   :  { %10950 = vmatprep.mubr.msk.bf16.mxu0 %vm1022_vm4, %v14676_v38  ;;  %v17428_v35 = vshrl.u32 %v17418_v45, 16  ;;  %v14868_v14 = vrot.slane %v6456_v37, 4  ;;  %v2160_v51 = vrot.slane %v2158_v44, 4  ;;  %v17430_v39 = vshrl.u32 %v17429_v48, 16 }
 0x1bb   :  { %v6476_v38 = vrot.slane %v17426_v34, 4  ;;  %v6479_v63 = vrot.slane %v17427_v57, 5  ;;  %v17431_v61 = vshll.u32 %v17429_v48, 16  ;;  %v14874_v16 = vcombine.low %v6414_v42, %v6424_v7  ;;  %v9576_v42 = vld [vmem:[%s17113_s0 + $0x368] sm:$0x1] }
 0x1bc   :  { %v6489_v46 = vrot.slane %v17428_v35, 4  ;;  %v6500_v6 = vrot.slane %v17430_v39, 4  ;;  %v9188_v18 = vcombine.low %v14825_v30, %v14851_v10  ;;  %v14878_v29 = vrot.slane %v6507_v52, 5  ;;  %v17438_v35 = vld [vmem:[#allocation54_spill] sm:$0xff]  ;;  %v17453_v30 = vld [vmem:[#allocation60_spill] sm:$0xff] }
 0x1bd   :  { %v6503_v49 = vrot.slane %v17431_v61, 5  ;;  %v17432_v25 = vshrl.u32 %v17424_v50, 16  ;;  %v14882_v41 = vcombine.low %v6438_v11, %v6448_v13  ;;  %v14884_v37 = vrot.slane %v6466_v15, 4  ;;  %v17433_v50 = vld [vmem:[#allocation52_spill] sm:$0xff]  ;;  %v11823_v48 = vld [vmem:[%s17113_s0 + $0x12c] sm:$0xf] }
 0x1be   :  { %v14886_v33 = vrot.slane %v6469_v31, 5  ;;  %v6493_v12 = vshll.u32 %v9573_v19, 16  ;;  %v14893_v7 = vsel %vm12674_vm7, %v9157_v26, %v2158_v44  ;;  %v6480_v52 = vor.u32 %v6479_v63, %v6476_v38  ;;  %v11821_v44 = vld [vmem:[%s17113_s0 + $0x130] sm:$0xf]  ;;  %v17434_v19 = vld [vmem:[#allocation53_spill] sm:$0xff] }
 0x1bf   :  { %v6513_v45 = vrot.slane %v17432_v25, 4  ;;  %v6490_v20 = vor.u32 %v6489_v46, %v14864_v3  ;;  %v2165_v34 = vrot.slane %v17433_v50, 5  ;;  %v6462_v11 = vsel %vm12191_vm3, %v14868_v14, %v14809_v43  ;;  %v11824_v61 = vld [vmem:[%s17113_s0 + $0x134] sm:$0x1]  ;;  %v11825_v50 = vld [vmem:[%s17113_s0 + $0x37c] sm:$0xf] }
 0x1c0   :  { %v14903_v31 = vsel %vm12674_vm7, %v2160_v51, %v2161_v24  ;;  %v6504_v13 = vor.u32 %v6503_v49, %v6500_v6  ;;  %v2172_v26 = vrot.slane %v11821_v44, 5  ;;  %10653 = vmatmul.mubr.msk.bf16.gmra.mrb[32].mxu1 %vm1022_vm4, %v9183_v32  ;;  %v6517_v15 = vshll.u32 %v9576_v42, 16  ;;  %v17437_v32 = vld [vmem:[#allocation51_spill] sm:$0xff] }
 0x1c1   :  { %10951 = vmatmul.mubr.msk.bf16.vlgmr.msra.gmra.mrb[0].mxu0 %vm1022_vm4, %v14686_v58  ;;  %v6514_v43 = vor.u32 %v6513_v45, %v14878_v29  ;;  %v17435_v24 = vshrl.u32 %v17434_v19, 16  ;;  %v17436_v57 = vshll.u32 %v17434_v19, 16  ;;  %10656 = vmatprep.mubr.msk.bf16.mxu1 %vm1022_vm4, %v9184_v27  ;;  %v6472_v22 = vsel %vm12191_vm3, %v14884_v37, %v14886_v33  ;;  %v9579_v37 = vld [vmem:[%s17113_s0 + $0x374] sm:$0x1] }
 0x1c2   :  { %11015 = vmatpush3.bf16.msra.mxu0 %v14670_v17  ;;  %v6495_v1 = vrot.slane %v6493_v12, 5  ;;  %v9158_v58 = vrot.slane %v17437_v32, 9  ;;  %v6531_v46 = vshll.u32 %v17438_v35, 16  ;;  %10954 = vmatprep.mubr.msk.bf16.mxu0 %vm1022_vm4, %v14751_v23  ;;  %v6481_v14 = vrot.slane %v6480_v52, 4  ;;  %v17440_v32 = vld [vmem:[#allocation55_spill] sm:$0xff] }
 0x1c3   :  { %v6524_v38 = vrot.slane %v17435_v24, 4  ;;  %v6527_v63 = vrot.slane %v17436_v57, 5  ;;  %v6491_v17 = vrot.slane %v6490_v20, 4  ;;  %v2167_v51 = vrot.slane %v2165_v34, 4 }
 0x1c4   :  { %v2168_v59 = vrot.slane %v11822_v55, 5  ;;  %v6505_v27 = vrot.slane %v6504_v13, 4  ;;  %v9159_v39 = vrot.slane %v11823_v48, 9  ;;  %v2174_v6 = vrot.slane %v2172_v26, 4 }
 0x1c5   :  { %v2175_v23 = vrot.slane %v11824_v61, 5  ;;  %v9189_v49 = vcombine.low %v14893_v7, %v14903_v31  ;;  %v6515_v25 = vrot.slane %v6514_v43, 4  ;;  %v6519_v45 = vrot.slane %v6517_v15, 5  ;;  %v11826_v15 = vld [vmem:[%s17113_s0 + $0x13c] sm:$0xf] }
 0x1c6   :  { %v6528_v33 = vor.u32 %v6527_v63, %v6524_v38  ;;  %v14948_v12 = vsel %vm12674_vm7, %v9158_v58, %v2165_v34  ;;  %v14950_v42 = vrot.slane %v6531_v46, 5  ;;  %v17439_v52 = vshrl.u32 %v17438_v35, 16  ;;  %v17443_v46 = vld [vmem:[#allocation56_spill] sm:$0xff]  ;;  %v11841_v31 = vld [vmem:[%s17113_s0 + $0x164] sm:$0x1] }
 0x1c7   :  { %v6555_v13 = vshll.u32 %v11825_v50, 16  ;;  %v6486_v44 = vsel %vm12191_vm3, %v6481_v14, %v14864_v3  ;;  %v6496_v43 = vsel %vm12191_vm3, %v6491_v17, %v6495_v1  ;;  %v14964_v34 = vsel %vm12674_vm7, %v2167_v51, %v2168_v59 }
 0x1c8   :  { %v6537_v20 = vrot.slane %v17439_v52, 4  ;;  %v2179_v19 = vrot.slane %v11826_v15, 5  ;;  %v6510_v24 = vsel %vm12191_vm3, %v6505_v27, %v14878_v29  ;;  %v14974_v38 = vsel %vm12674_vm7, %v9159_v39, %v2172_v26  ;;  %10657 = vmatmul.mubr.msk.bf16.gmra.mrb[36].mxu1 %vm1022_vm4, %v9185_v62  ;;  %v11827_v26 = vld [vmem:[%s17113_s0 + $0x138] sm:$0xf] }
 0x1c9   :  { %v14978_v3 = vsel %vm12674_vm7, %v2174_v6, %v2175_v23  ;;  %v6541_v57 = vshll.u32 %v9579_v37, 16  ;;  %10955 = vmatmul.mubr.msk.bf16.gmra.mrb[4].mxu0 %vm1022_vm4, %v14813_v60  ;;  %v6520_v29 = vsel %vm12191_vm3, %v6515_v25, %v6519_v45  ;;  %v14988_v63 = vrot.slane %v6528_v33, 4  ;;  %10660 = vmatprep.mubr.msk.bf16.mxu1 %vm1022_vm4, %v9186_v0  ;;  %v11830_v23 = vld [vmem:[%s17113_s0 + $0x388] sm:$0xf] }
 0x1ca   :  { %v9160_v1 = vrot.slane %v11827_v26, 9  ;;  %v17441_v58 = vshrl.u32 %v17440_v32, 16  ;;  %10958 = vmatprep.mubr.msk.bf16.mxu0 %vm1022_vm4, %v14874_v16  ;;  %v6538_v4 = vor.u32 %v6537_v20, %v14950_v42  ;;  %v17442_v9 = vshll.u32 %v17440_v32, 16  ;;  %v9582_v16 = vld [vmem:[%s17113_s0 + $0x380] sm:$0x1] }
 0x1cb   :  { %v15004_v60 = vrot.slane %v6555_v13, 5  ;;  %v17444_v14 = vshrl.u32 %v17443_v46, 16  ;;  %v9716_v51 = vcombine.low %v6462_v11, %v6472_v22  ;;  %v9190_v55 = vcombine.low %v14948_v12, %v14964_v34  ;;  %v11829_v11 = vld [vmem:[%s17113_s0 + $0x148] sm:$0xf]  ;;  %v11832_v13 = vld [vmem:[%s17113_s0 + $0x14c] sm:$0x1] }
 0x1cc   :  { %v6548_v35 = vrot.slane %v17441_v58, 4  ;;  %v6551_v62 = vrot.slane %v17442_v9, 5  ;;  %v2181_v2 = vrot.slane %v2179_v19, 4  ;;  %v2182_v0 = vrot.slane %v11828_v54, 5  ;;  %v11834_v9 = vld [vmem:[%s17113_s0 + $0x154] sm:$0xf] }
 0x1cd   :  { %v6561_v17 = vrot.slane %v17444_v14, 4  ;;  %v15016_v59 = vcombine.low %v6486_v44, %v6496_v43  ;;  %v9191_v27 = vcombine.low %v14974_v38, %v14978_v3  ;;  %v6543_v48 = vrot.slane %v6541_v57, 5  ;;  %v11833_v43 = vld [vmem:[%s17113_s0 + $0x394] sm:$0xf] }
 0x1ce   :  { %v2186_v22 = vrot.slane %v11829_v11, 5  ;;  %v15023_v39 = vcombine.low %v6510_v24, %v6520_v29  ;;  %v6534_v6 = vsel %vm12191_vm3, %v14988_v63, %v14950_v42  ;;  %v15031_v61 = vsel %vm12674_vm7, %v9160_v1, %v2179_v19  ;;  %v11831_v42 = vld [vmem:[%s17113_s0 + $0x144] sm:$0xf]  ;;  %v17448_v1 = vld [vmem:[#allocation58_spill] sm:$0xff]  ;;  %v17450_v46 = vld [vmem:[#allocation59_spill] sm:$0xff] }
 0x1cf   :  { %v6579_v25 = vshll.u32 %v11830_v23, 16  ;;  %v6539_v45 = vrot.slane %v6538_v4, 4  ;;  %v6552_v37 = vor.u32 %v6551_v62, %v6548_v35  ;;  %v6562_v33 = vor.u32 %v6561_v17, %v15004_v60  ;;  %v17445_v24 = vld [vmem:[#allocation57_spill] sm:$0xff]  ;;  %v9585_v35 = vld [vmem:[%s17113_s0 + $0x38c] sm:$0x1] }
 0x1d0   :  { %v6565_v52 = vshll.u32 %v9582_v16, 16  ;;  %v15039_v20 = vsel %vm12674_vm7, %v2181_v2, %v2182_v0  ;;  %v9161_v50 = vrot.slane %v11831_v42, 9  ;;  %v2189_v44 = vrot.slane %v11832_v13, 5  ;;  %10661 = vmatmul.mubr.msk.bf16.gmra.mrb[40].mxu1 %vm1022_vm4, %v9187_v53 }
 0x1d1   :  { %v6603_v15 = vshll.u32 %v11833_v43, 16  ;;  %v2188_v19 = vrot.slane %v2186_v22, 4  ;;  %v17446_v57 = vshrl.u32 %v17445_v24, 16  ;;  %v17447_v63 = vshll.u32 %v17445_v24, 16  ;;  %10959 = vmatmul.mubr.msk.bf16.gmra.mrb[8].mxu0 %vm1022_vm4, %v14882_v41  ;;  %10664 = vmatprep.mubr.msk.bf16.mxu1 %vm1022_vm4, %v9188_v18 }
 0x1d2   :  { %v17449_v32 = vshrl.u32 %v17448_v1, 16  ;;  %v15065_v4 = vrot.slane %v6579_v25, 5  ;;  %v2193_v62 = vrot.slane %v11834_v9, 5  ;;  %v17451_v14 = vshrl.u32 %v17450_v46, 16  ;;  %10962 = vmatprep.mubr.msk.bf16.mxu0 %vm1022_vm4, %v9716_v51  ;;  %v11835_v25 = vld [vmem:[%s17113_s0 + $0x150] sm:$0xf] }
 0x1d3   :  { %v6572_v29 = vrot.slane %v17446_v57, 4  ;;  %v6575_v26 = vrot.slane %v17447_v63, 5  ;;  %v17452_v47 = vshll.u32 %v17450_v46, 16  ;;  %v6544_v53 = vsel %vm12191_vm3, %v6539_v45, %v6543_v48  ;;  %v11840_v46 = vld [vmem:[%s17113_s0 + $0x15c] sm:$0xf] }
 0x1d4   :  { %v6585_v58 = vrot.slane %v17449_v32, 4  ;;  %v6596_v17 = vrot.slane %v17451_v14, 4  ;;  %v6553_v41 = vrot.slane %v6552_v37, 4  ;;  %v6563_v2 = vrot.slane %v6562_v33, 4  ;;  %v11839_v32 = vld [vmem:[%s17113_s0 + $0x3ac] sm:$0xf] }
 0x1d5   :  { %v6599_v21 = vrot.slane %v17452_v47, 5  ;;  %v6567_v54 = vrot.slane %v6565_v52, 5  ;;  %v9192_v0 = vcombine.low %v15031_v61, %v15039_v20  ;;  %v15085_v16 = vsel %vm12674_vm7, %v9161_v50, %v2186_v22  ;;  %v9588_v22 = vld [vmem:[%s17113_s0 + $0x398] sm:$0x1]  ;;  %v17465_v20 = vld [vmem:[#allocation65_spill] sm:$0xff] }
 0x1d6   :  { %v15087_v11 = vrot.slane %v6603_v15, 5  ;;  %v17454_v10 = vshrl.u32 %v17453_v30, 16  ;;  %v15093_v51 = vsel %vm12674_vm7, %v2188_v19, %v2189_v44  ;;  %v6576_v48 = vor.u32 %v6575_v26, %v6572_v29  ;;  %v11836_v52 = vld [vmem:[%s17113_s0 + $0x158] sm:$0x1]  ;;  %v11837_v15 = vld [vmem:[%s17113_s0 + $0x160] sm:$0xf] }
 0x1d7   :  { %v6589_v23 = vshll.u32 %v9585_v35, 16  ;;  %v9162_v45 = vrot.slane %v11835_v25, 9  ;;  %v6586_v37 = vor.u32 %v6585_v58, %v15065_v4  ;;  %v2195_v33 = vrot.slane %v2193_v62, 4  ;;  %v17460_v30 = vld [vmem:[#allocation63_spill] sm:$0xff] }
 0x1d8   :  { %v6609_v18 = vrot.slane %v17454_v10, 4  ;;  %v2196_v42 = vrot.slane %v11836_v52, 5  ;;  %v6600_v50 = vor.u32 %v6599_v21, %v6596_v17  ;;  %v9719_v13 = vcombine.low %v6534_v6, %v6544_v53  ;;  %v15119_v6 = vld [vmem:[%s17113_s0 + $0x3a0] sm:$0xf]  ;;  %10665 = vmatmul.mubr.msk.bf16.gmra.mrb[44].mxu1 %vm1022_vm4, %v9189_v49  ;;  %v17455_v17 = vld [vmem:[#allocation61_spill] sm:$0xff] }
 0x1d9   :  { %v6558_v44 = vsel %vm12191_vm3, %v6553_v41, %v15004_v60  ;;  %v6568_v43 = vsel %vm12191_vm3, %v6563_v2, %v6567_v54  ;;  %v2200_v19 = vrot.slane %v11837_v15, 5  ;;  %v9193_v24 = vcombine.low %v15085_v16, %v15093_v51  ;;  %10963 = vmatmul.mubr.msk.bf16.gmra.mrb[12].mxu0 %vm1022_vm4, %v15016_v59  ;;  %10668 = vmatprep.mubr.msk.bf16.mxu1 %vm1022_vm4, %v9190_v55  ;;  %v9591_v59 = vld [vmem:[%s17113_s0 + $0x3a4] sm:$0x1]  ;;  %v15178_v15 = vld [vmem:[%s17113_s0 + $0x3b0] sm:$0x1] }
 0x1da   :  { %v6610_v57 = vor.u32 %v6609_v18, %v15087_v11  ;;  %v6613_v29 = vshll.u32 %v9588_v22, 16  ;;  %v6627_v60 = vshll.u32 %v15119_v6, 16  ;;  %v6577_v63 = vrot.slane %v6576_v48, 4  ;;  %10966 = vmatprep.mubr.msk.bf16.mxu0 %vm1022_vm4, %v15023_v39  ;;  %v17458_v39 = vld [vmem:[#allocation62_spill] sm:$0xff] }
 0x1db   :  { %v6591_v26 = vrot.slane %v6589_v23, 5  ;;  %v15124_v1 = vsel %vm12674_vm7, %v9162_v45, %v2193_v62  ;;  %v6651_v58 = vshll.u32 %v11839_v32, 16  ;;  %v6587_v35 = vrot.slane %v6586_v37, 4  ;;  %v17463_v45 = vld [vmem:[#allocation64_spill] sm:$0xff] }
 0x1dc   :  { %v15137_v9 = vsel %vm12674_vm7, %v2195_v33, %v2196_v42  ;;  %v6601_v62 = vrot.slane %v6600_v50, 4  ;;  %v9163_v14 = vrot.slane %v11840_v46, 9  ;;  %v2202_v7 = vrot.slane %v2200_v19, 4 }
 0x1dd   :  { %v2203_v49 = vrot.slane %v11841_v31, 5  ;;  %v17456_v47 = vshrl.u32 %v17455_v17, 16  ;;  %v17457_v12 = vshll.u32 %v17455_v17, 16  ;;  %v6611_v55 = vrot.slane %v6610_v57, 4  ;;  %v15228_v31 = vld [vmem:[%s17113_s0 + $0x3c4] sm:$0xf] }
 0x1de   :  { %v6615_v53 = vrot.slane %v6613_v29, 5  ;;  %v15158_v41 = vrot.slane %v6627_v60, 5  ;;  %v17459_v2 = vshrl.u32 %v17458_v39, 16  ;;  %v17461_v10 = vshrl.u32 %v17460_v30, 16  ;;  %v15242_v39 = vld [vmem:[%s17113_s0 + $0x3bc] sm:$0x1] }
 0x1df   :  { %v6620_v21 = vrot.slane %v17456_v47, 4  ;;  %v6623_v34 = vrot.slane %v17457_v12, 5  ;;  %v17462_v48 = vshll.u32 %v17460_v30, 16  ;;  %v15166_v25 = vrot.slane %v6651_v58, 5 }
 0x1e0   :  { %v6633_v54 = vrot.slane %v17459_v2, 4  ;;  %v6644_v18 = vrot.slane %v17461_v10, 4  ;;  %v17464_v22 = vshrl.u32 %v17463_v45, 16  ;;  %v9720_v33 = vcombine.low %v6558_v44, %v6568_v43  ;;  %10669 = vmatmul.mubr.msk.bf16.gmra.mrb[48].mxu1 %vm1022_vm4, %v9191_v27  ;;  %v11845_v27 = vld [vmem:[%s17113_s0 + $0x170] sm:$0x1] }
 0x1e1   :  { %v6647_v23 = vrot.slane %v17462_v48, 5  ;;  %v6582_v52 = vsel %vm12191_vm3, %v6577_v63, %v15065_v4  ;;  %v6592_v42 = vsel %vm12191_vm3, %v6587_v35, %v6591_v26  ;;  %v6637_v50 = vshll.u32 %v9591_v59, 16  ;;  %v11842_v4 = vld [vmem:[%s17113_s0 + $0x16c] sm:$0xf]  ;;  %v11843_v26 = vld [vmem:[%s17113_s0 + $0x168] sm:$0xf]  ;;  %10967 = vmatmul.mubr.msk.bf16.gmra.mrb[16].mxu0 %vm1022_vm4, %v9719_v13  ;;  %10672 = vmatprep.mubr.msk.bf16.mxu1 %vm1022_vm4, %v9192_v0 }
 0x1e2   :  { %v6657_v37 = vrot.slane %v17464_v22, 4  ;;  %v15182_v57 = vsel %vm12674_vm7, %v9163_v14, %v2200_v19  ;;  %v15186_v44 = vsel %vm12674_vm7, %v2202_v7, %v2203_v49  ;;  %v6624_v43 = vor.u32 %v6623_v34, %v6620_v21  ;;  %10970 = vmatprep.mubr.msk.bf16.mxu0 %vm1022_vm4, %v9720_v33 }
 0x1e3   :  { %v2207_v29 = vrot.slane %v11842_v4, 5  ;;  %v9194_v60 = vcombine.low %v15124_v1, %v15137_v9  ;;  %v6606_v63 = vsel %vm12191_vm3, %v6601_v62, %v15087_v11  ;;  %v6634_v19 = vor.u32 %v6633_v54, %v15158_v41  ;;  %v15214_v62 = vld [vmem:[%s17113_s0 + $0x3b8] sm:$0xf]  ;;  %v17468_v54 = vld [vmem:[#allocation66_spill] sm:$0xff] }
 0x1e4   :  { %v9164_v32 = vrot.slane %v11843_v26, 9  ;;  %v6616_v58 = vsel %vm12191_vm3, %v6611_v55, %v6615_v53  ;;  %v6648_v35 = vor.u32 %v6647_v23, %v6644_v18  ;;  %v6658_v46 = vor.u32 %v6657_v37, %v15166_v25  ;;  %v17470_v18 = vld [vmem:[#allocation67_spill] sm:$0xff]  ;;  %v15272_v26 = vld [vmem:[%s17113_s0 + $0x3c8] sm:$0x1] }
 0x1e5   :  { %v6661_v14 = vshll.u32 %v15178_v15, 16  ;;  %v9721_v11 = vcombine.low %v6582_v52, %v6592_v42  ;;  %v9195_v1 = vcombine.low %v15182_v57, %v15186_v44  ;;  %v6639_v9 = vrot.slane %v6637_v50, 5  ;;  %v17473_v42 = vld [vmem:[#allocation68_spill] sm:$0xff] }
 0x1e6   :  { %v6675_v7 = vshll.u32 %v15214_v62, 16  ;;  %v6625_v38 = vrot.slane %v6624_v43, 4  ;;  %v2209_v3 = vrot.slane %v2207_v29, 4  ;;  %v2210_v13 = vrot.slane %v11845_v27, 5 }
 0x1e7   :  { %v6699_v49 = vshll.u32 %v15228_v31, 16  ;;  %v9722_v59 = vcombine.low %v6606_v63, %v6616_v58  ;;  %v6635_v61 = vrot.slane %v6634_v19, 4  ;;  %v17466_v0 = vshrl.u32 %v17465_v20, 16 }
 0x1e8   :  { %v17467_v47 = vshll.u32 %v17465_v20, 16  ;;  %v15237_v12 = vsel %vm12674_vm7, %v9164_v32, %v2207_v29  ;;  %v6649_v34 = vrot.slane %v6648_v35, 4  ;;  %v6659_v55 = vrot.slane %v6658_v46, 4  ;;  %v11847_v29 = vld [vmem:[%s17113_s0 + $0x178] sm:$0xf]  ;;  %10673 = vmatmul.mubr.msk.bf16.gmra.mrb[52].mxu1 %vm1022_vm4, %v9193_v24 }
 0x1e9   :  { %v6668_v17 = vrot.slane %v17466_v0, 4  ;;  %v6663_v53 = vrot.slane %v6661_v14, 5  ;;  %v15244_v2 = vrot.slane %v6675_v7, 5  ;;  %v17469_v30 = vshrl.u32 %v17468_v54, 16  ;;  %v11848_v35 = vld [vmem:[%s17113_s0 + $0x174] sm:$0xf]  ;;  %10971 = vmatmul.mubr.msk.bf16.gmra.mrb[20].mxu0 %vm1022_vm4, %v9721_v11  ;;  %10676 = vmatprep.mubr.msk.bf16.mxu1 %vm1022_vm4, %v9194_v60 }
 0x1ea   :  { %v6671_v21 = vrot.slane %v17467_v47, 5  ;;  %v17471_v48 = vshrl.u32 %v17470_v18, 16  ;;  %v17472_v45 = vshll.u32 %v17470_v18, 16  ;;  %v6630_v37 = vsel %vm12191_vm3, %v6625_v38, %v15158_v41  ;;  %v15285_v14 = vld [vmem:[%s17113_s0 + $0x3d0] sm:$0xf]  ;;  %10974 = vmatprep.mubr.msk.bf16.mxu0 %vm1022_vm4, %v9722_v59  ;;  %v17480_v18 = vld [vmem:[#allocation71_spill] sm:$0xff] }
 0x1eb   :  { %v6681_v10 = vrot.slane %v17469_v30, 4  ;;  %v15257_v33 = vsel %vm12674_vm7, %v2209_v3, %v2210_v13  ;;  %v15259_v52 = vrot.slane %v6699_v49, 5  ;;  %v17474_v50 = vshrl.u32 %v17473_v42, 16  ;;  %v11850_v7 = vld [vmem:[%s17113_s0 + $0x17c] sm:$0x1] }
 0x1ec   :  { %v6692_v23 = vrot.slane %v17471_v48, 4  ;;  %v6695_v22 = vrot.slane %v17472_v45, 5  ;;  %v6640_v4 = vsel %vm12191_vm3, %v6635_v61, %v6639_v9  ;;  %v2214_v63 = vrot.slane %v11847_v29, 5  ;;  %v15306_v11 = vld [vmem:[%s17113_s0 + $0x3dc] sm:$0xf] }
 0x1ed   :  { %v6705_v43 = vrot.slane %v17474_v50, 4  ;;  %v6672_v19 = vor.u32 %v6671_v21, %v6668_v17  ;;  %v6685_v41 = vshll.u32 %v15242_v39, 16  ;;  %v6654_v32 = vsel %vm12191_vm3, %v6649_v34, %v15166_v25  ;;  %v17475_v17 = vld [vmem:[#allocation69_spill] sm:$0xff]  ;;  %v17478_v34 = vld [vmem:[#allocation70_spill] sm:$0xff]  ;;  %v15329_v42 = vld [vmem:[%s17113_s0 + $0x3e0] sm:$0x1] }
 0x1ee   :  { %v6664_v58 = vsel %vm12191_vm3, %v6659_v55, %v6663_v53  ;;  %v9165_v46 = vrot.slane %v11848_v35, 9  ;;  %v6723_v9 = vshll.u32 %v15285_v14, 16  ;;  %v9196_v25 = vcombine.low %v15237_v12, %v15257_v33  ;;  %17483 = vst [vmem:[#allocation13_spill] sm:$0xff] %v15329_v42 }
 0x1ef   :  { %v2217_v38 = vrot.slane %v11850_v7, 5  ;;  %v6682_v3 = vor.u32 %v6681_v10, %v15244_v2  ;;  %v6696_v27 = vor.u32 %v6695_v22, %v6692_v23  ;;  %v9723_v16 = vcombine.low %v6630_v37, %v6640_v4  ;;  %v15320_v10 = vld [vmem:[%s17113_s0 + $0x3d4] sm:$0x1] }
 0x1f0   :  { %v6706_v51 = vor.u32 %v6705_v43, %v15259_v52  ;;  %v6709_v24 = vshll.u32 %v15272_v26, 16  ;;  %v6747_v13 = vshll.u32 %v15306_v11, 16  ;;  %v9724_v49 = vcombine.low %v6654_v32, %v6664_v58  ;;  %v17484_v43 = vld [vmem:[#allocation72_spill] sm:$0xff]  ;;  %v11853_v58 = vld [vmem:[%s17113_s0 + $0x184] sm:$0xf]  ;;  %10677 = vmatmul.mubr.msk.bf16.gmra.mrb[56].mxu1 %vm1022_vm4, %v9195_v1 }
 0x1f1   :  { %v2216_v61 = vrot.slane %v2214_v63, 4  ;;  %v6673_v20 = vrot.slane %v6672_v19, 4  ;;  %v6687_v0 = vrot.slane %v6685_v41, 5  ;;  %v17476_v60 = vshrl.u32 %v17475_v17, 16  ;;  %v11852_v32 = vld [vmem:[%s17113_s0 + $0x180] sm:$0xf]  ;;  %10975 = vmatmul.mubr.msk.bf16.gmra.mrb[24].mxu0 %vm1022_vm4, %v9723_v16  ;;  %10680 = vmatprep.mubr.msk.bf16.mxu1 %vm1022_vm4, %v9196_v25 }
 0x1f2   :  { %v17477_v59 = vshll.u32 %v17475_v17, 16  ;;  %v15313_v12 = vrot.slane %v6723_v9, 5  ;;  %v17479_v55 = vshrl.u32 %v17478_v34, 16  ;;  %v6683_v54 = vrot.slane %v6682_v3, 4  ;;  %v11854_v9 = vld [vmem:[%s17113_s0 + $0x3e8] sm:$0xf]  ;;  %10978 = vmatprep.mubr.msk.bf16.mxu0 %vm1022_vm4, %v9724_v49 }
 0x1f3   :  { %v6716_v47 = vrot.slane %v17476_v60, 4  ;;  %v6697_v30 = vrot.slane %v6696_v27, 4  ;;  %v17481_v48 = vshrl.u32 %v17480_v18, 16  ;;  %v17482_v45 = vshll.u32 %v17480_v18, 16  ;;  %v9609_v1 = vld [vmem:[%s17113_s0 + $0x3ec] sm:$0x1] }
 0x1f4   :  { %v6719_v21 = vrot.slane %v17477_v59, 5  ;;  %v6729_v53 = vrot.slane %v17479_v55, 4  ;;  %v6707_v37 = vrot.slane %v6706_v51, 4  ;;  %v6711_v33 = vrot.slane %v6709_v24, 5  ;;  %v17486_v16 = vld [vmem:[#allocation73_spill] sm:$0xff]  ;;  %v17489_v25 = vld [vmem:[#allocation74_spill] sm:$0xff] }
 0x1f5   :  { %v6740_v23 = vrot.slane %v17481_v48, 4  ;;  %v6743_v22 = vrot.slane %v17482_v45, 5  ;;  %v15331_v50 = vrot.slane %v6747_v13, 5  ;;  %v17485_v4 = vshrl.u32 %v17484_v43, 16 }
 0x1f6   :  { %v2215_v19 = vsel %vm12674_vm7, %v9165_v46, %v2214_v63  ;;  %v2218_v41 = vsel %vm12674_vm7, %v2216_v61, %v2217_v38  ;;  %v9326_v35 = vcombine.low %v11852_v32, %v11853_v58  ;;  %v6771_v7 = vshll.u32 %v11854_v9, 16  ;;  %v9612_v32 = vld [vmem:[%s17113_s0 + $0x3f8] sm:$0x1]  ;;  %v17494_v9 = vld [vmem:[#allocation76_spill] sm:$0xff] }
 0x1f7   :  { %v6753_v29 = vrot.slane %v17485_v4, 4  ;;  %v6678_v63 = vsel %vm12191_vm3, %v6673_v20, %v15244_v2  ;;  %v6720_v46 = vor.u32 %v6719_v21, %v6716_v47  ;;  %v6730_v38 = vor.u32 %v6729_v53, %v15313_v12  ;;  %v11855_v47 = vld [vmem:[%s17113_s0 + $0x3f4] sm:$0xf] }
 0x1f8   :  { %v6733_v3 = vshll.u32 %v15320_v10, 16  ;;  %v6688_v27 = vsel %vm12191_vm3, %v6683_v54, %v6687_v0  ;;  %v6702_v51 = vsel %vm12191_vm3, %v6697_v30, %v15259_v52  ;;  %v6744_v2 = vor.u32 %v6743_v22, %v6740_v23  ;;  %v17491_v22 = vld [vmem:[#allocation75_spill] sm:$0xff] }
 0x1f9   :  { %v6757_v24 = vshll.u32 %v15329_v42, 16  ;;  %v6712_v57 = vsel %vm12191_vm3, %v6707_v37, %v6711_v33  ;;  %v6754_v44 = vor.u32 %v6753_v29, %v15331_v50  ;;  %v17487_v13 = vshrl.u32 %v17486_v16, 16  ;;  %v15390_v29 = vld [vmem:[%s17113_s0 + $0x438] sm:$0xf] }
 0x1fa   :  { %v17488_v52 = vshll.u32 %v17486_v16, 16  ;;  %v9197_v0 = vcombine.low %v2215_v19, %v2218_v41  ;;  %v15376_v17 = vrot.slane %v6771_v7, 5  ;;  %v17490_v49 = vshrl.u32 %v17489_v25, 16 }
 0x1fb   :  { %v6764_v61 = vrot.slane %v17487_v13, 4  ;;  %v6795_v59 = vshll.u32 %v11855_v47, 16  ;;  %v9725_v21 = vcombine.low %v6678_v63, %v6688_v27  ;;  %v6721_v34 = vrot.slane %v6720_v46, 4  ;;  %v15404_v46 = vld [vmem:[%s17113_s0 + $0x43c] sm:$0xf] }
 0x1fc   :  { %v6767_v20 = vrot.slane %v17488_v52, 5  ;;  %v6777_v60 = vrot.slane %v17490_v49, 4  ;;  %v6731_v55 = vrot.slane %v6730_v38, 4  ;;  %v6735_v53 = vrot.slane %v6733_v3, 5  ;;  %10681 = vmatmul.mubr.msk.bf16.gmra.mrb[60].mxu1 %vm1022_vm4, %v9197_v0 }
 0x1fd   :  { %v9726_v54 = vcombine.low %v6702_v51, %v6712_v57  ;;  %v6745_v30 = vrot.slane %v6744_v2, 4  ;;  %v6759_v18 = vrot.slane %v6757_v24, 5  ;;  %v6781_v48 = vshll.u32 %v9609_v1, 16  ;;  %v11858_v51 = vld [vmem:[%s17113_s0 + $0x400] sm:$0xf]  ;;  %10979 = vmatmul.mubr.msk.bf16.gmra.mrb[28].mxu0 %vm1022_vm4, %v9725_v21  ;;  %10686 = vmatprep.mubr.msk.bf16.mxu1 %vm1022_vm4, %v9326_v35  ;;  %v17499_v35 = vld [vmem:[#allocation78_spill] sm:$0xff] }
 0x1fe   :  { %v6755_v23 = vrot.slane %v6754_v44, 4  ;;  %v6768_v45 = vor.u32 %v6767_v20, %v6764_v61  ;;  %v17492_v37 = vshrl.u32 %v17491_v22, 16  ;;  %v17493_v43 = vshll.u32 %v17491_v22, 16 }
 0x1ff   :  { %v6933_v19 = vshll.u32 %v15390_v29, 16  ;;  %v6778_v41 = vor.u32 %v6777_v60, %v15376_v17  ;;  %v15397_v58 = vrot.slane %v6795_v59, 5  ;;  %v17495_v7 = vshrl.u32 %v17494_v9, 16  ;;  %10982 = vmatprep.mubr.msk.bf16.mxu0 %vm1022_vm4, %v9726_v54  ;;  %v11863_v9 = vld [vmem:[%s17113_s0 + $0x19c] sm:$0xf] }
 0x200   :  { %v6788_v33 = vrot.slane %v17492_v37, 4  ;;  %v6791_v4 = vrot.slane %v17493_v43, 5  ;;  %v6943_v38 = vshrl.u32 %v15404_v46, 16  ;;  %v6954_v3 = vshrl.u32 %v14382_v40, 16  ;;  %v9615_v37 = vld [vmem:[%s17113_s0 + $0x404] sm:$0x1] }
 0x201   :  { %v6801_v63 = vrot.slane %v17495_v7, 4  ;;  %v6726_v27 = vsel %vm12191_vm3, %v6721_v34, %v15313_v12  ;;  %v6819_v2 = vshll.u32 %v11858_v51, 16  ;;  %v6736_v24 = vsel %vm12191_vm3, %v6731_v55, %v6735_v53  ;;  %v11859_v12 = vld [vmem:[%s17113_s0 + $0x40c] sm:$0xf]  ;;  %v17501_v55 = vld [vmem:[#allocation79_spill] sm:$0xff]  ;;  %v17504_v43 = vld [vmem:[#allocation80_spill] sm:$0xff] }
 0x202   :  { %v6750_v57 = vsel %vm12191_vm3, %v6745_v30, %v15331_v50  ;;  %v6783_v44 = vrot.slane %v6781_v48, 5  ;;  %v6843_v1 = vshll.u32 %v11859_v12, 16  ;;  %v6760_v16 = vsel %vm12191_vm3, %v6755_v23, %v6759_v18  ;;  %v17496_v50 = vld [vmem:[#allocation77_spill] sm:$0xff]  ;;  %v11860_v48 = vld [vmem:[%s17113_s0 + $0x18c] sm:$0xf] }
 0x203   :  { %v6769_v13 = vrot.slane %v6768_v45, 4  ;;  %v6792_v61 = vor.u32 %v6791_v4, %v6788_v33  ;;  %v6805_v52 = vshll.u32 %v9612_v32, 16  ;;  %v6779_v20 = vrot.slane %v6778_v41, 4  ;;  %v11861_v23 = vld [vmem:[%s17113_s0 + $0x190] sm:$0xf] }
 0x204   :  { %v6802_v0 = vor.u32 %v6801_v63, %v15397_v58  ;;  %v17497_v25 = vshrl.u32 %v17496_v50, 16  ;;  %v17498_v60 = vshll.u32 %v17496_v50, 16  ;;  %v15433_v59 = vrot.slane %v6819_v2, 5  ;;  %v11862_v32 = vld [vmem:[%s17113_s0 + $0x198] sm:$0xf] }
 0x205   :  { %v17500_v21 = vshrl.u32 %v17499_v35, 16  ;;  %v17502_v53 = vshrl.u32 %v17501_v55, 16  ;;  %v17503_v30 = vshll.u32 %v17501_v55, 16  ;;  %v9327_v45 = vcombine.low %v11860_v48, %v11861_v23  ;;  %v9618_v51 = vld [vmem:[%s17113_s0 + $0x410] sm:$0x1] }
 0x206   :  { %v6812_v49 = vrot.slane %v17497_v25, 4  ;;  %v6815_v47 = vrot.slane %v17498_v60, 5  ;;  %v9727_v22 = vcombine.low %v6726_v27, %v6736_v24  ;;  %v15450_v33 = vrot.slane %v6843_v1, 5  ;;  %v11864_v2 = vld [vmem:[%s17113_s0 + $0x418] sm:$0xf]  ;;  %v17510_v48 = vld [vmem:[#allocation82_spill] sm:$0xff] }
 0x207   :  { %v6825_v34 = vrot.slane %v17500_v21, 4  ;;  %v6836_v54 = vrot.slane %v17502_v53, 4  ;;  %v6839_v18 = vrot.slane %v17503_v30, 5  ;;  %v17505_v4 = vshrl.u32 %v17504_v43, 16  ;;  %10687 = vmatmul.mubr.msk.bf16.vlgmr.msra.gmra.mrb[0].mxu1 %vm1022_vm4, %v9327_v45  ;;  %v17506_v21 = vld [vmem:[#allocation81_spill] sm:$0xff] }
 0x208   :  { %v9328_v7 = vcombine.low %v11862_v32, %v11863_v9  ;;  %v9728_v63 = vcombine.low %v6750_v57, %v6760_v16  ;;  %v6774_v27 = vsel %vm12191_vm3, %v6769_v13, %v15376_v17  ;;  %v6867_v24 = vshll.u32 %v11864_v2, 16  ;;  %10983 = vmatmul.mubr.msk.bf16.gmra.mrb[32].mxu0 %vm1022_vm4, %v9727_v22  ;;  %v9621_v30 = vld [vmem:[%s17113_s0 + $0x41c] sm:$0x1]  ;;  %v11882_v40 = vld [vmem:[%s17113_s0 + $0x1e4] sm:$0xf] }
 0x209   :  { %v6849_v41 = vrot.slane %v17505_v4, 4  ;;  %v6784_v12 = vsel %vm12191_vm3, %v6779_v20, %v6783_v44  ;;  %v6793_v1 = vrot.slane %v6792_v61, 4  ;;  %v6803_v50 = vrot.slane %v6802_v0, 4  ;;  %v17509_v20 = vld [vmem:[#allocation9_spill] sm:$0xff] }
 0x20a   :  { %v6807_v25 = vrot.slane %v6805_v52, 5  ;;  %v6816_v57 = vor.u32 %v6815_v47, %v6812_v49  ;;  %v6826_v16 = vor.u32 %v6825_v34, %v15433_v59  ;;  %v6829_v60 = vshll.u32 %v9615_v37, 16  ;;  %11081 = vmatpush3.bf16.msra.mxu1 %v17509_v20  ;;  %10690 = vmatprep.mubr.msk.bf16.mxu1 %vm1022_vm4, %v9328_v7  ;;  %v11865_v52 = vld [vmem:[%s17113_s0 + $0x1a4] sm:$0xf]  ;;  %v11866_v0 = vld [vmem:[%s17113_s0 + $0x1a8] sm:$0xf] }
 0x20b   :  { %v6840_v17 = vor.u32 %v6839_v18, %v6836_v54  ;;  %v6850_v13 = vor.u32 %v6849_v41, %v15450_v33  ;;  %v6853_v35 = vshll.u32 %v9618_v51, 16  ;;  %v17507_v55 = vshrl.u32 %v17506_v21, 16  ;;  %v11867_v47 = vld [vmem:[%s17113_s0 + $0x1b0] sm:$0xf]  ;;  %v11868_v34 = vld [vmem:[%s17113_s0 + $0x1b4] sm:$0xf]  ;;  %10986 = vmatprep.mubr.msk.bf16.mxu0 %vm1022_vm4, %v9728_v63 }
 0x20c   :  { %v17508_v44 = vshll.u32 %v17506_v21, 16  ;;  %v9329_v49 = vcombine.low %v11865_v52, %v11866_v0  ;;  %v9330_v54 = vcombine.low %v11867_v47, %v11868_v34  ;;  %v15496_v18 = vrot.slane %v6867_v24, 5  ;;  %v11869_v4 = vld [vmem:[%s17113_s0 + $0x424] sm:$0xf]  ;;  %v11872_v20 = vld [vmem:[%s17113_s0 + $0x1bc] sm:$0xf] }
 0x20d   :  { %v6860_v53 = vrot.slane %v17507_v55, 4  ;;  %v17511_v23 = vshrl.u32 %v17510_v48, 16  ;;  %v9729_v22 = vcombine.low %v6774_v27, %v6784_v12  ;;  %v6798_v37 = vsel %vm12191_vm3, %v6793_v1, %v15397_v58  ;;  %v17512_v58 = vld [vmem:[#allocation12_spill] sm:$0xff] }
 0x20e   :  { %v6863_v61 = vrot.slane %v17508_v44, 5  ;;  %v6808_v43 = vsel %vm12191_vm3, %v6803_v50, %v6807_v25  ;;  %v6891_v41 = vshll.u32 %v11869_v4, 16  ;;  %v6817_v32 = vrot.slane %v6816_v57, 4  ;;  %v15517_v57 = vld [vmem:[%s17113_s0 + $0x444] sm:$0xf] }
 0x20f   :  { %v6873_v45 = vrot.slane %v17511_v23, 4  ;;  %v6827_v9 = vrot.slane %v6826_v16, 4  ;;  %v6831_v7 = vrot.slane %v6829_v60, 5  ;;  %v6841_v51 = vrot.slane %v6840_v17, 4  ;;  %v9624_v60 = vld [vmem:[%s17113_s0 + $0x428] sm:$0x1]  ;;  %10691 = vmatmul.mubr.msk.bf16.gmra.mrb[4].mxu1 %vm1022_vm4, %v9329_v49 }
 0x210   :  { %v6851_v2 = vrot.slane %v6850_v13, 4  ;;  %v6855_v24 = vrot.slane %v6853_v35, 5  ;;  %v6864_v63 = vor.u32 %v6863_v61, %v6860_v53  ;;  %v6877_v27 = vshll.u32 %v9621_v30, 16  ;;  %v17515_v13 = vld [vmem:[#allocation11_spill] sm:$0xff]  ;;  %v11871_v44 = vld [vmem:[%s17113_s0 + $0x430] sm:$0xf]  ;;  %10987 = vmatmul.mubr.msk.bf16.gmra.mrb[36].mxu0 %vm1022_vm4, %v9729_v22  ;;  %10694 = vmatprep.mubr.msk.bf16.mxu1 %vm1022_vm4, %v9330_v54 }
 0x211   :  { %v9730_v12 = vcombine.low %v6798_v37, %v6808_v43  ;;  %v6874_v21 = vor.u32 %v6873_v45, %v15496_v18  ;;  %v17513_v1 = vshrl.u32 %v17512_v58, 16  ;;  %v17514_v50 = vshll.u32 %v17512_v58, 16  ;;  %v11873_v52 = vld [vmem:[%s17113_s0 + $0x1c0] sm:$0xf]  ;;  %v9627_v22 = vld [vmem:[%s17113_s0 + $0x434] sm:$0x1] }
 0x212   :  { %v6957_v16 = vshll.u32 %v15517_v57, 16  ;;  %v15523_v17 = vrot.slane %v6891_v41, 5  ;;  %v17516_v35 = vshrl.u32 %v17515_v13, 16  ;;  %v6915_v61 = vshll.u32 %v11871_v44, 16 }
 0x213   :  { %v6884_v55 = vrot.slane %v17513_v1, 4  ;;  %v6887_v25 = vrot.slane %v17514_v50, 5  ;;  %v9331_v0 = vcombine.low %v11872_v20, %v11873_v52  ;;  %v6822_v47 = vsel %vm12191_vm3, %v6817_v32, %v15433_v59  ;;  %10990 = vmatprep.mubr.msk.bf16.mxu0 %vm1022_vm4, %v9730_v12  ;;  %v11878_v52 = vld [vmem:[%s17113_s0 + $0x454] sm:$0xf] }
 0x214   :  { %v6897_v53 = vrot.slane %v17516_v35, 4  ;;  %v6832_v34 = vsel %vm12191_vm3, %v6827_v9, %v6831_v7  ;;  %v6846_v30 = vsel %vm12191_vm3, %v6841_v51, %v15450_v33  ;;  %v6856_v48 = vsel %vm12191_vm3, %v6851_v2, %v6855_v24  ;;  %v11874_v24 = vld [vmem:[%s17113_s0 + $0x1c8] sm:$0xf] }
 0x215   :  { %v6865_v23 = vrot.slane %v6864_v63, 4  ;;  %v6879_v45 = vrot.slane %v6877_v27, 5  ;;  %v6939_v37 = vshll.u32 %v15404_v46, 16  ;;  %v6875_v59 = vrot.slane %v6874_v21, 4  ;;  %v11875_v63 = vld [vmem:[%s17113_s0 + $0x1cc] sm:$0xf] }
 0x216   :  { %v6888_v43 = vor.u32 %v6887_v25, %v6884_v55  ;;  %v6901_v4 = vshll.u32 %v9624_v60, 16  ;;  %v17517_v33 = vshrl.u32 %v14300_v5, 16  ;;  %v6898_v49 = vor.u32 %v6897_v53, %v15523_v17  ;;  %v11877_v46 = vld [vmem:[%s17113_s0 + $0x450] sm:$0xf] }
 0x217   :  { %v17518_v32 = vshll.u32 %v14300_v5, 16  ;;  %v15559_v7 = vrot.slane %v6915_v61, 5  ;;  %v17519_v54 = vshrl.u32 %v14309_v36, 16  ;;  %v9731_v2 = vcombine.low %v6822_v47, %v6832_v34  ;;  %v9630_v5 = vld [vmem:[%s17113_s0 + $0x440] sm:$0x1]  ;;  %10695 = vmatmul.mubr.msk.bf16.gmra.mrb[8].mxu1 %vm1022_vm4, %v9331_v0 }
 0x218   :  { %v6908_v41 = vrot.slane %v17517_v33, 4  ;;  %v9332_v27 = vcombine.low %v11874_v24, %v11875_v63  ;;  %v17520_v12 = vshrl.u32 %v14342_v8, 16  ;;  %v6935_v36 = vrot.slane %v6933_v19, 5  ;;  %v11879_v34 = vld [vmem:[%s17113_s0 + $0x1d4] sm:$0xf] }
 0x219   :  { %v6911_v9 = vrot.slane %v17518_v32, 5  ;;  %v6921_v51 = vrot.slane %v17519_v54, 4  ;;  %v9732_v58 = vcombine.low %v6846_v30, %v6856_v48  ;;  %v6870_v1 = vsel %vm12191_vm3, %v6865_v23, %v15496_v18  ;;  %v11876_v18 = vld [vmem:[%s17113_s0 + $0x448] sm:$0xf]  ;;  %10991 = vmatmul.mubr.msk.bf16.gmra.mrb[40].mxu0 %vm1022_vm4, %v9731_v2  ;;  %v11880_v30 = vld [vmem:[%s17113_s0 + $0x1d8] sm:$0xf] }
 0x21a   :  { %v6932_v21 = vrot.slane %v17520_v12, 4  ;;  %v15579_v55 = vrot.slane %v6939_v37, 5  ;;  %v6945_v50 = vrot.slane %v6943_v38, 4  ;;  %v6880_v25 = vsel %vm12191_vm3, %v6875_v59, %v6879_v45  ;;  %10698 = vmatprep.mubr.msk.bf16.mxu1 %vm1022_vm4, %v9332_v27  ;;  %v11881_v27 = vld [vmem:[%s17113_s0 + $0x1e0] sm:$0xf] }
 0x21b   :  { %v6889_v60 = vrot.slane %v6888_v43, 4  ;;  %v6903_v13 = vrot.slane %v6901_v4, 5  ;;  %v6925_v8 = vshll.u32 %v9627_v22, 16  ;;  %v6899_v35 = vrot.slane %v6898_v49, 4  ;;  %10994 = vmatprep.mubr.msk.bf16.mxu0 %vm1022_vm4, %v9732_v58  ;;  %v11883_v12 = vld [vmem:[%s17113_s0 + $0x45c] sm:$0xf] }
 0x21c   :  { %v6912_v53 = vor.u32 %v6911_v9, %v6908_v41  ;;  %v6922_v29 = vor.u32 %v6921_v51, %v15559_v7  ;;  %v6949_v19 = vshll.u32 %v9630_v5, 16  ;;  %v6967_v44 = vshrl.u32 %v11876_v18, 16  ;;  %v11884_v58 = vld [vmem:[%s17113_s0 + $0x460] sm:$0xf] }
 0x21d   :  { %v6978_v38 = vshrl.u32 %v11877_v46, 16  ;;  %v6981_v61 = vshll.u32 %v11877_v46, 16  ;;  %v6936_v20 = vor.u32 %v6935_v36, %v6932_v21  ;;  %v6991_v47 = vshrl.u32 %v11878_v52, 16 }
 0x21e   :  { %v9333_v48 = vcombine.low %v11879_v34, %v11880_v30  ;;  %v6946_v23 = vor.u32 %v6945_v50, %v15579_v55  ;;  %v6963_v45 = vshll.u32 %v11876_v18, 16  ;;  %v9733_v37 = vcombine.low %v6870_v1, %v6880_v25  ;;  %v9636_v25 = vld [vmem:[%s17113_s0 + $0x458] sm:$0x1] }
 0x21f   :  { %v6894_v0 = vsel %vm12191_vm3, %v6889_v60, %v15523_v17  ;;  %v6927_v59 = vrot.slane %v6925_v8, 5  ;;  %v6987_v43 = vshll.u32 %v11878_v52, 16  ;;  %v6904_v4 = vsel %vm12191_vm3, %v6899_v35, %v6903_v13  ;;  %v9633_v17 = vld [vmem:[%s17113_s0 + $0x44c] sm:$0x1]  ;;  %v11889_v30 = vld [vmem:[%s17113_s0 + $0x1f8] sm:$0xf] }
 0x220   :  { %v6913_v33 = vrot.slane %v6912_v53, 4  ;;  %v6923_v41 = vrot.slane %v6922_v29, 4  ;;  %v6951_v49 = vrot.slane %v6949_v19, 5  ;;  %v6937_v22 = vrot.slane %v6936_v20, 4  ;;  %v11885_v53 = vld [vmem:[%s17113_s0 + $0x468] sm:$0xf]  ;;  %10699 = vmatmul.mubr.msk.bf16.gmra.mrb[12].mxu1 %vm1022_vm4, %v9333_v48 }
 0x221   :  { %v6956_v32 = vrot.slane %v6954_v3, 4  ;;  %v6959_v9 = vrot.slane %v6957_v16, 5  ;;  %v6969_v54 = vrot.slane %v6967_v44, 4  ;;  %v6947_v51 = vrot.slane %v6946_v23, 4  ;;  %10995 = vmatmul.mubr.msk.bf16.gmra.mrb[44].mxu0 %vm1022_vm4, %v9733_v37  ;;  %v11887_v52 = vld [vmem:[%s17113_s0 + $0x1ec] sm:$0xf] }
 0x222   :  { %v15618_v2 = vrot.slane %v6963_v45, 5  ;;  %v6980_v24 = vrot.slane %v6978_v38, 4  ;;  %v6983_v63 = vrot.slane %v6981_v61, 5  ;;  %v9334_v3 = vcombine.low %v11881_v27, %v11882_v40  ;;  %v11886_v61 = vld [vmem:[%s17113_s0 + $0x46c] sm:$0xf] }
 0x223   :  { %v9734_v57 = vcombine.low %v6894_v0, %v6904_v4  ;;  %v15626_v16 = vrot.slane %v6987_v43, 5  ;;  %v6993_v5 = vrot.slane %v6991_v47, 4  ;;  %v7002_v21 = vshrl.u32 %v11883_v12, 16  ;;  %v11888_v47 = vld [vmem:[%s17113_s0 + $0x1f0] sm:$0xf] }
 0x224   :  { %v7005_v36 = vshll.u32 %v11883_v12, 16  ;;  %v7015_v1 = vshrl.u32 %v11884_v58, 16  ;;  %v6918_v50 = vsel %vm12191_vm3, %v6913_v33, %v15559_v7  ;;  %v6928_v60 = vsel %vm12191_vm3, %v6923_v41, %v6927_v59  ;;  %10702 = vmatprep.mubr.msk.bf16.mxu1 %vm1022_vm4, %v9334_v3  ;;  %v11890_v48 = vld [vmem:[%s17113_s0 + $0x1fc] sm:$0xf]  ;;  %v11891_v40 = vld [vmem:[%s17113_s0 + $0x474] sm:$0xf] }
 0x225   :  { %v6942_v13 = vsel %vm12191_vm3, %v6937_v22, %v15579_v55  ;;  %v6960_v8 = vor.u32 %v6959_v9, %v6956_v32  ;;  %v6973_v35 = vshll.u32 %v9633_v17, 16  ;;  %v7026_v29 = vshrl.u32 %v11885_v53, 16  ;;  %10998 = vmatprep.mubr.msk.bf16.mxu0 %vm1022_vm4, %v9734_v57  ;;  %v9639_v9 = vld [vmem:[%s17113_s0 + $0x464] sm:$0x1]  ;;  %v11892_v12 = vld [vmem:[%s17113_s0 + $0x478] sm:$0xf] }
 0x226   :  { %v6952_v7 = vsel %vm12191_vm3, %v6947_v51, %v6951_v49  ;;  %v6970_v19 = vor.u32 %v6969_v54, %v15618_v2  ;;  %v6984_v18 = vor.u32 %v6983_v63, %v6980_v24  ;;  %v7029_v44 = vshll.u32 %v11885_v53, 16 }
 0x227   :  { %v6994_v55 = vor.u32 %v6993_v5, %v15626_v16  ;;  %v6997_v46 = vshll.u32 %v9636_v25, 16  ;;  %v7011_v38 = vshll.u32 %v11884_v58, 16  ;;  %v7039_v20 = vshrl.u32 %v11886_v61, 16  ;;  %v9642_v5 = vld [vmem:[%s17113_s0 + $0x470] sm:$0x1] }
 0x228   :  { %v9335_v34 = vcombine.low %v11887_v52, %v11888_v47  ;;  %v9336_v23 = vcombine.low %v11889_v30, %v11890_v48  ;;  %v7035_v45 = vshll.u32 %v11886_v61, 16  ;;  %v9735_v37 = vcombine.low %v6918_v50, %v6928_v60 }
 0x229   :  { %v9736_v0 = vcombine.low %v6942_v13, %v6952_v7  ;;  %v6961_v59 = vrot.slane %v6960_v8, 4  ;;  %v6975_v43 = vrot.slane %v6973_v35, 5  ;;  %v6971_v4 = vrot.slane %v6970_v19, 4  ;;  %v11894_v7 = vld [vmem:[%s17113_s0 + $0x208] sm:$0xf] }
 0x22a   :  { %v6985_v33 = vrot.slane %v6984_v18, 4  ;;  %v7004_v41 = vrot.slane %v7002_v21, 4  ;;  %v7007_v49 = vrot.slane %v7005_v36, 5  ;;  %v6995_v22 = vrot.slane %v6994_v55, 4  ;;  %10703 = vmatmul.mubr.msk.bf16.gmra.mrb[16].mxu1 %vm1022_vm4, %v9335_v34  ;;  %10999 = vmatmul.mubr.msk.bf16.gmra.mrb[48].mxu0 %vm1022_vm4, %v9735_v37  ;;  %v11895_v55 = vld [vmem:[%s17113_s0 + $0x210] sm:$0xf] }
 0x22b   :  { %v6999_v32 = vrot.slane %v6997_v46, 5  ;;  %v15674_v54 = vrot.slane %v7011_v38, 5  ;;  %v7017_v51 = vrot.slane %v7015_v1, 4  ;;  %v7028_v17 = vrot.slane %v7026_v29, 4  ;;  %10706 = vmatprep.mubr.msk.bf16.mxu1 %vm1022_vm4, %v9336_v23  ;;  %11002 = vmatprep.mubr.msk.bf16.mxu0 %vm1022_vm4, %v9736_v0  ;;  %v11893_v29 = vld [vmem:[%s17113_s0 + $0x204] sm:$0xf] }
 0x22c   :  { %v7031_v24 = vrot.slane %v7029_v44, 5  ;;  %v15676_v63 = vrot.slane %v7035_v45, 5  ;;  %v7041_v27 = vrot.slane %v7039_v20, 4  ;;  %v7050_v3 = vshrl.u32 %v11891_v40, 16  ;;  %v11896_v46 = vld [vmem:[%s17113_s0 + $0x214] sm:$0xf] }
 0x22d   :  { %v7053_v57 = vshll.u32 %v11891_v40, 16  ;;  %v7063_v21 = vshrl.u32 %v11892_v12, 16  ;;  %v6966_v36 = vsel %vm12191_vm3, %v6961_v59, %v15618_v2  ;;  %v7008_v58 = vor.u32 %v7007_v49, %v7004_v41  ;;  %v9645_v37 = vld [vmem:[%s17113_s0 + $0x47c] sm:$0x1]  ;;  %v15723_v59 = vld [vmem:[%s17113_s0 + $0x24c] sm:$0xf] }
 0x22e   :  { %v7021_v1 = vshll.u32 %v9639_v9, 16  ;;  %v6976_v50 = vsel %vm12191_vm3, %v6971_v4, %v6975_v43  ;;  %v6990_v25 = vsel %vm12191_vm3, %v6985_v33, %v15626_v16  ;;  %v7018_v60 = vor.u32 %v7017_v51, %v15674_v54  ;;  %v15730_v33 = vld [vmem:[%s17113_s0 + $0x250] sm:$0xf]  ;;  %v11899_v49 = vld [vmem:[%s17113_s0 + $0x304] sm:$0xf] }
 0x22f   :  { %v7059_v13 = vshll.u32 %v11892_v12, 16  ;;  %v7000_v8 = vsel %vm12191_vm3, %v6995_v22, %v6999_v32  ;;  %v7032_v2 = vor.u32 %v7031_v24, %v7028_v17  ;;  %v7042_v35 = vor.u32 %v7041_v27, %v15676_v63  ;;  %v11900_v27 = vld [vmem:[%s17113_s0 + $0x254] sm:$0x1] }
 0x230   :  { %v7045_v53 = vshll.u32 %v9642_v5, 16  ;;  %v9337_v19 = vcombine.low %v11893_v29, %v11894_v7  ;;  %v7052_v16 = vrot.slane %v7050_v3, 4  ;;  %v7055_v18 = vrot.slane %v7053_v57, 5  ;;  %v11901_v57 = vld [vmem:[%s17113_s0 + $0x21c] sm:$0xf] }
 0x231   :  { %v9737_v44 = vcombine.low %v6966_v36, %v6976_v50  ;;  %v9338_v38 = vcombine.low %v11895_v55, %v11896_v46  ;;  %v7009_v61 = vrot.slane %v7008_v58, 4  ;;  %v7023_v20 = vrot.slane %v7021_v1, 5  ;;  %v11902_v5 = vld [vmem:[%s17113_s0 + $0x220] sm:$0xf] }
 0x232   :  { %v9738_v52 = vcombine.low %v6990_v25, %v7000_v8  ;;  %v7019_v47 = vrot.slane %v7018_v60, 4  ;;  %v15715_v34 = vrot.slane %v7059_v13, 5  ;;  %v7065_v30 = vrot.slane %v7063_v21, 4  ;;  %10707 = vmatmul.mubr.msk.bf16.gmra.mrb[20].mxu1 %vm1022_vm4, %v9337_v19  ;;  %v11903_v21 = vld [vmem:[%s17113_s0 + $0x228] sm:$0xf] }
 0x233   :  { %v7033_v48 = vrot.slane %v7032_v2, 4  ;;  %v7043_v23 = vrot.slane %v7042_v35, 4  ;;  %v7047_v45 = vrot.slane %v7045_v53, 5  ;;  %v7056_v0 = vor.u32 %v7055_v18, %v7052_v16  ;;  %11003 = vmatmul.mubr.msk.bf16.gmra.mrb[52].mxu0 %vm1022_vm4, %v9737_v44  ;;  %10710 = vmatprep.mubr.msk.bf16.mxu1 %vm1022_vm4, %v9338_v38  ;;  %v11905_v1 = vld [vmem:[%s17113_s0 + $0x300] sm:$0xf] }
 0x234   :  { %v3885_v43 = vshrl.u32 %v15723_v59, 16  ;;  %v3888_v4 = vshll.u32 %v15723_v59, 16  ;;  %v3894_v41 = vshll.u32 %v15730_v33, 16  ;;  %v7655_v22 = vrot.slane %v11899_v49, 5  ;;  %11006 = vmatprep.mubr.msk.bf16.mxu0 %vm1022_vm4, %v9738_v52  ;;  %v11906_v13 = vld [vmem:[%s17113_s0 + $0x308] sm:$0x1] }
 0x235   :  { %v7014_v32 = vsel %vm12191_vm3, %v7009_v61, %v15674_v54  ;;  %v7024_v9 = vsel %vm12191_vm3, %v7019_v47, %v7023_v20  ;;  %v7066_v51 = vor.u32 %v7065_v30, %v15715_v34  ;;  %v7069_v17 = vshll.u32 %v9645_v37, 16  ;;  %v11907_v2 = vld [vmem:[%s17113_s0 + $0x310] sm:$0xf]  ;;  %v11908_v19 = vld [vmem:[%s17113_s0 + $0x31c] sm:$0xf] }
 0x236   :  { %v3898_v24 = vshrl.u32 %v15730_v33, 16  ;;  %v3904_v40 = vshll.u32 %v11900_v27, 16  ;;  %v7038_v3 = vsel %vm12191_vm3, %v7033_v48, %v15676_v63  ;;  %v7048_v54 = vsel %vm12191_vm3, %v7043_v23, %v7047_v45  ;;  %v11904_v63 = vld [vmem:[%s17113_s0 + $0x22c] sm:$0xf]  ;;  %v11911_v45 = vld [vmem:[%s17113_s0 + $0x318] sm:$0xf] }
 0x237   :  { %v9339_v12 = vcombine.low %v11901_v57, %v11902_v5  ;;  %v9340_v36 = vcombine.low %v11903_v21, %v11904_v63  ;;  %v7057_v58 = vrot.slane %v7056_v0, 4  ;;  %v9774_v50 = vrot.slane %v11905_v1, 9  ;;  %v11909_v52 = vld [vmem:[%s17113_s0 + $0x30c] sm:$0xf]  ;;  %v11913_v49 = vld [vmem:[%s17113_s0 + $0x328] sm:$0xf] }
 0x238   :  { %v9739_v25 = vcombine.low %v7014_v32, %v7024_v9  ;;  %v7657_v60 = vrot.slane %v7655_v22, 4  ;;  %v7658_v8 = vrot.slane %v11906_v13, 5  ;;  %v7662_v35 = vrot.slane %v11907_v2, 5  ;;  %v11914_v32 = vld [vmem:[%s17113_s0 + $0x234] sm:$0xf] }
 0x239   :  { %v9740_v53 = vcombine.low %v7038_v3, %v7048_v54  ;;  %v7067_v29 = vrot.slane %v7066_v51, 4  ;;  %v7071_v7 = vrot.slane %v7069_v17, 5  ;;  %v7669_v16 = vrot.slane %v11908_v19, 5  ;;  %v11915_v9 = vld [vmem:[%s17113_s0 + $0x238] sm:$0xf] }
 0x23a   :  { %v15779_v18 = vrot.slane %v3885_v43, 4  ;;  %v15781_v44 = vrot.slane %v3888_v4, 5  ;;  %v15783_v55 = vrot.slane %v3894_v41, 5  ;;  %v15785_v46 = vrot.slane %v3898_v24, 4  ;;  %10711 = vmatmul.mubr.msk.bf16.gmra.mrb[24].mxu1 %vm1022_vm4, %v9339_v12  ;;  %v11912_v4 = vld [vmem:[%s17113_s0 + $0x320] sm:$0x1] }
 0x23b   :  { %v15787_v38 = vrot.slane %v3904_v40, 5  ;;  %v7062_v61 = vsel %vm12191_vm3, %v7057_v58, %v15715_v34  ;;  %v15794_v20 = vsel %vm12674_vm7, %v9774_v50, %v7655_v22  ;;  %v9775_v47 = vrot.slane %v11909_v52, 9  ;;  %11007 = vmatmul.mubr.msk.bf16.gmra.mrb[56].mxu0 %vm1022_vm4, %v9739_v25  ;;  %v11910_v34 = vld [vmem:[%s17113_s0 + $0x314] sm:$0x1]  ;;  %10714 = vmatprep.mubr.msk.bf16.mxu1 %vm1022_vm4, %v9340_v36  ;;  %v15830_v17 = vld [vmem:[%s17113_s0 + $0x240] sm:$0xf] }
 0x23c   :  { %v15803_v30 = vsel %vm12674_vm7, %v7657_v60, %v7658_v8  ;;  %v7664_v48 = vrot.slane %v7662_v35, 4  ;;  %v7665_v23 = vrot.slane %v11910_v34, 5  ;;  %v9776_v37 = vrot.slane %v11911_v45, 9  ;;  %11010 = vmatprep.mubr.msk.bf16.mxu0 %vm1022_vm4, %v9740_v53  ;;  %v15835_v24 = vld [vmem:[%s17113_s0 + $0x244] sm:$0xf] }
 0x23d   :  { %v7072_v0 = vsel %vm12191_vm3, %v7067_v29, %v7071_v7  ;;  %v7671_v43 = vrot.slane %v7669_v16, 4  ;;  %v7672_v41 = vrot.slane %v11912_v4, 5  ;;  %v7676_v22 = vrot.slane %v11913_v49, 5  ;;  %v11918_v40 = vld [vmem:[%s17113_s0 + $0x334] sm:$0xf] }
 0x23e   :  { %v9341_v51 = vcombine.low %v11914_v32, %v11915_v9  ;;  %v9342_v27 = vcombine.low %v15830_v17, %v15835_v24  ;;  %v7683_v3 = vrot.slane %v11918_v40, 5  ;;  %v11919_v54 = vld [vmem:[%s17113_s0 + $0x340] sm:$0xf]  ;;  %v9806_v5 = vcombine.low %v15794_v20, %v15803_v30  ;;  %v11920_v63 = vld [vmem:[%s17113_s0 + $0x324] sm:$0xf] }
 0x23f   :  { %v7690_v57 = vrot.slane %v11919_v54, 5  ;;  %v9343_v12 = vcombine.low %v15723_v59, %v15730_v33  ;;  %v15851_v21 = vsel %vm12674_vm7, %v9775_v47, %v7662_v35  ;;  %v9777_v36 = vrot.slane %v11920_v63, 9  ;;  %v11921_v25 = vld [vmem:[%s17113_s0 + $0x32c] sm:$0x1]  ;;  %v11922_v2 = vld [vmem:[%s17113_s0 + $0x330] sm:$0xf] }
 0x240   :  { %v9741_v58 = vcombine.low %v7062_v61, %v7072_v0  ;;  %v15858_v1 = vsel %vm12674_vm7, %v7664_v48, %v7665_v23  ;;  %v15862_v50 = vsel %vm12674_vm7, %v9776_v37, %v7669_v16  ;;  %v7679_v60 = vrot.slane %v11921_v25, 5  ;;  %v11923_v53 = vld [vmem:[%s17113_s0 + $0x338] sm:$0x1]  ;;  %v11924_v19 = vld [vmem:[%s17113_s0 + $0x33c] sm:$0xf] }
 0x241   :  { %v15869_v13 = vsel %vm12674_vm7, %v7671_v43, %v7672_v41  ;;  %v7678_v8 = vrot.slane %v7676_v22, 4  ;;  %v9778_v35 = vrot.slane %v11922_v2, 9  ;;  %v7686_v29 = vrot.slane %v11923_v53, 5  ;;  %v11925_v20 = vld [vmem:[%s17113_s0 + $0x344] sm:$0x1] }
 0x242   :  { %v7685_v7 = vrot.slane %v7683_v3, 4  ;;  %v9779_v16 = vrot.slane %v11924_v19, 9  ;;  %v7692_v61 = vrot.slane %v7690_v57, 4  ;;  %v7693_v52 = vrot.slane %v11925_v20, 5  ;;  %v15886_v47 = vld [vmem:[%s17113_s0 + $0x258] sm:$0xf]  ;;  %10715 = vmatmul.mubr.msk.bf16.gmra.mrb[28].mxu1 %vm1022_vm4, %v9341_v51 }
 0x243   :  { %v15891_v30 = vld [vmem:[%s17113_s0 + $0x25c] sm:$0xf]  ;;  %v15898_v34 = vld [vmem:[%s17113_s0 + $0x264] sm:$0xf]  ;;  %v15903_v23 = vld [vmem:[%s17113_s0 + $0x268] sm:$0xf]  ;;  %11011 = vmatmul.mubr.msk.bf16.gmra.mrb[60].mxu0 %vm1022_vm4, %v9741_v58  ;;  %v9807_v41 = vcombine.low %v15851_v21, %v15858_v1  ;;  %v9808_v49 = vcombine.low %v15862_v50, %v15869_v13  ;;  %10718 = vmatprep.mubr.msk.bf16.mxu1 %vm1022_vm4, %v9342_v27  ;;  %v15938_v21 = vsel %vm12674_vm7, %v9777_v36, %v7676_v22 }
 0x244   :  { %v9344_v48 = vcombine.low %v15886_v47, %v15891_v30  ;;  %v11930_v37 = vld [vmem:[%s17113_s0 + $0x34c] sm:$0xf]  ;;  %v11931_v43 = vld [vmem:[%s17113_s0 + $0x358] sm:$0xf]  ;;  %v15922_v32 = vld [vmem:[%s17113_s0 + $0x270] sm:$0xf]  ;;  %11016 = vmatprep.mubr.msk.bf16.mxu0 %vm1022_vm4, %v9806_v5  ;;  %v15942_v63 = vsel %vm12674_vm7, %v7678_v8, %v7679_v60  ;;  %v15946_v58 = vsel %vm12674_vm7, %v9778_v35, %v7683_v3  ;;  %v15953_v27 = vsel %vm12674_vm7, %v7685_v7, %v7686_v29 }
 0x245   :  { %v7697_v0 = vrot.slane %v11930_v37, 5  ;;  %v7704_v4 = vrot.slane %v11931_v43, 5  ;;  %v15927_v9 = vld [vmem:[%s17113_s0 + $0x274] sm:$0xf]  ;;  %v11934_v40 = vld [vmem:[%s17113_s0 + $0x364] sm:$0xf]  ;;  %v15957_v22 = vsel %vm12674_vm7, %v9779_v16, %v7690_v57  ;;  %v15961_v5 = vsel %vm12674_vm7, %v7692_v61, %v7693_v52 }
 0x246   :  { %v7711_v54 = vrot.slane %v11934_v40, 5  ;;  %v11935_v1 = vld [vmem:[%s17113_s0 + $0x348] sm:$0xf]  ;;  %v11936_v3 = vld [vmem:[%s17113_s0 + $0x350] sm:$0x1] }
 0x247   :  { %v9780_v50 = vrot.slane %v11935_v1, 9  ;;  %v7700_v36 = vrot.slane %v11936_v3, 5  ;;  %v7699_v25 = vrot.slane %v7697_v0, 4  ;;  %v11937_v60 = vld [vmem:[%s17113_s0 + $0x354] sm:$0xf]  ;;  %v7706_v8 = vrot.slane %v7704_v4, 4 }
 0x248   :  { %v9781_v13 = vrot.slane %v11937_v60, 9  ;;  %v11938_v57 = vld [vmem:[%s17113_s0 + $0x35c] sm:$0x1]  ;;  %v11939_v35 = vld [vmem:[%s17113_s0 + $0x360] sm:$0xf]  ;;  %v7713_v29 = vrot.slane %v7711_v54, 4 }
 0x249   :  { %v7707_v2 = vrot.slane %v11938_v57, 5  ;;  %v9782_v53 = vrot.slane %v11939_v35, 9  ;;  %v11940_v7 = vld [vmem:[%s17113_s0 + $0x368] sm:$0x1]  ;;  %v11941_v16 = vld [vmem:[%s17113_s0 + $0x370] sm:$0xf]  ;;  %v16013_v35 = vsel %vm12674_vm7, %v9780_v50, %v7697_v0  ;;  %v16032_v0 = vsel %vm12674_vm7, %v7699_v25, %v7700_v36 }
 0x24a   :  { %v7714_v19 = vrot.slane %v11940_v7, 5  ;;  %v7718_v61 = vrot.slane %v11941_v16, 5  ;;  %v15988_v37 = vld [vmem:[%s17113_s0 + $0x280] sm:$0xf]  ;;  %v15993_v43 = vld [vmem:[%s17113_s0 + $0x27c] sm:$0xf]  ;;  %v16036_v50 = vsel %vm12674_vm7, %v9781_v13, %v7704_v4  ;;  %10719 = vmatmul.mubr.msk.bf16.gmra.mrb[32].mxu1 %vm1022_vm4, %v9343_v12 }
 0x24b   :  { %v16000_v1 = vld [vmem:[%s17113_s0 + $0x28c] sm:$0xf]  ;;  %v16005_v3 = vld [vmem:[%s17113_s0 + $0x288] sm:$0xf]  ;;  %v16018_v7 = vld [vmem:[%s17113_s0 + $0x298] sm:$0xf]  ;;  %v16040_v52 = vsel %vm12674_vm7, %v7706_v8, %v7707_v2  ;;  %11017 = vmatmul.mubr.msk.bf16.vlgmr.msra.gmra.mrb[0].mxu0 %vm1022_vm4, %v9807_v41  ;;  %v16052_v4 = vsel %vm12674_vm7, %v9782_v53, %v7711_v54  ;;  %10722 = vmatprep.mubr.msk.bf16.mxu1 %vm1022_vm4, %v9344_v48 }
 0x24c   :  { %v16023_v16 = vld [vmem:[%s17113_s0 + $0x294] sm:$0xf]  ;;  %v11948_v57 = vld [vmem:[%s17113_s0 + $0x37c] sm:$0xf]  ;;  %v11949_v60 = vld [vmem:[%s17113_s0 + $0x36c] sm:$0xf]  ;;  %v16056_v36 = vsel %vm12674_vm7, %v7713_v29, %v7714_v19  ;;  %11020 = vmatprep.mubr.msk.bf16.mxu0 %vm1022_vm4, %v9808_v49 }
 0x24d   :  { %v7725_v40 = vrot.slane %v11948_v57, 5  ;;  %v9783_v51 = vrot.slane %v11949_v60, 9  ;;  %v7720_v25 = vrot.slane %v7718_v61, 4  ;;  %v11950_v13 = vld [vmem:[%s17113_s0 + $0x374] sm:$0x1] }
 0x24e   :  { %v7721_v8 = vrot.slane %v11950_v13, 5  ;;  %v16069_v59 = vld [vmem:[%s17113_s0 + $0x2a4] sm:$0xf]  ;;  %v16074_v33 = vld [vmem:[%s17113_s0 + $0x2a0] sm:$0xf] }
 0x24f   :  { %v16081_v41 = vld [vmem:[%s17113_s0 + $0x2b0] sm:$0xf]  ;;  %v16086_v48 = vld [vmem:[%s17113_s0 + $0x2ac] sm:$0xf]  ;;  %v11955_v54 = vld [vmem:[%s17113_s0 + $0x378] sm:$0xf]  ;;  %v16110_v19 = vsel %vm12674_vm7, %v9783_v51, %v7718_v61 }
 0x250   :  { %17521 = vst [vmem:[#allocation20_spill] sm:$0xff] %v16081_v41  ;;  %17522 = vst [vmem:[#allocation15_spill] sm:$0xff] %v16086_v48  ;;  %v9784_v2 = vrot.slane %v11955_v54, 9  ;;  %v11956_v53 = vld [vmem:[%s17113_s0 + $0x388] sm:$0xf]  ;;  %v7727_v60 = vrot.slane %v7725_v40, 4 }
 0x251   :  { %v7732_v29 = vrot.slane %v11956_v53, 5  ;;  %v11957_v57 = vld [vmem:[%s17113_s0 + $0x380] sm:$0x1]  ;;  %v11958_v49 = vld [vmem:[%s17113_s0 + $0x394] sm:$0xf]  ;;  %v16126_v53 = vsel %vm12674_vm7, %v7720_v25, %v7721_v8  ;;  %v7746_v25 = vrot.slane %v15119_v6, 5 }
 0x252   :  { %v7728_v13 = vrot.slane %v11957_v57, 5  ;;  %v7739_v12 = vrot.slane %v11958_v49, 5  ;;  %v16115_v20 = vld [vmem:[%s17113_s0 + $0x2bc] sm:$0xf]  ;;  %v16120_v57 = vld [vmem:[%s17113_s0 + $0x2b8] sm:$0xf]  ;;  %v16146_v8 = vsel %vm12674_vm7, %v9784_v2, %v7725_v40 }
 0x253   :  { %17523 = vst [vmem:[#allocation17_spill] sm:$0xff] %v16115_v20  ;;  %17524 = vst [vmem:[#allocation19_spill] sm:$0xff] %v16120_v57  ;;  %v16131_v51 = vld [vmem:[%s17113_s0 + $0x2c8] sm:$0xf]  ;;  %v16136_v61 = vld [vmem:[%s17113_s0 + $0x2c4] sm:$0xf] }
 0x254   :  { %17525 = vst [vmem:[#allocation22_spill] sm:$0xff] %v16126_v53  ;;  %17526 = vst [vmem:[#allocation24_spill] sm:$0xff] %v16131_v51  ;;  %v11963_v49 = vld [vmem:[%s17113_s0 + $0x384] sm:$0xf]  ;;  %v7734_v20 = vrot.slane %v7732_v29, 4  ;;  %v16165_v40 = vsel %vm12674_vm7, %v7727_v60, %v7728_v13  ;;  %v7741_v51 = vrot.slane %v7739_v12, 4 }
 0x255   :  { %17527 = vst [vmem:[#allocation21_spill] sm:$0xff] %v16136_v61  ;;  %v9785_v45 = vrot.slane %v11963_v49, 9  ;;  %v11964_v57 = vld [vmem:[%s17113_s0 + $0x38c] sm:$0x1]  ;;  %v16154_v54 = vld [vmem:[%s17113_s0 + $0x2d4] sm:$0xf] }
 0x256   :  { %v7735_v41 = vrot.slane %v11964_v57, 5  ;;  %17528 = vst [vmem:[#allocation23_spill] sm:$0xff] %v16154_v54  ;;  %v16159_v49 = vld [vmem:[%s17113_s0 + $0x2d0] sm:$0xf]  ;;  %v11968_v61 = vld [vmem:[%s17113_s0 + $0x398] sm:$0x1] }
 0x257   :  { %17529 = vst [vmem:[#allocation26_spill] sm:$0xff] %v16159_v49  ;;  %v11967_v2 = vld [vmem:[%s17113_s0 + $0x390] sm:$0xf]  ;;  %v7742_v48 = vrot.slane %v11968_v61, 5  ;;  %v11969_v6 = vld [vmem:[%s17113_s0 + $0x3ac] sm:$0xf]  ;;  %v17531_v61 = vcombine.low %v15938_v21, %v15942_v63  ;;  %v16190_v42 = vsel %vm12674_vm7, %v9785_v45, %v7732_v29  ;;  %v17532_v21 = vcombine.low %v15922_v32, %v15927_v9 }
 0x258   :  { %v9786_v57 = vrot.slane %v11967_v2, 9  ;;  %v7753_v60 = vrot.slane %v11969_v6, 5  ;;  %v3861_v13 = vshrl.u32 %v15830_v17, 16  ;;  %v3864_v54 = vshll.u32 %v15830_v17, 16  ;;  %v11970_v6 = vld [vmem:[%s17113_s0 + $0x39c] sm:$0xf] }
 0x259   :  { %v17530_v2 = vcombine.low %v15898_v34, %v15903_v23  ;;  %11021 = vmatmul.mubr.msk.bf16.gmra.mrb[4].mxu0 %vm1022_vm4, %v17531_v61  ;;  %v9787_v49 = vrot.slane %v11970_v6, 9  ;;  %v7748_v17 = vrot.slane %v7746_v25, 4  ;;  %v11971_v53 = vld [vmem:[%s17113_s0 + $0x3a4] sm:$0x1]  ;;  %v17533_v45 = vcombine.low %v15946_v58, %v15953_v27  ;;  %v16225_v27 = vld [vmem:[%s17113_s0 + $0x2e0] sm:$0xf] }
 0x25a   :  { %v16210_v29 = vsel %vm12674_vm7, %v7734_v20, %v7735_v41  ;;  %v3870_v61 = vshll.u32 %v15835_v24, 16  ;;  %v16216_v6 = vsel %vm12674_vm7, %v9786_v57, %v7739_v12  ;;  %v16220_v58 = vsel %vm12674_vm7, %v7741_v51, %v7742_v48  ;;  %17534 = vst [vmem:[#allocation25_spill] sm:$0xff] %v16225_v27  ;;  %v16230_v20 = vld [vmem:[%s17113_s0 + $0x2dc] sm:$0xf]  ;;  %v11974_v12 = vld [vmem:[%s17113_s0 + $0x3a8] sm:$0xf] }
 0x25b   :  { %10723 = vmatmul.mubr.msk.bf16.gmra.mrb[36].mxu1 %vm1022_vm4, %v17530_v2  ;;  %v7749_v2 = vrot.slane %v11971_v53, 5  ;;  %11024 = vmatprep.mubr.msk.bf16.mxu0 %vm1022_vm4, %v17533_v45  ;;  %v3874_v53 = vshrl.u32 %v15835_v24, 16  ;;  %v9788_v41 = vrot.slane %v11974_v12, 9  ;;  %v7755_v48 = vrot.slane %v7753_v60, 4  ;;  %v16252_v12 = vld [vmem:[%s17113_s0 + $0x2ec] sm:$0xf] }
 0x25c   :  { %10726 = vmatprep.mubr.msk.bf16.mxu1 %vm1022_vm4, %v17532_v21  ;;  %v7756_v51 = vrot.slane %v15178_v15, 5  ;;  %v3863_v57 = vrot.slane %v3861_v13, 4  ;;  %v3866_v21 = vrot.slane %v3864_v54, 5  ;;  %v16242_v63 = vsel %vm12674_vm7, %v9787_v49, %v7746_v25  ;;  %17535 = vst [vmem:[#allocation27_spill] sm:$0xff] %v16252_v12  ;;  %v16257_v15 = vld [vmem:[%s17113_s0 + $0x2e8] sm:$0xf] }
 0x25d   :  { %v16246_v24 = vsel %vm12674_vm7, %v7748_v17, %v7749_v2  ;;  %v7760_v27 = vrot.slane %v15214_v62, 5  ;;  %v16261_v25 = vrot.slane %v3870_v61, 5  ;;  %v3876_v49 = vrot.slane %v3874_v53, 4  ;;  %v16273_v2 = vld [vmem:[%s17113_s0 + $0x2f8] sm:$0xf] }
 0x25e   :  { %v7767_v13 = vrot.slane %v15228_v31, 5  ;;  %v16268_v17 = vsel %vm12674_vm7, %v9788_v41, %v7753_v60  ;;  %17536 = vst [vmem:[#allocation28_spill] sm:$0xff] %v16273_v2  ;;  %v16278_v61 = vld [vmem:[%s17113_s0 + $0x2f4] sm:$0xf]  ;;  %v16289_v41 = vsel %vm12674_vm7, %v7755_v48, %v7756_v51  ;;  %v7763_v62 = vrot.slane %v15242_v39, 5 }
 0x25f   :  { %17537 = vst [vmem:[#allocation30_spill] sm:$0xff] %v16278_v61  ;;  %v11979_v53 = vld [vmem:[%s17113_s0 + $0x3b4] sm:$0xf]  ;;  %v3867_v45 = vor.u32 %v3866_v21, %v3863_v57  ;;  %v17538_v12 = vcombine.low %v15993_v43, %v15988_v37  ;;  %v17539_v31 = vcombine.low %v15957_v22, %v15961_v5  ;;  %v11980_v60 = vld [vmem:[%s17113_s0 + $0x248] sm:$0x1]  ;;  %v3909_v51 = vshrl.u32 %v15886_v47, 16 }
 0x260   :  { %v9789_v54 = vrot.slane %v11979_v53, 9  ;;  %v7762_v53 = vrot.slane %v7760_v27, 4  ;;  %v3880_v48 = vshll.u32 %v11980_v60, 16  ;;  %v3912_v39 = vshll.u32 %v15886_v47, 16  ;;  %v11981_v21 = vld [vmem:[%s17113_s0 + $0x3c0] sm:$0xf] }
 0x261   :  { %11025 = vmatmul.mubr.msk.bf16.gmra.mrb[8].mxu0 %vm1022_vm4, %v17539_v31  ;;  %v17540_v57 = vcombine.low %v16005_v3, %v16000_v1  ;;  %v17541_v22 = vcombine.low %v16013_v35, %v16032_v0  ;;  %v3877_v5 = vor.u32 %v3876_v49, %v16261_v25  ;;  %v7769_v31 = vrot.slane %v7767_v13, 4 }
 0x262   :  { %v7770_v47 = vrot.slane %v15272_v26, 5  ;;  %v3901_v35 = vor.u32 %v15785_v46, %v15783_v55  ;;  %v7774_v0 = vrot.slane %v15285_v14, 5  ;;  %v16327_v49 = vsel %vm12674_vm7, %v9789_v54, %v7760_v27 }
 0x263   :  { %10727 = vmatmul.mubr.msk.bf16.gmra.mrb[40].mxu1 %vm1022_vm4, %v17538_v12  ;;  %11028 = vmatprep.mubr.msk.bf16.mxu0 %vm1022_vm4, %v17541_v22  ;;  %v9790_v12 = vrot.slane %v11981_v21, 9  ;;  %v3868_v22 = vrot.slane %v3867_v45, 4  ;;  %v3918_v21 = vshll.u32 %v15891_v30, 16  ;;  %v3922_v26 = vshrl.u32 %v15891_v30, 16  ;;  %v11982_v30 = vld [vmem:[%s17113_s0 + $0x3cc] sm:$0xf] }
 0x264   :  { %10730 = vmatprep.mubr.msk.bf16.mxu1 %vm1022_vm4, %v17540_v57  ;;  %v3891_v57 = vor.u32 %v15781_v44, %v15779_v18  ;;  %v16333_v60 = vsel %vm12674_vm7, %v7762_v53, %v7763_v62  ;;  %v3882_v2 = vrot.slane %v3880_v48, 5  ;;  %v3911_v18 = vrot.slane %v3909_v51, 4 }
 0x265   :  { %v3914_v44 = vrot.slane %v3912_v39, 5  ;;  %v3878_v61 = vrot.slane %v3877_v5, 4  ;;  %v16337_v14 = vsel %vm12674_vm7, %v9790_v12, %v7767_v13  ;;  %v16341_v46 = vsel %vm12674_vm7, %v7769_v31, %v7770_v47 }
 0x266   :  { %v9791_v27 = vrot.slane %v11982_v30, 9  ;;  %v3892_v45 = vrot.slane %v3891_v57, 4  ;;  %v3902_v54 = vrot.slane %v3901_v35, 4  ;;  %v7776_v62 = vrot.slane %v7774_v0, 4 }
 0x267   :  { %v7777_v53 = vrot.slane %v15320_v10, 5  ;;  %v3873_v13 = vsel %vm12191_vm3, %v3868_v22, %v16261_v25  ;;  %v16352_v51 = vrot.slane %v3918_v21, 5  ;;  %v3924_v39 = vrot.slane %v3922_v26, 4  ;;  %v17546_v26 = vld [vmem:[#allocation13_spill] sm:$0xff] }
 0x268   :  { %v17542_v5 = vcombine.low %v16023_v16, %v16018_v7  ;;  %v17543_v12 = vcombine.low %v16036_v50, %v16040_v52  ;;  %v3915_v10 = vor.u32 %v3914_v44, %v3911_v18  ;;  %v7781_v31 = vrot.slane %v15306_v11, 5  ;;  %v17571_v11 = vld [vmem:[#allocation28_spill] sm:$0xff] }
 0x269   :  { %v3933_v47 = vshrl.u32 %v15898_v34, 16  ;;  %v3936_v25 = vshll.u32 %v15898_v34, 16  ;;  %v17544_v57 = vcombine.low %v16074_v33, %v16069_v59  ;;  %v17545_v35 = vcombine.low %v16052_v4, %v16056_v36 }
 0x26a   :  { %11029 = vmatmul.mubr.msk.bf16.gmra.mrb[12].mxu0 %vm1022_vm4, %v17543_v12  ;;  %v3883_v52 = vsel %vm12191_vm3, %v3878_v61, %v3882_v2  ;;  %v3942_v50 = vshll.u32 %v15903_v23, 16  ;;  %v3946_v34 = vshrl.u32 %v15903_v23, 16  ;;  %v3897_v22 = vsel %vm12191_vm3, %v3892_v45, %v15783_v55  ;;  %v11983_v23 = vld [vmem:[%s17113_s0 + $0x260] sm:$0x1]  ;;  %v11984_v55 = vld [vmem:[%s17113_s0 + $0x3d8] sm:$0xf] }
 0x26b   :  { %10731 = vmatmul.mubr.msk.bf16.gmra.mrb[44].mxu1 %vm1022_vm4, %v17542_v5  ;;  %11032 = vmatprep.mubr.msk.bf16.mxu0 %vm1022_vm4, %v17545_v35  ;;  %v3907_v4 = vsel %vm12191_vm3, %v3902_v54, %v15787_v38  ;;  %v16387_v36 = vsel %vm12674_vm7, %v9791_v27, %v7774_v0  ;;  %v16391_v2 = vsel %vm12674_vm7, %v7776_v62, %v7777_v53  ;;  %v3928_v21 = vshll.u32 %v11983_v23, 16  ;;  %v17547_v35 = vld [vmem:[#allocation15_spill] sm:$0xff] }
 0x26c   :  { %10734 = vmatprep.mubr.msk.bf16.mxu1 %vm1022_vm4, %v17544_v57  ;;  %v3925_v61 = vor.u32 %v3924_v39, %v16352_v51  ;;  %v9792_v38 = vrot.slane %v11984_v55, 9  ;;  %v7784_v18 = vrot.slane %v17546_v26, 5  ;;  %v3916_v0 = vrot.slane %v3915_v10, 4  ;;  %v17552_v23 = vld [vmem:[#allocation19_spill] sm:$0xff]  ;;  %v17556_v10 = vld [vmem:[#allocation21_spill] sm:$0xff] }
 0x26d   :  { %v7783_v44 = vrot.slane %v7781_v31, 4  ;;  %v3935_v30 = vrot.slane %v3933_v47, 4  ;;  %v3938_v27 = vrot.slane %v3936_v25, 5  ;;  %v16401_v45 = vcombine.low %v3873_v13, %v3883_v52  ;;  %v17548_v52 = vld [vmem:[#allocation20_spill] sm:$0xff] }
 0x26e   :  { %v16403_v54 = vcombine.low %v3897_v22, %v3907_v4  ;;  %v16405_v62 = vrot.slane %v3942_v50, 5  ;;  %v3948_v53 = vrot.slane %v3946_v34, 4  ;;  %v3957_v39 = vshrl.u32 %v15922_v32, 16  ;;  %v11985_v4 = vld [vmem:[%s17113_s0 + $0x26c] sm:$0x1] }
 0x26f   :  { %v3960_v5 = vshll.u32 %v15922_v32, 16  ;;  %v3966_v12 = vshll.u32 %v15927_v9, 16  ;;  %v3970_v57 = vshrl.u32 %v15927_v9, 16  ;;  %v3926_v47 = vrot.slane %v3925_v61, 4  ;;  %v17550_v32 = vld [vmem:[#allocation22_spill] sm:$0xff] }
 0x270   :  { %v3930_v25 = vrot.slane %v3928_v21, 5  ;;  %v16415_v13 = vsel %vm12674_vm7, %v9792_v38, %v7781_v31  ;;  %v17549_v50 = vcombine.low %v17547_v35, %v17548_v52  ;;  %v17551_v34 = vcombine.low %v16110_v19, %v17550_v32  ;;  %v17553_v21 = vld [vmem:[#allocation17_spill] sm:$0xff] }
 0x271   :  { %v3921_v9 = vsel %vm12191_vm3, %v3916_v0, %v16352_v51  ;;  %v16430_v22 = vsel %vm12674_vm7, %v7783_v44, %v7784_v18  ;;  %v3939_v31 = vor.u32 %v3938_v27, %v3935_v30  ;;  %v3952_v61 = vshll.u32 %v11985_v4, 16  ;;  %v11986_v38 = vld [vmem:[%s17113_s0 + $0x3e8] sm:$0xf] }
 0x272   :  { %11033 = vmatmul.mubr.msk.bf16.gmra.mrb[16].mxu0 %vm1022_vm4, %v17551_v34  ;;  %v17554_v55 = vcombine.low %v17552_v23, %v17553_v21  ;;  %v17555_v19 = vcombine.low %v16146_v8, %v16165_v40  ;;  %v3949_v51 = vor.u32 %v3948_v53, %v16405_v62  ;;  %v7788_v26 = vrot.slane %v11986_v38, 5  ;;  %v11987_v40 = vld [vmem:[%s17113_s0 + $0x3e4] sm:$0xf]  ;;  %v17557_v38 = vld [vmem:[#allocation24_spill] sm:$0xff] }
 0x273   :  { %10735 = vmatmul.mubr.msk.bf16.gmra.mrb[48].mxu1 %vm1022_vm4, %v17549_v50  ;;  %v3981_v18 = vshrl.u32 %v15993_v43, 16  ;;  %v3984_v0 = vshll.u32 %v15993_v43, 16  ;;  %v3959_v44 = vrot.slane %v3957_v39, 4  ;;  %v3962_v30 = vrot.slane %v3960_v5, 5  ;;  %v11988_v43 = vld [vmem:[%s17113_s0 + $0x3ec] sm:$0x1] }
 0x274   :  { %10738 = vmatprep.mubr.msk.bf16.mxu1 %vm1022_vm4, %v17554_v55  ;;  %11036 = vmatprep.mubr.msk.bf16.mxu0 %vm1022_vm4, %v17555_v19  ;;  %v16449_v27 = vrot.slane %v3966_v12, 5  ;;  %v3972_v50 = vrot.slane %v3970_v57, 4  ;;  %v3931_v8 = vsel %vm12191_vm3, %v3926_v47, %v3930_v25  ;;  %v9793_v53 = vrot.slane %v11987_v40, 9  ;;  %v11989_v5 = vld [vmem:[%s17113_s0 + $0x3f4] sm:$0xf] }
 0x275   :  { %v3990_v32 = vshll.u32 %v15988_v37, 16  ;;  %v3994_v34 = vshrl.u32 %v15988_v37, 16  ;;  %v3940_v4 = vrot.slane %v3939_v31, 4  ;;  %v3954_v55 = vrot.slane %v3952_v61, 5  ;;  %v11990_v61 = vld [vmem:[%s17113_s0 + $0x278] sm:$0x1] }
 0x276   :  { %v7791_v39 = vrot.slane %v11988_v43, 5  ;;  %v7795_v12 = vrot.slane %v11989_v5, 5  ;;  %v3950_v57 = vrot.slane %v3949_v51, 4  ;;  %v7790_v47 = vrot.slane %v7788_v26, 4  ;;  %v11991_v51 = vld [vmem:[%s17113_s0 + $0x3f0] sm:$0xf] }
 0x277   :  { %v3983_v25 = vrot.slane %v3981_v18, 4  ;;  %v3986_v19 = vrot.slane %v3984_v0, 5  ;;  %v3963_v37 = vor.u32 %v3962_v30, %v3959_v44  ;;  %v3973_v31 = vor.u32 %v3972_v50, %v16449_v27 }
 0x278   :  { %v3976_v40 = vshll.u32 %v11990_v61, 16  ;;  %v16470_v43 = vcombine.low %v3921_v9, %v3931_v8  ;;  %v9794_v5 = vrot.slane %v11991_v51, 9  ;;  %v16475_v18 = vrot.slane %v3990_v32, 5  ;;  %v11992_v32 = vld [vmem:[%s17113_s0 + $0x3f8] sm:$0x1]  ;;  %v17560_v61 = vld [vmem:[#allocation26_spill] sm:$0xff] }
 0x279   :  { %v3996_v0 = vrot.slane %v3994_v34, 4  ;;  %v17558_v44 = vcombine.low %v17556_v10, %v17557_v38  ;;  %v17559_v30 = vcombine.low %v16190_v42, %v16210_v29  ;;  %v3945_v9 = vsel %vm12191_vm3, %v3940_v4, %v16405_v62  ;;  %v17561_v51 = vld [vmem:[#allocation23_spill] sm:$0xff] }
 0x27a   :  { %v16490_v50 = vsel %vm12674_vm7, %v9793_v53, %v7788_v26  ;;  %v7797_v8 = vrot.slane %v7795_v12, 4  ;;  %v7798_v34 = vrot.slane %v11992_v32, 5  ;;  %v17563_v42 = vcombine.low %v16216_v6, %v16220_v58  ;;  %v11993_v32 = vld [vmem:[%s17113_s0 + $0x400] sm:$0xf] }
 0x27b   :  { %10739 = vmatmul.mubr.msk.bf16.gmra.mrb[52].mxu1 %vm1022_vm4, %v17558_v44  ;;  %11037 = vmatmul.mubr.msk.bf16.gmra.mrb[20].mxu0 %vm1022_vm4, %v17559_v30  ;;  %v17562_v44 = vcombine.low %v17560_v61, %v17561_v51  ;;  %v3955_v29 = vsel %vm12191_vm3, %v3950_v57, %v3954_v55  ;;  %v16507_v62 = vsel %vm12674_vm7, %v7790_v47, %v7791_v39  ;;  %v3964_v53 = vrot.slane %v3963_v37, 4  ;;  %v11994_v55 = vld [vmem:[%s17113_s0 + $0x284] sm:$0x1] }
 0x27c   :  { %11040 = vmatprep.mubr.msk.bf16.mxu0 %vm1022_vm4, %v17563_v42  ;;  %v3987_v26 = vor.u32 %v3986_v19, %v3983_v25  ;;  %v3974_v4 = vrot.slane %v3973_v31, 4  ;;  %v3978_v30 = vrot.slane %v3976_v40, 5  ;;  %v16514_v6 = vsel %vm12674_vm7, %v9794_v5, %v7795_v12  ;;  %v11995_v5 = vld [vmem:[%s17113_s0 + $0x3fc] sm:$0xf]  ;;  %v17570_v31 = vld [vmem:[#allocation30_spill] sm:$0xff] }
 0x27d   :  { %10742 = vmatprep.mubr.msk.bf16.mxu1 %vm1022_vm4, %v17562_v44  ;;  %v7802_v44 = vrot.slane %v11993_v32, 5  ;;  %v3997_v58 = vor.u32 %v3996_v0, %v16475_v18  ;;  %v4000_v39 = vshll.u32 %v11994_v55, 16  ;;  %v4005_v57 = vshrl.u32 %v16005_v3, 16  ;;  %v17564_v55 = vld [vmem:[#allocation25_spill] sm:$0xff] }
 0x27e   :  { %v16523_v47 = vsel %vm12674_vm7, %v7797_v8, %v7798_v34  ;;  %v4008_v25 = vshll.u32 %v16005_v3, 16  ;;  %v4014_v19 = vshll.u32 %v16000_v1, 16  ;;  %v4018_v12 = vshrl.u32 %v16000_v1, 16  ;;  %v11996_v1 = vld [vmem:[%s17113_s0 + $0x404] sm:$0x1] }
 0x27f   :  { %v16528_v37 = vcombine.low %v3945_v9, %v3955_v29  ;;  %v3988_v40 = vrot.slane %v3987_v26, 4  ;;  %v9795_v0 = vrot.slane %v11995_v5, 9  ;;  %v3969_v8 = vsel %vm12191_vm3, %v3964_v53, %v16449_v27 }
 0x280   :  { %v3979_v3 = vsel %vm12191_vm3, %v3974_v4, %v3978_v30  ;;  %v7804_v34 = vrot.slane %v7802_v44, 4  ;;  %v7805_v9 = vrot.slane %v11996_v1, 5  ;;  %v3998_v29 = vrot.slane %v3997_v58, 4  ;;  %v11997_v58 = vld [vmem:[%s17113_s0 + $0x40c] sm:$0xf] }
 0x281   :  { %v4002_v26 = vrot.slane %v4000_v39, 5  ;;  %v4007_v32 = vrot.slane %v4005_v57, 4  ;;  %v17565_v5 = vcombine.low %v16230_v20, %v17564_v55  ;;  %v17566_v27 = vcombine.low %v16242_v63, %v16246_v24  ;;  %v17567_v57 = vld [vmem:[#allocation27_spill] sm:$0xff] }
 0x282   :  { %v4010_v53 = vrot.slane %v4008_v25, 5  ;;  %v16553_v4 = vrot.slane %v4014_v19, 5  ;;  %v4020_v30 = vrot.slane %v4018_v12, 4  ;;  %v7809_v39 = vrot.slane %v11997_v58, 5 }
 0x283   :  { %10743 = vmatmul.mubr.msk.bf16.gmra.mrb[56].mxu1 %vm1022_vm4, %v17565_v5  ;;  %11041 = vmatmul.mubr.msk.bf16.gmra.mrb[24].mxu0 %vm1022_vm4, %v17566_v27  ;;  %v17568_v1 = vcombine.low %v16257_v15, %v17567_v57  ;;  %v17569_v5 = vcombine.low %v16268_v17, %v16289_v41  ;;  %v16566_v63 = vcombine.low %v3969_v8, %v3979_v3  ;;  %v11998_v17 = vld [vmem:[%s17113_s0 + $0x290] sm:$0x1]  ;;  %v4029_v12 = vshrl.u32 %v16023_v16, 16 }
 0x284   :  { %v3993_v24 = vsel %vm12191_vm3, %v3988_v40, %v16475_v18  ;;  %v16573_v25 = vsel %vm12674_vm7, %v9795_v0, %v7802_v44  ;;  %v16577_v19 = vsel %vm12674_vm7, %v7804_v34, %v7805_v9  ;;  %v4024_v41 = vshll.u32 %v11998_v17, 16  ;;  %v11999_v44 = vld [vmem:[%s17113_s0 + $0x408] sm:$0xf] }
 0x285   :  { %10746 = vmatprep.mubr.msk.bf16.mxu1 %vm1022_vm4, %v17568_v1  ;;  %11044 = vmatprep.mubr.msk.bf16.mxu0 %vm1022_vm4, %v17569_v5  ;;  %v4032_v8 = vshll.u32 %v16023_v16, 16  ;;  %v4003_v18 = vsel %vm12191_vm3, %v3998_v29, %v4002_v26  ;;  %v9796_v40 = vrot.slane %v11999_v44, 9  ;;  %v4038_v0 = vshll.u32 %v16018_v7, 16  ;;  %v12000_v16 = vld [vmem:[%s17113_s0 + $0x410] sm:$0x1] }
 0x286   :  { %v4042_v3 = vshrl.u32 %v16018_v7, 16  ;;  %v4011_v34 = vor.u32 %v4010_v53, %v4007_v32  ;;  %v4021_v9 = vor.u32 %v4020_v30, %v16553_v4  ;;  %v7811_v27 = vrot.slane %v7809_v39, 4 }
 0x287   :  { %v7812_v58 = vrot.slane %v12000_v16, 5  ;;  %v4053_v29 = vshrl.u32 %v16074_v33, 16  ;;  %v4056_v26 = vshll.u32 %v16074_v33, 16  ;;  %v4062_v1 = vshll.u32 %v16069_v59, 16  ;;  %v12001_v16 = vld [vmem:[%s17113_s0 + $0x418] sm:$0xf] }
 0x288   :  { %v4066_v5 = vshrl.u32 %v16069_v59, 16  ;;  %v16599_v17 = vcombine.low %v3993_v24, %v4003_v18  ;;  %v9827_v7 = vcombine.low %v16573_v25, %v16577_v19  ;;  %v4031_v32 = vrot.slane %v4029_v12, 4 }
 0x289   :  { %v4034_v53 = vrot.slane %v4032_v8, 5  ;;  %v4026_v30 = vrot.slane %v4024_v41, 5  ;;  %v16603_v44 = vrot.slane %v4038_v0, 5  ;;  %v4044_v42 = vrot.slane %v4042_v3, 4 }
 0x28a   :  { %v7816_v33 = vrot.slane %v12001_v16, 5  ;;  %v17572_v48 = vcombine.low %v17570_v31, %v17571_v11  ;;  %v17573_v59 = vcombine.low %v16327_v49, %v16333_v60  ;;  %v4012_v24 = vrot.slane %v4011_v34, 4 }
 0x28b   :  { %v4022_v41 = vrot.slane %v4021_v9, 4  ;;  %v16618_v12 = vsel %vm12674_vm7, %v9796_v40, %v7809_v39  ;;  %v16622_v8 = vsel %vm12674_vm7, %v7811_v27, %v7812_v58  ;;  %v4055_v60 = vrot.slane %v4053_v29, 4  ;;  %v12002_v39 = vld [vmem:[%s17113_s0 + $0x29c] sm:$0x1] }
 0x28c   :  { %10747 = vmatmul.mubr.msk.bf16.gmra.mrb[60].mxu1 %vm1022_vm4, %v17572_v48  ;;  %11045 = vmatmul.mubr.msk.bf16.gmra.mrb[28].mxu0 %vm1022_vm4, %v17573_v59  ;;  %v17574_v48 = vcombine.low %v16337_v14, %v16341_v46  ;;  %v4058_v49 = vrot.slane %v4056_v26, 5  ;;  %v16630_v18 = vrot.slane %v4062_v1, 5  ;;  %v4068_v0 = vrot.slane %v4066_v5, 4  ;;  %v12003_v14 = vld [vmem:[%s17113_s0 + $0x414] sm:$0xf] }
 0x28d   :  { %10784 = vmatprep.mubr.msk.bf16.mxu1 %vm1022_vm4, %v16401_v45  ;;  %v4035_v3 = vor.u32 %v4034_v53, %v4031_v32  ;;  %v4048_v40 = vshll.u32 %v12002_v39, 16  ;;  %v4077_v34 = vshrl.u32 %v17547_v35, 16  ;;  %v4080_v45 = vshll.u32 %v17547_v35, 16  ;;  %v12004_v58 = vld [vmem:[%s17113_s0 + $0x41c] sm:$0x1] }
 0x28e   :  { %11048 = vmatprep.mubr.msk.bf16.mxu0 %vm1022_vm4, %v17574_v48  ;;  %v4045_v9 = vor.u32 %v4044_v42, %v16603_v44  ;;  %v9797_v46 = vrot.slane %v12003_v14, 9  ;;  %v7818_v27 = vrot.slane %v7816_v33, 4  ;;  %v7819_v29 = vrot.slane %v12004_v58, 5  ;;  %v12005_v35 = vld [vmem:[%s17113_s0 + $0x2a8] sm:$0x1] }
 0x28f   :  { %v4017_v26 = vsel %vm12191_vm3, %v4012_v24, %v16553_v4  ;;  %v4072_v42 = vshll.u32 %v12005_v35, 16  ;;  %v4086_v1 = vshll.u32 %v17548_v52, 16  ;;  %v4090_v5 = vshrl.u32 %v17548_v52, 16  ;;  %v12006_v59 = vld [vmem:[%s17113_s0 + $0x424] sm:$0xf] }
 0x290   :  { %v4027_v32 = vsel %vm12191_vm3, %v4022_v41, %v4026_v30  ;;  %v4059_v53 = vor.u32 %v4058_v49, %v4055_v60  ;;  %v4069_v16 = vor.u32 %v4068_v0, %v16630_v18  ;;  %v7823_v4 = vrot.slane %v12006_v59, 5  ;;  %v12007_v49 = vld [vmem:[%s17113_s0 + $0x420] sm:$0xf] }
 0x291   :  { %v9828_v24 = vcombine.low %v16618_v12, %v16622_v8  ;;  %v4036_v48 = vrot.slane %v4035_v3, 4  ;;  %v4079_v39 = vrot.slane %v4077_v34, 4  ;;  %v4082_v14 = vrot.slane %v4080_v45, 5  ;;  %v12008_v34 = vld [vmem:[%s17113_s0 + $0x428] sm:$0x1] }
 0x292   :  { %v4046_v58 = vrot.slane %v4045_v9, 4  ;;  %v4050_v35 = vrot.slane %v4048_v40, 5  ;;  %v16662_v52 = vsel %vm12674_vm7, %v9797_v46, %v7816_v33  ;;  %v16666_v30 = vsel %vm12674_vm7, %v7818_v27, %v7819_v29 }
 0x293   :  { %v17575_v41 = vcombine.low %v16387_v36, %v16391_v2  ;;  %v4074_v60 = vrot.slane %v4072_v42, 5  ;;  %v9798_v0 = vrot.slane %v12007_v49, 9  ;;  %v16677_v33 = vrot.slane %v4086_v1, 5 }
 0x294   :  { %10785 = vmatmul.mubr.msk.bf16.vlgmr.msra.gmra.mrb[32].mxu1 %vm1022_vm4, %v16403_v54  ;;  %v4092_v3 = vrot.slane %v4090_v5, 4  ;;  %v17576_v54 = vcombine.low %v16415_v13, %v16430_v22  ;;  %v4060_v36 = vrot.slane %v4059_v53, 4  ;;  %v4070_v2 = vrot.slane %v4069_v16, 4  ;;  %v12009_v13 = vld [vmem:[%s17113_s0 + $0x2b4] sm:$0x1] }
 0x295   :  { %11049 = vmatmul.mubr.msk.bf16.gmra.mrb[32].mxu0 %vm1022_vm4, %v17575_v41  ;;  %10788 = vmatprep.mubr.msk.bf16.mxu1 %vm1022_vm4, %v16470_v43  ;;  %v7825_v40 = vrot.slane %v7823_v4, 4  ;;  %v7826_v45 = vrot.slane %v12008_v34, 5  ;;  %v16688_v9 = vcombine.low %v4017_v26, %v4027_v32  ;;  %v4041_v46 = vsel %vm12191_vm3, %v4036_v48, %v16603_v44  ;;  %v12010_v32 = vld [vmem:[%s17113_s0 + $0x430] sm:$0xf] }
 0x296   :  { %11052 = vmatprep.mubr.msk.bf16.mxu0 %vm1022_vm4, %v17576_v54  ;;  %v4083_v43 = vor.u32 %v4082_v14, %v4079_v39  ;;  %v4096_v22 = vshll.u32 %v12009_v13, 16  ;;  %v4101_v27 = vshrl.u32 %v17552_v23, 16  ;;  %v4104_v29 = vshll.u32 %v17552_v23, 16  ;;  %v12011_v14 = vld [vmem:[%s17113_s0 + $0x42c] sm:$0xf] }
 0x297   :  { %v4110_v42 = vshll.u32 %v17553_v21, 16  ;;  %v4114_v1 = vshrl.u32 %v17553_v21, 16  ;;  %v4051_v26 = vsel %vm12191_vm3, %v4046_v58, %v4050_v35  ;;  %v9829_v44 = vcombine.low %v16662_v52, %v16666_v30  ;;  %v12012_v58 = vld [vmem:[%s17113_s0 + $0x434] sm:$0x1]  ;;  %v12014_v13 = vld [vmem:[%s17113_s0 + $0x43c] sm:$0xf] }
 0x298   :  { %v4093_v5 = vor.u32 %v4092_v3, %v16677_v33  ;;  %v7830_v53 = vrot.slane %v12010_v32, 5  ;;  %v4065_v23 = vsel %vm12191_vm3, %v4060_v36, %v16630_v18  ;;  %v4075_v21 = vsel %vm12191_vm3, %v4070_v2, %v4074_v60 }
 0x299   :  { %v16715_v16 = vsel %vm12674_vm7, %v9798_v0, %v7823_v4  ;;  %v16719_v59 = vsel %vm12674_vm7, %v7825_v40, %v7826_v45  ;;  %v16721_v48 = vrot.slane %v4083_v43, 4  ;;  %v16723_v39 = vrot.slane %v4096_v22, 5 }
 0x29a   :  { %v9799_v18 = vrot.slane %v12011_v14, 9  ;;  %v7833_v35 = vrot.slane %v12012_v58, 5  ;;  %v4103_v4 = vrot.slane %v4101_v27, 4  ;;  %v4106_v41 = vrot.slane %v4104_v29, 5 }
 0x29b   :  { %v16731_v60 = vrot.slane %v4110_v42, 5  ;;  %v4116_v49 = vrot.slane %v4114_v1, 4  ;;  %v17577_v0 = vcombine.low %v16490_v50, %v16507_v62  ;;  %v4094_v3 = vrot.slane %v4093_v5, 4 }
 0x29c   :  { %10789 = vmatmul.mubr.msk.bf16.gmra.mrb[36].mxu1 %vm1022_vm4, %v16528_v37  ;;  %v7832_v54 = vrot.slane %v7830_v53, 4  ;;  %v4125_v36 = vshrl.u32 %v17556_v10, 16  ;;  %v4128_v2 = vshll.u32 %v17556_v10, 16  ;;  %v17578_v40 = vcombine.low %v16514_v6, %v16523_v47  ;;  %v12013_v10 = vld [vmem:[%s17113_s0 + $0x2c0] sm:$0x1] }
 0x29d   :  { %11053 = vmatmul.mubr.msk.bf16.gmra.mrb[36].mxu0 %vm1022_vm4, %v17577_v0  ;;  %10792 = vmatprep.mubr.msk.bf16.mxu1 %vm1022_vm4, %v16566_v63  ;;  %v16747_v37 = vcombine.low %v4041_v46, %v4051_v26  ;;  %v16749_v34 = vcombine.low %v4065_v23, %v4075_v21  ;;  %v9830_v50 = vcombine.low %v16715_v16, %v16719_v59  ;;  %v4120_v63 = vshll.u32 %v12013_v10, 16 }
 0x29e   :  { %11056 = vmatprep.mubr.msk.bf16.mxu0 %vm1022_vm4, %v17578_v40  ;;  %v16755_v62 = vsel %vm12674_vm7, %v9799_v18, %v7830_v53  ;;  %v4134_v6 = vshll.u32 %v17557_v38, 16  ;;  %v4138_v47 = vshrl.u32 %v17557_v38, 16  ;;  %v4089_v45 = vsel %vm12191_vm3, %v16721_v48, %v16677_v33  ;;  %v12015_v53 = vld [vmem:[%s17113_s0 + $0x438] sm:$0xf]  ;;  %v12020_v40 = vld [vmem:[%s17113_s0 + $0x454] sm:$0xf] }
 0x29f   :  { %v4107_v46 = vor.u32 %v4106_v41, %v4103_v4  ;;  %v4117_v43 = vor.u32 %v4116_v49, %v16731_v60  ;;  %v7837_v22 = vrot.slane %v12014_v13, 5  ;;  %v4099_v27 = vsel %vm12191_vm3, %v4094_v3, %v16723_v39  ;;  %v12018_v41 = vld [vmem:[%s17113_s0 + $0x444] sm:$0xf] }
 0x2a0   :  { %v16775_v38 = vsel %vm12674_vm7, %v7832_v54, %v7833_v35  ;;  %v4127_v29 = vrot.slane %v4125_v36, 4  ;;  %v4130_v42 = vrot.slane %v4128_v2, 5  ;;  %v4149_v33 = vshrl.u32 %v17560_v61, 16  ;;  %v12017_v35 = vld [vmem:[%s17113_s0 + $0x2cc] sm:$0x1] }
 0x2a1   :  { %v4152_v1 = vshll.u32 %v17560_v61, 16  ;;  %v4158_v26 = vshll.u32 %v17561_v51, 16  ;;  %v4162_v5 = vshrl.u32 %v17561_v51, 16  ;;  %v16781_v32 = vrot.slane %v4120_v63, 5  ;;  %v12016_v61 = vld [vmem:[%s17113_s0 + $0x440] sm:$0x1] }
 0x2a2   :  { %v9800_v23 = vrot.slane %v12015_v53, 9  ;;  %v16786_v21 = vrot.slane %v4134_v6, 5  ;;  %v4140_v48 = vrot.slane %v4138_v47, 4  ;;  %v16788_v39 = vrot.slane %v4107_v46, 4 }
 0x2a3   :  { %v16790_v14 = vrot.slane %v4117_v43, 4  ;;  %v7839_v18 = vrot.slane %v7837_v22, 4  ;;  %v7840_v51 = vrot.slane %v12016_v61, 5  ;;  %v4131_v58 = vor.u32 %v4130_v42, %v4127_v29  ;;  %v12023_v42 = vld [vmem:[%s17113_s0 + $0x450] sm:$0xf] }
 0x2a4   :  { %10793 = vmatmul.mubr.msk.bf16.gmra.mrb[40].mxu1 %vm1022_vm4, %v16599_v17  ;;  %v4144_v4 = vshll.u32 %v12017_v35, 16  ;;  %v9801_v49 = vrot.slane %v12018_v41, 9  ;;  %v12019_v17 = vld [vmem:[%s17113_s0 + $0x448] sm:$0xf]  ;;  %v4151_v25 = vrot.slane %v4149_v33, 4  ;;  %v4154_v19 = vrot.slane %v4152_v1, 5 }
 0x2a5   :  { %11057 = vmatmul.mubr.msk.bf16.gmra.mrb[40].mxu0 %vm1022_vm4, %v9827_v7  ;;  %v7844_v0 = vrot.slane %v12019_v17, 5  ;;  %10796 = vmatprep.mubr.msk.bf16.mxu1 %vm1022_vm4, %v16688_v9  ;;  %v16816_v7 = vrot.slane %v4158_v26, 5  ;;  %v4164_v3 = vrot.slane %v4162_v5, 4  ;;  %v16818_v54 = vcombine.low %v4089_v45, %v4099_v27 }
 0x2a6   :  { %11060 = vmatprep.mubr.msk.bf16.mxu0 %vm1022_vm4, %v9828_v24  ;;  %v9831_v36 = vcombine.low %v16755_v62, %v16775_v38  ;;  %v16824_v2 = vsel %vm12674_vm7, %v9800_v23, %v7837_v22  ;;  %v4141_v9 = vor.u32 %v4140_v48, %v16786_v21  ;;  %v4113_v12 = vsel %vm12191_vm3, %v16788_v39, %v16731_v60  ;;  %v12021_v60 = vld [vmem:[%s17113_s0 + $0x44c] sm:$0x1]  ;;  %v12022_v22 = vld [vmem:[%s17113_s0 + $0x2d8] sm:$0x1] }
 0x2a7   :  { %v4123_v8 = vsel %vm12191_vm3, %v16790_v14, %v16781_v32  ;;  %v16837_v24 = vsel %vm12674_vm7, %v7839_v18, %v7840_v51  ;;  %v7851_v10 = vrot.slane %v12020_v40, 5  ;;  %v4132_v63 = vrot.slane %v4131_v58, 4  ;;  %v12024_v32 = vld [vmem:[%s17113_s0 + $0x458] sm:$0x1] }
 0x2a8   :  { %v4146_v6 = vrot.slane %v4144_v4, 5  ;;  %v16844_v47 = vsel %vm12674_vm7, %v9801_v49, %v7844_v0  ;;  %v7847_v45 = vrot.slane %v12021_v60, 5  ;;  %v7846_v46 = vrot.slane %v7844_v0, 4 }
 0x2a9   :  { %v4155_v43 = vor.u32 %v4154_v19, %v4151_v25  ;;  %v4165_v13 = vor.u32 %v4164_v3, %v16816_v7  ;;  %v4168_v27 = vshll.u32 %v12022_v22, 16  ;;  %v4142_v29 = vrot.slane %v4141_v9, 4  ;;  %v12025_v3 = vld [vmem:[%s17113_s0 + $0x2e4] sm:$0x1] }
 0x2aa   :  { %v9802_v33 = vrot.slane %v12023_v42, 9  ;;  %v4173_v1 = vshrl.u32 %v16230_v20, 16  ;;  %v4176_v26 = vshll.u32 %v16230_v20, 16  ;;  %v7853_v5 = vrot.slane %v7851_v10, 4  ;;  %v12030_v22 = vld [vmem:[%s17113_s0 + $0x464] sm:$0x1] }
 0x2ab   :  { %v7854_v53 = vrot.slane %v12024_v32, 5  ;;  %v4182_v23 = vshll.u32 %v17564_v55, 16  ;;  %v4186_v48 = vshrl.u32 %v17564_v55, 16  ;;  %v4197_v20 = vshrl.u32 %v16257_v15, 16  ;;  %v12032_v32 = vld [vmem:[%s17113_s0 + $0x470] sm:$0x1] }
 0x2ac   :  { %10797 = vmatmul.mubr.msk.bf16.gmra.mrb[44].mxu1 %vm1022_vm4, %v16747_v37  ;;  %v4200_v39 = vshll.u32 %v16257_v15, 16  ;;  %v4206_v14 = vshll.u32 %v17567_v57, 16  ;;  %v4210_v18 = vshrl.u32 %v17567_v57, 16  ;;  %v4137_v55 = vsel %vm12191_vm3, %v4132_v63, %v16786_v21 }
 0x2ad   :  { %11061 = vmatmul.mubr.msk.bf16.gmra.mrb[44].mxu0 %vm1022_vm4, %v9829_v44  ;;  %10800 = vmatprep.mubr.msk.bf16.mxu1 %vm1022_vm4, %v16749_v34  ;;  %v4156_v52 = vrot.slane %v4155_v43, 4  ;;  %v4166_v30 = vrot.slane %v4165_v13, 4  ;;  %v4170_v44 = vrot.slane %v4168_v27, 5  ;;  %v4147_v15 = vsel %vm12191_vm3, %v4142_v29, %v4146_v6  ;;  %v12029_v43 = vld [vmem:[%s17113_s0 + $0x45c] sm:$0xf] }
 0x2ae   :  { %11064 = vmatprep.mubr.msk.bf16.mxu0 %vm1022_vm4, %v9830_v50  ;;  %v16886_v57 = vsel %vm12674_vm7, %v7846_v46, %v7847_v45  ;;  %v4175_v37 = vrot.slane %v4173_v1, 4  ;;  %v4178_v34 = vrot.slane %v4176_v26, 5  ;;  %v16890_v16 = vsel %vm12674_vm7, %v9802_v33, %v7851_v10 }
 0x2af   :  { %v16894_v59 = vsel %vm12674_vm7, %v7853_v5, %v7854_v53  ;;  %v16896_v50 = vrot.slane %v4182_v23, 5  ;;  %v4188_v21 = vrot.slane %v4186_v48, 4  ;;  %v4199_v61 = vrot.slane %v4197_v20, 4 }
 0x2b0   :  { %v4202_v51 = vrot.slane %v4200_v39, 5  ;;  %v16898_v58 = vrot.slane %v4206_v14, 5  ;;  %v4212_v35 = vrot.slane %v4210_v18, 4  ;;  %v9416_v4 = vcombine.low %v4113_v12, %v4123_v8 }
 0x2b1   :  { %v9832_v41 = vcombine.low %v16824_v2, %v16837_v24  ;;  %v4161_v49 = vsel %vm12191_vm3, %v4156_v52, %v16816_v7  ;;  %v4171_v17 = vsel %vm12191_vm3, %v4166_v30, %v4170_v44  ;;  %v9417_v0 = vcombine.low %v4137_v55, %v4147_v15  ;;  %v12026_v7 = vld [vmem:[%s17113_s0 + $0x460] sm:$0xf]  ;;  %v12027_v24 = vld [vmem:[%s17113_s0 + $0x2f0] sm:$0x1] }
 0x2b2   :  { %v9833_v25 = vcombine.low %v16844_v47, %v16886_v57  ;;  %v4179_v19 = vor.u32 %v4178_v34, %v4175_v37  ;;  %v4192_v9 = vshll.u32 %v12025_v3, 16  ;;  %v9834_v2 = vcombine.low %v16890_v16, %v16894_v59  ;;  %v12028_v47 = vld [vmem:[%s17113_s0 + $0x46c] sm:$0xf]  ;;  %v12033_v57 = vld [vmem:[%s17113_s0 + $0x2fc] sm:$0x1] }
 0x2b3   :  { %v4189_v12 = vor.u32 %v4188_v21, %v16896_v50  ;;  %v7858_v8 = vrot.slane %v12026_v7, 5  ;;  %v4216_v40 = vshll.u32 %v12027_v24, 16  ;;  %v9418_v10 = vcombine.low %v4161_v49, %v4171_v17 }
 0x2b4   :  { %10801 = vmatmul.mubr.msk.bf16.gmra.mrb[48].mxu1 %vm1022_vm4, %v16818_v54  ;;  %v4203_v63 = vor.u32 %v4202_v51, %v4199_v61  ;;  %v4213_v6 = vor.u32 %v4212_v35, %v16898_v58  ;;  %v7865_v60 = vrot.slane %v12028_v47, 5  ;;  %v4221_v54 = vshrl.u32 %v17570_v31, 16 }
 0x2b5   :  { %11065 = vmatmul.mubr.msk.bf16.gmra.mrb[48].mxu0 %vm1022_vm4, %v9831_v36  ;;  %10804 = vmatprep.mubr.msk.bf16.mxu1 %vm1022_vm4, %v9416_v4  ;;  %v4224_v45 = vshll.u32 %v17570_v31, 16  ;;  %v4230_v62 = vshll.u32 %v17571_v11, 16  ;;  %v4234_v38 = vshrl.u32 %v17571_v11, 16  ;;  %v4180_v36 = vrot.slane %v4179_v19, 4  ;;  %v12031_v31 = vld [vmem:[%s17113_s0 + $0x468] sm:$0xf] }
 0x2b6   :  { %11068 = vmatprep.mubr.msk.bf16.mxu0 %vm1022_vm4, %v9832_v41  ;;  %v4194_v46 = vrot.slane %v4192_v9, 5  ;;  %v9803_v13 = vrot.slane %v12029_v43, 9  ;;  %v7861_v27 = vrot.slane %v12030_v22, 5  ;;  %v4190_v29 = vrot.slane %v4189_v12, 4  ;;  %v12035_v41 = vld [vmem:[%s17113_s0 + $0x474] sm:$0xf] }
 0x2b7   :  { %v7860_v42 = vrot.slane %v7858_v8, 4  ;;  %v4218_v33 = vrot.slane %v4216_v40, 5  ;;  %v9804_v11 = vrot.slane %v12031_v31, 9  ;;  %v4204_v1 = vrot.slane %v4203_v63, 4  ;;  %v12036_v19 = vld [vmem:[%s17113_s0 + $0x47c] sm:$0x1] }
 0x2b8   :  { %v4214_v26 = vrot.slane %v4213_v6, 4  ;;  %v7867_v5 = vrot.slane %v7865_v60, 4  ;;  %v7868_v53 = vrot.slane %v12032_v32, 5  ;;  %v4223_v23 = vrot.slane %v4221_v54, 4 }
 0x2b9   :  { %v4226_v48 = vrot.slane %v4224_v45, 5  ;;  %v4232_v20 = vrot.slane %v4230_v62, 5  ;;  %v4236_v39 = vrot.slane %v4234_v38, 4  ;;  %v4185_v14 = vsel %vm12191_vm3, %v4180_v36, %v16896_v50  ;;  %v12034_v50 = vld [vmem:[%s17113_s0 + $0x478] sm:$0xf]  ;;  %s12108_s0 = smov [#allocation2]  }
 0x2ba   :  { %v4195_v18 = vsel %vm12191_vm3, %v4190_v29, %v4194_v46  ;;  %v7859_v55 = vsel %vm12674_vm7, %v9803_v13, %v7858_v8  ;;  %v7862_v52 = vsel %vm12674_vm7, %v7860_v42, %v7861_v27  ;;  %v4209_v30 = vsel %vm12191_vm3, %v4204_v1, %v16898_v58  ;;  %s8962_s28 = sshll.u32 %s12108_s0, 4  ;;  %s8963_s28 = int_to_ptr.vmem [resolvable:$true] %s8962_s28 }
 0x2bb   :  { %v7866_v44 = vsel %vm12674_vm7, %v9804_v11, %v7865_v60  ;;  %v7869_v15 = vsel %vm12674_vm7, %v7867_v5, %v7868_v53  ;;  %v4240_v37 = vshll.u32 %v12033_v57, 16  ;;  %v4219_v34 = vsel %vm12191_vm3, %v4214_v26, %v4218_v33  ;;  %s12037_s29 = scalar_lea.vmem %s8963_s28, 4096  ;;  %p12042_p1 = scmp.lt.s32.totalorder %s8963_s28, %s8963_s28 }
 0x2bc   :  { %10805 = vmatmul.mubr.msk.bf16.gmra.mrb[52].mxu1 %vm1022_vm4, %v9417_v0  ;;  %v4227_v16 = vor.u32 %v4226_v48, %v4223_v23  ;;  %v4237_v59 = vor.u32 %v4236_v39, %v4232_v20  ;;  %v7872_v21 = vrot.slane %v12034_v50, 5  ;;  %v9419_v61 = vcombine.low %v4185_v14, %v4195_v18  ;;  %p12038_p0 = scmp.ne.s32.totalorder %s8963_s28, %s12037_s29  ;;  %p12043_p2 = scmp.lt.s32.totalorder %s12037_s29, %s12037_s29 }
 0x2bd   :  { %11069 = vmatmul.mubr.msk.bf16.gmra.mrb[52].mxu0 %vm1022_vm4, %v9833_v25  ;;  %10808 = vmatprep.mubr.msk.bf16.mxu1 %vm1022_vm4, %v9418_v10  ;;  %v9835_v51 = vcombine.low %v7859_v55, %v7862_v52  ;;  %v9420_v58 = vcombine.low %v4209_v30, %v4219_v34  ;;  %v9836_v35 = vcombine.low %v7866_v44, %v7869_v15  ;;  %v4242_v4 = vrot.slane %v4240_v37, 5 }
 0x2be   :  { %11072 = vmatprep.mubr.msk.bf16.mxu0 %vm1022_vm4, %v9834_v2  ;;  %v9805_v49 = vrot.slane %v12035_v41, 9  ;;  %v4228_v17 = vrot.slane %v4227_v16, 4  ;;  %v4238_v0 = vrot.slane %v4237_v59, 4  ;;  %v7874_v25 = vrot.slane %v7872_v21, 4  ;;  %p12044_p3 = por %p12043_p2, %p12042_p1 }
 0x2bf   :  { %v7875_v3 = vrot.slane %v12036_v19, 5  ;;  %v12107_v34 = vmov 0.0  }
 0x2c0   :  { %v7873_v9 = vsel %vm12674_vm7, %v9805_v49, %v7872_v21  ;;  %v4233_v2 = vsel %vm12191_vm3, %v4228_v17, %v4232_v20  ;;  %v4243_v12 = vsel %vm12191_vm3, %v4238_v0, %v4242_v4  ;;  %48 = vst [vmem:[#allocation4] sm:$0x1] %v12107_v34  ;;  %49 = vst [vmem:[#allocation6] sm:$0x1] %v12107_v34  ;;  %p12045_p4 = pnand %p12044_p3, %p12038_p0 }
 0x2c1   :  { %v7876_v7 = vsel %vm12674_vm7, %v7874_v25, %v7875_v3  ;;  %v9421_v8 = vcombine.low %v4233_v2, %v4243_v12 }
 0x2c2   :  { %v9837_v24 = vcombine.low %v7873_v9, %v7876_v7 }
 0x2c4   :  { %10809 = vmatmul.mubr.msk.bf16.gmra.mrb[56].mxu1 %vm1022_vm4, %v9419_v61 }
 0x2c5   :  { %11073 = vmatmul.mubr.msk.bf16.gmra.mrb[56].mxu0 %vm1022_vm4, %v9835_v51  ;;  %10812 = vmatprep.mubr.msk.bf16.mxu1 %vm1022_vm4, %v9420_v58 }
 0x2c6   :  { %11076 = vmatprep.mubr.msk.bf16.mxu0 %vm1022_vm4, %v9836_v35 }
 0x2cc   :  { %10813 = vmatmul.mubr.msk.bf16.gmra.mrb[60].mxu1 %vm1022_vm4, %v9421_v8 }
 0x2cd   :  { %11077 = vmatmul.mubr.msk.bf16.gmra.mrb[60].mxu0 %vm1022_vm4, %v9837_v24 }
 0x2da   :  { %v10688_v40 = vpop.f32.mrb[0].mxu1 }
 0x2db   :  { %v3157_v10 = vpop.f32.mrb[1].mxu1 }
 0x2dc   :  { %v10689_v63 = vpop.f32.mrb[2].mxu1 }
 0x2dd   :  { %v3160_v6 = vpop.f32.mrb[3].mxu1 }
 0x2e2   :  { %v10692_v47 = vpop.f32.mrb[4].mxu1 }
 0x2e3   :  { %v3173_v60 = vpop.f32.mrb[5].mxu1 }
 0x2e4   :  { %v10693_v54 = vpop.f32.mrb[6].mxu1 }
 0x2e5   :  { %v3176_v45 = vpop.f32.mrb[7].mxu1 }
 0x2ea   :  { %v16997_v62 = vpop.f32.mrb[8].mxu1 }
 0x2eb   :  { %v16999_v28 = vpop.f32.mrb[9].mxu1 }
 0x2ec   :  { %v17001_v56 = vpop.f32.mrb[10].mxu1 }
 0x2ed   :  { %v17003_v38 = vpop.f32.mrb[11].mxu1 }
 0x2f3   :  { %v17005_v36 = vpop.f32.mrb[12].mxu1 }
 0x2f4   :  { %v17007_v46 = vpop.f32.mrb[13].mxu1 }
 0x2f5   :  { %v17009_v43 = vpop.f32.mrb[14].mxu1 }
 0x2f6   :  { %v17011_v13 = vpop.f32.mrb[15].mxu1 }
 0x2fd   :  { %v17013_v22 = vpop.f32.mrb[16].mxu1 }
 0x2fe   :  { %v17015_v27 = vpop.f32.mrb[17].mxu1 }
 0x2ff   :  { %v17017_v29 = vpop.f32.mrb[18].mxu1 }
 0x300   :  { %v17019_v42 = vpop.f32.mrb[19].mxu1 }
 0x305   :  { %v17021_v33 = vpop.f32.mrb[20].mxu1 }
 0x306   :  { %v17023_v31 = vpop.f32.mrb[21].mxu1 }
 0x307   :  { %v17025_v11 = vpop.f32.mrb[22].mxu1 }
 0x308   :  { %v17027_v1 = vpop.f32.mrb[23].mxu1 }
 0x30d   :  { %v17029_v26 = vpop.f32.mrb[24].mxu1 }
 0x30e   :  { %v17031_v5 = vpop.f32.mrb[25].mxu1 }
 0x30f   :  { %v17033_v32 = vpop.f32.mrb[26].mxu1 }
 0x310   :  { %v17035_v53 = vpop.f32.mrb[27].mxu1 }
 0x315   :  { %v17037_v23 = vpop.f32.mrb[28].mxu1 }
 0x316   :  { %v17039_v48 = vpop.f32.mrb[29].mxu1 }
 0x317   :  { %v17041_v20 = vpop.f32.mrb[30].mxu1 }
 0x318   :  { %v17043_v39 = vpop.f32.mrb[31].mxu1 }
 0x31e   :  { %v11018_v14 = vpop.f32.mrb[0].mxu0 }
 0x31f   :  { %v11082_v18 = vadd.f32 %v11018_v14, %v10688_v40  ;;  %v8106_v55 = vpop.f32.mrb[1].mxu0 }
 0x320   :  { %v11083_v52 = vadd.f32 %v8106_v55, %v3157_v10  ;;  %v11019_v30 = vpop.f32.mrb[2].mxu0 }
 0x321   :  { %v11084_v44 = vadd.f32 %v11019_v30, %v10689_v63  ;;  %v8109_v15 = vpop.f32.mrb[3].mxu0  ;;  %v8820_v61 = vmul.f32 %v11082_v18, %v11082_v18 }
 0x322   :  { %v11085_v57 = vadd.f32 %v8109_v15, %v3160_v6  ;;  %v8818_v16 = vmul.f32 %v11083_v52, %v11083_v52 }
 0x323   :  { %v10006_v37 = vpack.c.bf16 %v11084_v44, %v11082_v18  ;;  %v8821_v49 = vmul.f32 %v11084_v44, %v11084_v44 }
 0x324   :  { %v10001_v59 = vpack.c.bf16 %v11085_v57, %v11083_v52  ;;  %v8746_v50 = vadd.f32 %v11085_v57, %v11083_v52  ;;  %v8819_v21 = vmul.f32 %v11085_v57, %v11085_v57 }
 0x325   :  { %10158 = vst [vmem:[#allocation2 + $0x8] sm:$0xff] %v10006_v37  }
 0x326   :  { %10002 = vst [vmem:[#allocation2] sm:$0xff] %v10001_v59   ;;  %v8747_v51 = vadd.f32 %v11082_v18, %v8746_v50  ;;  %v8882_v58 = vadd.f32 %v8819_v21, %v8818_v16 }
 0x328   :  { %v8748_v17 = vadd.f32 %v11084_v44, %v8747_v51  ;;  %v8883_v0 = vadd.f32 %v8882_v58, %v8820_v61 }
 0x32a   :  { %v8884_v2 = vadd.f32 %v8883_v0, %v8821_v49 }
 0x32c   :  { %v11022_v35 = vpop.f32.mrb[4].mxu0 }
 0x32d   :  { %v11086_v4 = vadd.f32 %v11022_v35, %v10692_v47  ;;  %v8122_v41 = vpop.f32.mrb[5].mxu0 }
 0x32e   :  { %v11087_v25 = vadd.f32 %v8122_v41, %v3173_v60  ;;  %v11023_v19 = vpop.f32.mrb[6].mxu0 }
 0x32f   :  { %v11088_v3 = vadd.f32 %v11023_v19, %v10693_v54  ;;  %v8125_v9 = vpop.f32.mrb[7].mxu0  ;;  %v8824_v14 = vmul.f32 %v11086_v4, %v11086_v4 }
 0x330   :  { %v8749_v12 = vadd.f32 %v11087_v25, %v8748_v17  ;;  %v8822_v7 = vmul.f32 %v11087_v25, %v11087_v25  ;;  %v11089_v8 = vadd.f32 %v8125_v9, %v3176_v45 }
 0x331   :  { %v10016_v24 = vpack.c.bf16 %v11088_v3, %v11086_v4  ;;  %v8825_v54 = vmul.f32 %v11088_v3, %v11088_v3 }
 0x332   :  { %v8885_v40 = vadd.f32 %v8884_v2, %v8822_v7  ;;  %v10011_v10 = vpack.c.bf16 %v11089_v8, %v11087_v25  ;;  %v8750_v63 = vadd.f32 %v11089_v8, %v8749_v12  ;;  %v8823_v6 = vmul.f32 %v11089_v8, %v11089_v8 }
 0x333   :  { %10160 = vst [vmem:[#allocation2 + $0x18] sm:$0xff] %v10016_v24  }
 0x334   :  { %10159 = vst [vmem:[#allocation2 + $0x10] sm:$0xff] %v10011_v10   ;;  %v8751_v47 = vadd.f32 %v11086_v4, %v8750_v63  ;;  %v8886_v18 = vadd.f32 %v8885_v40, %v8823_v6  ;;  %v11026_v55 = vpop.f32.mrb[8].mxu0 }
 0x335   :  { %v11090_v60 = vadd.f32 %v11026_v55, %v16997_v62  ;;  %v8138_v52 = vpop.f32.mrb[9].mxu0 }
 0x336   :  { %v8887_v30 = vadd.f32 %v8886_v18, %v8824_v14  ;;  %v11091_v44 = vadd.f32 %v8138_v52, %v16999_v28  ;;  %v8752_v15 = vadd.f32 %v11088_v3, %v8751_v47  ;;  %v11027_v45 = vpop.f32.mrb[10].mxu0 }
 0x337   :  { %v11092_v57 = vadd.f32 %v11027_v45, %v17001_v56  ;;  %v8141_v37 = vpop.f32.mrb[11].mxu0  ;;  %v8828_v35 = vmul.f32 %v11090_v60, %v11090_v60 }
 0x338   :  { %v8753_v34 = vadd.f32 %v11091_v44, %v8752_v15  ;;  %v8826_v16 = vmul.f32 %v11091_v44, %v11091_v44  ;;  %v8888_v59 = vadd.f32 %v8887_v30, %v8825_v54  ;;  %v11093_v50 = vadd.f32 %v8141_v37, %v17003_v38 }
 0x339   :  { %v10026_v21 = vpack.c.bf16 %v11092_v57, %v11090_v60  ;;  %v8829_v17 = vmul.f32 %v11092_v57, %v11092_v57 }
 0x33a   :  { %v8889_v61 = vadd.f32 %v8888_v59, %v8826_v16  ;;  %v10021_v51 = vpack.c.bf16 %v11093_v50, %v11091_v44  ;;  %v8754_v58 = vadd.f32 %v11093_v50, %v8753_v34  ;;  %v8827_v62 = vmul.f32 %v11093_v50, %v11093_v50 }
 0x33b   :  { %10162 = vst [vmem:[#allocation2 + $0x28] sm:$0xff] %v10026_v21  }
 0x33c   :  { %10161 = vst [vmem:[#allocation2 + $0x20] sm:$0xff] %v10021_v51   ;;  %v8755_v4 = vadd.f32 %v11090_v60, %v8754_v58  ;;  %v8890_v28 = vadd.f32 %v8889_v61, %v8827_v62 }
 0x33d   :  { %v11030_v41 = vpop.f32.mrb[12].mxu0 }
 0x33e   :  { %v11094_v49 = vadd.f32 %v11030_v41, %v17005_v36  ;;  %v8154_v56 = vpop.f32.mrb[13].mxu0  ;;  %v8891_v0 = vadd.f32 %v8890_v28, %v8828_v35  ;;  %v8756_v19 = vadd.f32 %v11092_v57, %v8755_v4 }
 0x33f   :  { %v11095_v25 = vadd.f32 %v8154_v56, %v17007_v46  ;;  %v11031_v38 = vpop.f32.mrb[14].mxu0 }
 0x340   :  { %v11096_v3 = vadd.f32 %v11031_v38, %v17009_v43  ;;  %v8157_v9 = vpop.f32.mrb[15].mxu0  ;;  %v8892_v7 = vadd.f32 %v8891_v0, %v8829_v17  ;;  %v8832_v6 = vmul.f32 %v11094_v49, %v11094_v49 }
 0x341   :  { %v8757_v2 = vadd.f32 %v11095_v25, %v8756_v19  ;;  %v8830_v12 = vmul.f32 %v11095_v25, %v11095_v25  ;;  %v11097_v8 = vadd.f32 %v8157_v9, %v17011_v13 }
 0x342   :  { %v10036_v24 = vpack.c.bf16 %v11096_v3, %v11094_v49  ;;  %v8833_v55 = vmul.f32 %v11096_v3, %v11096_v3 }
 0x343   :  { %v8893_v40 = vadd.f32 %v8892_v7, %v8830_v12  ;;  %v10031_v10 = vpack.c.bf16 %v11097_v8, %v11095_v25  ;;  %v8758_v63 = vadd.f32 %v11097_v8, %v8757_v2  ;;  %v8831_v36 = vmul.f32 %v11097_v8, %v11097_v8 }
 0x344   :  { %10164 = vst [vmem:[#allocation2 + $0x38] sm:$0xff] %v10036_v24  }
 0x345   :  { %10163 = vst [vmem:[#allocation2 + $0x30] sm:$0xff] %v10031_v10   ;;  %v8759_v14 = vadd.f32 %v11094_v49, %v8758_v63  ;;  %v8894_v46 = vadd.f32 %v8893_v40, %v8831_v36  ;;  %v11034_v47 = vpop.f32.mrb[16].mxu0 }
 0x346   :  { %v11098_v18 = vadd.f32 %v11034_v47, %v17013_v22  ;;  %v8170_v43 = vpop.f32.mrb[17].mxu0 }
 0x347   :  { %v8895_v60 = vadd.f32 %v8894_v46, %v8832_v6  ;;  %v11099_v52 = vadd.f32 %v8170_v43, %v17015_v27  ;;  %v8760_v54 = vadd.f32 %v11096_v3, %v8759_v14  ;;  %v11035_v13 = vpop.f32.mrb[18].mxu0 }
 0x348   :  { %v11100_v30 = vadd.f32 %v11035_v13, %v17017_v29  ;;  %v8173_v44 = vpop.f32.mrb[19].mxu0  ;;  %v8836_v21 = vmul.f32 %v11098_v18, %v11098_v18 }
 0x349   :  { %v8761_v15 = vadd.f32 %v11099_v52, %v8760_v54  ;;  %v8834_v45 = vmul.f32 %v11099_v52, %v11099_v52  ;;  %v8896_v57 = vadd.f32 %v8895_v60, %v8833_v55  ;;  %v11101_v37 = vadd.f32 %v8173_v44, %v17019_v42 }
 0x34a   :  { %v10046_v34 = vpack.c.bf16 %v11100_v30, %v11098_v18  ;;  %v8837_v62 = vmul.f32 %v11100_v30, %v11100_v30 }
 0x34b   :  { %v8897_v16 = vadd.f32 %v8896_v57, %v8834_v45  ;;  %v10041_v59 = vpack.c.bf16 %v11101_v37, %v11099_v52  ;;  %v8762_v50 = vadd.f32 %v11101_v37, %v8761_v15  ;;  %v8835_v22 = vmul.f32 %v11101_v37, %v11101_v37 }
 0x34c   :  { %10166 = vst [vmem:[#allocation2 + $0x48] sm:$0xff] %v10046_v34  }
 0x34d   :  { %10165 = vst [vmem:[#allocation2 + $0x40] sm:$0xff] %v10041_v59   ;;  %v8763_v61 = vadd.f32 %v11098_v18, %v8762_v50  ;;  %v8898_v27 = vadd.f32 %v8897_v16, %v8835_v22 }
 0x34e   :  { %v11038_v51 = vpop.f32.mrb[20].mxu0 }
 0x34f   :  { %v11102_v58 = vadd.f32 %v11038_v51, %v17021_v33  ;;  %v8186_v29 = vpop.f32.mrb[21].mxu0  ;;  %v8899_v35 = vadd.f32 %v8898_v27, %v8836_v21  ;;  %v8764_v28 = vadd.f32 %v11100_v30, %v8763_v61 }
 0x350   :  { %v11103_v4 = vadd.f32 %v8186_v29, %v17023_v31  ;;  %v11039_v42 = vpop.f32.mrb[22].mxu0 }
 0x351   :  { %v11104_v41 = vadd.f32 %v11039_v42, %v17025_v11  ;;  %v8189_v49 = vpop.f32.mrb[23].mxu0  ;;  %v8900_v0 = vadd.f32 %v8899_v35, %v8837_v62  ;;  %v8840_v2 = vmul.f32 %v11102_v58, %v11102_v58 }
 0x352   :  { %v8765_v56 = vadd.f32 %v11103_v4, %v8764_v28  ;;  %v8838_v17 = vmul.f32 %v11103_v4, %v11103_v4  ;;  %v11105_v25 = vadd.f32 %v8189_v49, %v17027_v1 }
 0x353   :  { %v10056_v19 = vpack.c.bf16 %v11104_v41, %v11102_v58  ;;  %v8841_v24 = vmul.f32 %v11104_v41, %v11104_v41 }
 0x354   :  { %v8901_v38 = vadd.f32 %v8900_v0, %v8838_v17  ;;  %v10051_v3 = vpack.c.bf16 %v11105_v25, %v11103_v4  ;;  %v8766_v9 = vadd.f32 %v11105_v25, %v8765_v56  ;;  %v8839_v33 = vmul.f32 %v11105_v25, %v11105_v25 }
 0x355   :  { %10168 = vst [vmem:[#allocation2 + $0x58] sm:$0xff] %v10056_v19  }
 0x356   :  { %10167 = vst [vmem:[#allocation2 + $0x50] sm:$0xff] %v10051_v3   ;;  %v8767_v12 = vadd.f32 %v11102_v58, %v8766_v9  ;;  %v8902_v31 = vadd.f32 %v8901_v38, %v8839_v33  ;;  %v11042_v7 = vpop.f32.mrb[24].mxu0 }
 0x357   :  { %v11106_v8 = vadd.f32 %v11042_v7, %v17029_v26  ;;  %v8202_v11 = vpop.f32.mrb[25].mxu0 }
 0x358   :  { %v8903_v40 = vadd.f32 %v8902_v31, %v8840_v2  ;;  %v11107_v10 = vadd.f32 %v8202_v11, %v17031_v5  ;;  %v8768_v63 = vadd.f32 %v11104_v41, %v8767_v12  ;;  %v11043_v1 = vpop.f32.mrb[26].mxu0 }
 0x359   :  { %v11108_v36 = vadd.f32 %v11043_v1, %v17033_v32  ;;  %v8205_v6 = vpop.f32.mrb[27].mxu0  ;;  %v8844_v54 = vmul.f32 %v11106_v8, %v11106_v8 }
 0x35a   :  { %v8769_v14 = vadd.f32 %v11107_v10, %v8768_v63  ;;  %v8842_v46 = vmul.f32 %v11107_v10, %v11107_v10  ;;  %v8904_v47 = vadd.f32 %v8903_v40, %v8841_v24  ;;  %v11109_v18 = vadd.f32 %v8205_v6, %v17035_v53 }
 0x35b   :  { %v10066_v43 = vpack.c.bf16 %v11108_v36, %v11106_v8  ;;  %v8845_v15 = vmul.f32 %v11108_v36, %v11108_v36 }
 0x35c   :  { %v8905_v55 = vadd.f32 %v8904_v47, %v8842_v46  ;;  %v10061_v60 = vpack.c.bf16 %v11109_v18, %v11107_v10  ;;  %v8770_v52 = vadd.f32 %v11109_v18, %v8769_v14  ;;  %v8843_v26 = vmul.f32 %v11109_v18, %v11109_v18 }
 0x35d   :  { %10170 = vst [vmem:[#allocation2 + $0x68] sm:$0xff] %v10066_v43  }
 0x35e   :  { %10169 = vst [vmem:[#allocation2 + $0x60] sm:$0xff] %v10061_v60   ;;  %v8771_v13 = vadd.f32 %v11106_v8, %v8770_v52  ;;  %v8906_v5 = vadd.f32 %v8905_v55, %v8843_v26 }
 0x35f   :  { %v11046_v30 = vpop.f32.mrb[28].mxu0 }
 0x360   :  { %v11110_v44 = vadd.f32 %v11046_v30, %v17037_v23  ;;  %v8218_v32 = vpop.f32.mrb[29].mxu0  ;;  %v8907_v45 = vadd.f32 %v8906_v5, %v8844_v54  ;;  %v8772_v37 = vadd.f32 %v11108_v36, %v8771_v13 }
 0x361   :  { %v11111_v57 = vadd.f32 %v8218_v32, %v17039_v48  ;;  %v11047_v53 = vpop.f32.mrb[30].mxu0 }
 0x362   :  { %v11112_v34 = vadd.f32 %v11047_v53, %v17041_v20  ;;  %v8221_v16 = vpop.f32.mrb[31].mxu0  ;;  %v8908_v22 = vadd.f32 %v8907_v45, %v8845_v15  ;;  %v8848_v29 = vmul.f32 %v11110_v44, %v11110_v44 }
 0x363   :  { %v8773_v59 = vadd.f32 %v11111_v57, %v8772_v37  ;;  %v8846_v50 = vmul.f32 %v11111_v57, %v11111_v57  ;;  %v11113_v21 = vadd.f32 %v8221_v16, %v17043_v39 }
 0x364   :  { %v10076_v61 = vpack.c.bf16 %v11112_v34, %v11110_v44  ;;  %v8849_v41 = vmul.f32 %v11112_v34, %v11112_v34 }
 0x365   :  { %v8909_v27 = vadd.f32 %v8908_v22, %v8846_v50  ;;  %v10071_v51 = vpack.c.bf16 %v11113_v21, %v11111_v57  ;;  %v8774_v58 = vadd.f32 %v11113_v21, %v8773_v59  ;;  %v8847_v23 = vmul.f32 %v11113_v21, %v11113_v21 }
 0x366   :  { %10172 = vst [vmem:[#allocation2 + $0x78] sm:$0xff] %v10076_v61  }
 0x367   :  { %10171 = vst [vmem:[#allocation2 + $0x70] sm:$0xff] %v10071_v51   ;;  %v8775_v62 = vadd.f32 %v11110_v44, %v8774_v58  ;;  %v8910_v48 = vadd.f32 %v8909_v27, %v8847_v23  ;;  %v10786_v35 = vpop.f32.mrb[32].mxu1 }
 0x368   :  { %v11050_v4 = vpop.f32.mrb[32].mxu0  ;;  %v4601_v20 = vpop.f32.mrb[33].mxu1 }
 0x369   :  { %v11114_v28 = vadd.f32 %v11050_v4, %v10786_v35  ;;  %v8234_v42 = vpop.f32.mrb[33].mxu0  ;;  %v8911_v49 = vadd.f32 %v8910_v48, %v8848_v29  ;;  %v8776_v17 = vadd.f32 %v11112_v34, %v8775_v62  ;;  %v10787_v39 = vpop.f32.mrb[34].mxu1 }
 0x36a   :  { %v11115_v56 = vadd.f32 %v8234_v42, %v4601_v20  ;;  %v11051_v0 = vpop.f32.mrb[34].mxu0  ;;  %v4604_v19 = vpop.f32.mrb[35].mxu1 }
 0x36b   :  { %v11116_v25 = vadd.f32 %v11051_v0, %v10787_v39  ;;  %v8237_v38 = vpop.f32.mrb[35].mxu0  ;;  %v8912_v33 = vadd.f32 %v8911_v49, %v8849_v41  ;;  %v8852_v24 = vmul.f32 %v11114_v28, %v11114_v28 }
 0x36c   :  { %v8777_v3 = vadd.f32 %v11115_v56, %v8776_v17  ;;  %v8850_v9 = vmul.f32 %v11115_v56, %v11115_v56  ;;  %v11117_v2 = vadd.f32 %v8237_v38, %v4604_v19 }
 0x36d   :  { %v10086_v12 = vpack.c.bf16 %v11116_v25, %v11114_v28  ;;  %v8853_v46 = vmul.f32 %v11116_v25, %v11116_v25 }
 0x36e   :  { %v8913_v31 = vadd.f32 %v8912_v33, %v8850_v9  ;;  %v10081_v7 = vpack.c.bf16 %v11117_v2, %v11115_v56  ;;  %v8778_v8 = vadd.f32 %v11117_v2, %v8777_v3  ;;  %v8851_v11 = vmul.f32 %v11117_v2, %v11117_v2 }
 0x36f   :  { %10174 = vst [vmem:[#allocation2 + $0x88] sm:$0xff] %v10086_v12   ;;  %v10790_v63 = vpop.f32.mrb[36].mxu1 }
 0x370   :  { %10173 = vst [vmem:[#allocation2 + $0x80] sm:$0xff] %v10081_v7   ;;  %v8779_v40 = vadd.f32 %v11114_v28, %v8778_v8  ;;  %v8914_v10 = vadd.f32 %v8913_v31, %v8851_v11  ;;  %v11054_v1 = vpop.f32.mrb[36].mxu0  ;;  %v4617_v6 = vpop.f32.mrb[37].mxu1 }
 0x371   :  { %v11118_v36 = vadd.f32 %v11054_v1, %v10790_v63  ;;  %v8250_v14 = vpop.f32.mrb[37].mxu0  ;;  %v10791_v55 = vpop.f32.mrb[38].mxu1 }
 0x372   :  { %v8915_v47 = vadd.f32 %v8914_v10, %v8852_v24  ;;  %v11119_v18 = vadd.f32 %v8250_v14, %v4617_v6  ;;  %v8780_v43 = vadd.f32 %v11116_v25, %v8779_v40  ;;  %v11055_v60 = vpop.f32.mrb[38].mxu0  ;;  %v4620_v26 = vpop.f32.mrb[39].mxu1 }
 0x373   :  { %v11120_v52 = vadd.f32 %v11055_v60, %v10791_v55  ;;  %v8253_v54 = vpop.f32.mrb[39].mxu0  ;;  %v8856_v53 = vmul.f32 %v11118_v36, %v11118_v36 }
 0x374   :  { %v8781_v13 = vadd.f32 %v11119_v18, %v8780_v43  ;;  %v8854_v5 = vmul.f32 %v11119_v18, %v11119_v18  ;;  %v8916_v30 = vadd.f32 %v8915_v47, %v8853_v46  ;;  %v11121_v44 = vadd.f32 %v8253_v54, %v4620_v26 }
 0x375   :  { %v10096_v32 = vpack.c.bf16 %v11120_v52, %v11118_v36  ;;  %v8857_v27 = vmul.f32 %v11120_v52, %v11120_v52 }
 0x376   :  { %v8917_v15 = vadd.f32 %v8916_v30, %v8854_v5  ;;  %v10091_v45 = vpack.c.bf16 %v11121_v44, %v11119_v18  ;;  %v8782_v57 = vadd.f32 %v11121_v44, %v8781_v13  ;;  %v8855_v37 = vmul.f32 %v11121_v44, %v11121_v44 }
 0x377   :  { %10176 = vst [vmem:[#allocation2 + $0x98] sm:$0xff] %v10096_v32   ;;  %v10794_v59 = vpop.f32.mrb[40].mxu1 }
 0x378   :  { %10175 = vst [vmem:[#allocation2 + $0x90] sm:$0xff] %v10091_v45   ;;  %v8783_v34 = vadd.f32 %v11118_v36, %v8782_v57  ;;  %v8918_v16 = vadd.f32 %v8917_v15, %v8855_v37  ;;  %v11058_v50 = vpop.f32.mrb[40].mxu0  ;;  %v4633_v21 = vpop.f32.mrb[41].mxu1 }
 0x379   :  { %v11122_v22 = vadd.f32 %v11058_v50, %v10794_v59  ;;  %v8266_v61 = vpop.f32.mrb[41].mxu0  ;;  %v10795_v29 = vpop.f32.mrb[42].mxu1 }
 0x37a   :  { %v8919_v51 = vadd.f32 %v8918_v16, %v8856_v53  ;;  %v11123_v58 = vadd.f32 %v8266_v61, %v4633_v21  ;;  %v8784_v23 = vadd.f32 %v11120_v52, %v8783_v34  ;;  %v11059_v62 = vpop.f32.mrb[42].mxu0  ;;  %v4636_v35 = vpop.f32.mrb[43].mxu1 }
 0x37b   :  { %v11124_v48 = vadd.f32 %v11059_v62, %v10795_v29  ;;  %v8269_v4 = vpop.f32.mrb[43].mxu0  ;;  %v8860_v25 = vmul.f32 %v11122_v22, %v11122_v22 }
 0x37c   :  { %v8785_v28 = vadd.f32 %v11123_v58, %v8784_v23  ;;  %v8858_v20 = vmul.f32 %v11123_v58, %v11123_v58  ;;  %v8920_v42 = vadd.f32 %v8919_v51, %v8857_v27  ;;  %v11125_v41 = vadd.f32 %v8269_v4, %v4636_v35 }
 0x37d   :  { %v10106_v49 = vpack.c.bf16 %v11124_v48, %v11122_v22  ;;  %v8861_v31 = vmul.f32 %v11124_v48, %v11124_v48 }
 0x37e   :  { %v8921_v56 = vadd.f32 %v8920_v42, %v8858_v20  ;;  %v10101_v17 = vpack.c.bf16 %v11125_v41, %v11123_v58  ;;  %v8786_v39 = vadd.f32 %v11125_v41, %v8785_v28  ;;  %v8859_v0 = vmul.f32 %v11125_v41, %v11125_v41 }
 0x37f   :  { %10178 = vst [vmem:[#allocation2 + $0xa8] sm:$0xff] %v10106_v49   ;;  %v10798_v3 = vpop.f32.mrb[44].mxu1 }
 0x380   :  { %10177 = vst [vmem:[#allocation2 + $0xa0] sm:$0xff] %v10101_v17   ;;  %v8787_v19 = vadd.f32 %v11122_v22, %v8786_v39  ;;  %v8922_v38 = vadd.f32 %v8921_v56, %v8859_v0  ;;  %v11062_v9 = vpop.f32.mrb[44].mxu0  ;;  %v4649_v2 = vpop.f32.mrb[45].mxu1 }
 0x381   :  { %v11126_v33 = vadd.f32 %v11062_v9, %v10798_v3  ;;  %v8282_v12 = vpop.f32.mrb[45].mxu0  ;;  %v10799_v24 = vpop.f32.mrb[46].mxu1 }
 0x382   :  { %v8923_v7 = vadd.f32 %v8922_v38, %v8860_v25  ;;  %v11127_v8 = vadd.f32 %v8282_v12, %v4649_v2  ;;  %v8788_v11 = vadd.f32 %v11124_v48, %v8787_v19  ;;  %v11063_v40 = vpop.f32.mrb[46].mxu0  ;;  %v4652_v63 = vpop.f32.mrb[47].mxu1 }
 0x383   :  { %v11128_v10 = vadd.f32 %v11063_v40, %v10799_v24  ;;  %v8285_v1 = vpop.f32.mrb[47].mxu0  ;;  %v8864_v52 = vmul.f32 %v11126_v33, %v11126_v33 }
 0x384   :  { %v8789_v36 = vadd.f32 %v11127_v8, %v8788_v11  ;;  %v8862_v6 = vmul.f32 %v11127_v8, %v11127_v8  ;;  %v8924_v14 = vadd.f32 %v8923_v7, %v8861_v31  ;;  %v11129_v46 = vadd.f32 %v8285_v1, %v4652_v63 }
 0x385   :  { %v10116_v47 = vpack.c.bf16 %v11128_v10, %v11126_v33  ;;  %v8865_v15 = vmul.f32 %v11128_v10, %v11128_v10 }
 0x386   :  { %v8925_v18 = vadd.f32 %v8924_v14, %v8862_v6  ;;  %v10111_v43 = vpack.c.bf16 %v11129_v46, %v11127_v8  ;;  %v8790_v55 = vadd.f32 %v11129_v46, %v8789_v36  ;;  %v8863_v60 = vmul.f32 %v11129_v46, %v11129_v46 }
 0x387   :  { %10180 = vst [vmem:[#allocation2 + $0xb8] sm:$0xff] %v10116_v47   ;;  %v10802_v13 = vpop.f32.mrb[48].mxu1 }
 0x388   :  { %10179 = vst [vmem:[#allocation2 + $0xb0] sm:$0xff] %v10111_v43   ;;  %v8791_v26 = vadd.f32 %v11126_v33, %v8790_v55  ;;  %v8926_v54 = vadd.f32 %v8925_v18, %v8863_v60  ;;  %v11066_v5 = vpop.f32.mrb[48].mxu0  ;;  %v4665_v44 = vpop.f32.mrb[49].mxu1 }
 0x389   :  { %v11130_v30 = vadd.f32 %v11066_v5, %v10802_v13  ;;  %v8298_v32 = vpop.f32.mrb[49].mxu0  ;;  %v10803_v53 = vpop.f32.mrb[50].mxu1 }
 0x38a   :  { %v8927_v45 = vadd.f32 %v8926_v54, %v8864_v52  ;;  %v11131_v57 = vadd.f32 %v8298_v32, %v4665_v44  ;;  %v8792_v37 = vadd.f32 %v11128_v10, %v8791_v26  ;;  %v11067_v34 = vpop.f32.mrb[50].mxu0  ;;  %v4668_v59 = vpop.f32.mrb[51].mxu1 }
 0x38b   :  { %v11132_v16 = vadd.f32 %v11067_v34, %v10803_v53  ;;  %v8301_v50 = vpop.f32.mrb[51].mxu0  ;;  %v8868_v48 = vmul.f32 %v11130_v30, %v11130_v30 }
 0x38c   :  { %v8793_v22 = vadd.f32 %v11131_v57, %v8792_v37  ;;  %v8866_v21 = vmul.f32 %v11131_v57, %v11131_v57  ;;  %v8928_v61 = vadd.f32 %v8927_v45, %v8865_v15  ;;  %v11133_v27 = vadd.f32 %v8301_v50, %v4668_v59 }
 0x38d   :  { %v10126_v51 = vpack.c.bf16 %v11132_v16, %v11130_v30  ;;  %v8869_v56 = vmul.f32 %v11132_v16, %v11132_v16 }
 0x38e   :  { %v8929_v58 = vadd.f32 %v8928_v61, %v8866_v21  ;;  %v10121_v23 = vpack.c.bf16 %v11133_v27, %v11131_v57  ;;  %v8794_v29 = vadd.f32 %v11133_v27, %v8793_v22  ;;  %v8867_v62 = vmul.f32 %v11133_v27, %v11133_v27 }
 0x38f   :  { %10182 = vst [vmem:[#allocation2 + $0xc8] sm:$0xff] %v10126_v51   ;;  %v10806_v28 = vpop.f32.mrb[52].mxu1 }
 0x390   :  { %10181 = vst [vmem:[#allocation2 + $0xc0] sm:$0xff] %v10121_v23   ;;  %v8795_v35 = vadd.f32 %v11130_v30, %v8794_v29  ;;  %v8930_v4 = vadd.f32 %v8929_v58, %v8867_v62  ;;  %v11070_v20 = vpop.f32.mrb[52].mxu0  ;;  %v4681_v41 = vpop.f32.mrb[53].mxu1 }
 0x391   :  { %v11134_v42 = vadd.f32 %v11070_v20, %v10806_v28  ;;  %v8314_v49 = vpop.f32.mrb[53].mxu0  ;;  %v10807_v25 = vpop.f32.mrb[54].mxu1 }
 0x392   :  { %v8931_v17 = vadd.f32 %v8930_v4, %v8868_v48  ;;  %v11135_v39 = vadd.f32 %v8314_v49, %v4681_v41  ;;  %v8796_v0 = vadd.f32 %v11132_v16, %v8795_v35  ;;  %v11071_v19 = vpop.f32.mrb[54].mxu0  ;;  %v4684_v3 = vpop.f32.mrb[55].mxu1 }
 0x393   :  { %v11136_v38 = vadd.f32 %v11071_v19, %v10807_v25  ;;  %v8317_v9 = vpop.f32.mrb[55].mxu0  ;;  %v8872_v10 = vmul.f32 %v11134_v42, %v11134_v42 }
 0x394   :  { %v8797_v33 = vadd.f32 %v11135_v39, %v8796_v0  ;;  %v8870_v2 = vmul.f32 %v11135_v39, %v11135_v39  ;;  %v8932_v12 = vadd.f32 %v8931_v17, %v8869_v56  ;;  %v11137_v31 = vadd.f32 %v8317_v9, %v4684_v3 }
 0x395   :  { %v10136_v7 = vpack.c.bf16 %v11136_v38, %v11134_v42  ;;  %v8873_v18 = vmul.f32 %v11136_v38, %v11136_v38 }
 0x396   :  { %v8933_v8 = vadd.f32 %v8932_v12, %v8870_v2  ;;  %v10131_v11 = vpack.c.bf16 %v11137_v31, %v11135_v39  ;;  %v8798_v24 = vadd.f32 %v11137_v31, %v8797_v33  ;;  %v8871_v40 = vmul.f32 %v11137_v31, %v11137_v31 }
 0x397   :  { %10184 = vst [vmem:[#allocation2 + $0xd8] sm:$0xff] %v10136_v7   ;;  %v10810_v36 = vpop.f32.mrb[56].mxu1 }
 0x398   :  { %10183 = vst [vmem:[#allocation2 + $0xd0] sm:$0xff] %v10131_v11   ;;  %v8799_v63 = vadd.f32 %v11134_v42, %v8798_v24  ;;  %v8934_v1 = vadd.f32 %v8933_v8, %v8871_v40  ;;  %v11074_v6 = vpop.f32.mrb[56].mxu0  ;;  %v4697_v46 = vpop.f32.mrb[57].mxu1 }
 0x399   :  { %v11138_v14 = vadd.f32 %v11074_v6, %v10810_v36  ;;  %v8330_v47 = vpop.f32.mrb[57].mxu0  ;;  %v10811_v52 = vpop.f32.mrb[58].mxu1 }
 0x39a   :  { %v8935_v43 = vadd.f32 %v8934_v1, %v8872_v10  ;;  %v11139_v55 = vadd.f32 %v8330_v47, %v4697_v46  ;;  %v8800_v60 = vadd.f32 %v11136_v38, %v8799_v63  ;;  %v11075_v26 = vpop.f32.mrb[58].mxu0  ;;  %v4700_v13 = vpop.f32.mrb[59].mxu1 }
 0x39b   :  { %v11140_v54 = vadd.f32 %v11075_v26, %v10811_v52  ;;  %v8333_v5 = vpop.f32.mrb[59].mxu0  ;;  %v8876_v16 = vmul.f32 %v11138_v14, %v11138_v14 }
 0x39c   :  { %v8801_v30 = vadd.f32 %v11139_v55, %v8800_v60  ;;  %v8874_v44 = vmul.f32 %v11139_v55, %v11139_v55  ;;  %v8936_v32 = vadd.f32 %v8935_v43, %v8873_v18  ;;  %v11141_v15 = vadd.f32 %v8333_v5, %v4700_v13 }
 0x39d   :  { %v10146_v45 = vpack.c.bf16 %v11140_v54, %v11138_v14  ;;  %v8877_v58 = vmul.f32 %v11140_v54, %v11140_v54 }
 0x39e   :  { %v8937_v57 = vadd.f32 %v8936_v32, %v8874_v44  ;;  %v10141_v37 = vpack.c.bf16 %v11141_v15, %v11139_v55  ;;  %v8802_v53 = vadd.f32 %v11141_v15, %v8801_v30  ;;  %v8875_v34 = vmul.f32 %v11141_v15, %v11141_v15 }
 0x39f   :  { %10186 = vst [vmem:[#allocation2 + $0xe8] sm:$0xff] %v10146_v45   ;;  %v10814_v22 = vpop.f32.mrb[60].mxu1 }
 0x3a0   :  { %10185 = vst [vmem:[#allocation2 + $0xe0] sm:$0xff] %v10141_v37   ;;  %v8803_v59 = vadd.f32 %v11138_v14, %v8802_v53  ;;  %v8938_v50 = vadd.f32 %v8937_v57, %v8875_v34  ;;  %v11078_v21 = vpop.f32.mrb[60].mxu0  ;;  %v4713_v27 = vpop.f32.mrb[61].mxu1 }
 0x3a1   :  { %v11142_v61 = vadd.f32 %v11078_v21, %v10814_v22  ;;  %v8346_v51 = vpop.f32.mrb[61].mxu0  ;;  %v10815_v48 = vpop.f32.mrb[62].mxu1 }
 0x3a2   :  { %v8939_v23 = vadd.f32 %v8938_v50, %v8876_v16  ;;  %v11143_v29 = vadd.f32 %v8346_v51, %v4713_v27  ;;  %v8804_v62 = vadd.f32 %v11140_v54, %v8803_v59  ;;  %v11079_v35 = vpop.f32.mrb[62].mxu0  ;;  %v4716_v28 = vpop.f32.mrb[63].mxu1 }
 0x3a3   :  { %v11144_v4 = vadd.f32 %v11079_v35, %v10815_v48  ;;  %v8349_v20 = vpop.f32.mrb[63].mxu0  ;;  %v8880_v38 = vmul.f32 %v11142_v61, %v11142_v61 }
 0x3a4   :  { %v8805_v42 = vadd.f32 %v11143_v29, %v8804_v62  ;;  %v8878_v41 = vmul.f32 %v11143_v29, %v11143_v29  ;;  %v8940_v49 = vadd.f32 %v8939_v23, %v8877_v58  ;;  %v11145_v56 = vadd.f32 %v8349_v20, %v4716_v28 }
 0x3a5   :  { %v10156_v17 = vpack.c.bf16 %v11144_v4, %v11142_v61 }
 0x3a6   :  { %v8941_v39 = vadd.f32 %v8940_v49, %v8878_v41  ;;  %v10151_v0 = vpack.c.bf16 %v11145_v56, %v11143_v29  ;;  %v8806_v25 = vadd.f32 %v11145_v56, %v8805_v42  ;;  %v8879_v19 = vmul.f32 %v11145_v56, %v11145_v56 }
 0x3a7   :  { %10188 = vst [vmem:[#allocation2 + $0xf8] sm:$0xff] %v10156_v17  }
 0x3a8   :  { %10187 = vst [vmem:[#allocation2 + $0xf0] sm:$0xff] %v10151_v0   ;;  %v8807_v3 = vadd.f32 %v11142_v61, %v8806_v25  ;;  %v8942_v9 = vadd.f32 %v8941_v39, %v8879_v19 }
 0x3a9   :  { %12048 = shalt.err (!%p12045_p4)
}
 0x3aa   :  { %s12049_s6 = scalar_lea.hbm %s17115_s2, 4096 }
 0x3ab   :  { %p12050_p5 = scmp.ne.s32.totalorder %s17115_s2, %s12049_s6  ;;  %p12053_p6 = scmp.lt.u32.totalorder %s12049_s6, %s17115_s2 }
 0x3ad   :  { %p12055_p7 = pnand %p12053_p6, %p12050_p5 }
 0x3af   :  { %12058 = shalt.err (!%p12055_p7)
}
 0x3b0   :  { %s12109_s11 = smov 64   ;;  %s12110_s12 = smov 4   ;;  %v8881_v33 = vmul.f32 %v11144_v4, %v11144_v4  ;;  %v8808_v2 = vadd.f32 %v11144_v4, %v8807_v3  ;;  %v8943_v12 = vadd.f32 %v8942_v9, %v8880_v38  ;;  %v8745_v6 = vld [vmem:[#allocation4] sm:$0x1]  ;;  %v8817_v47 = vld [vmem:[#allocation6] sm:$0x1] }
 0x3b1   :  { %8968 = dma.vmem_to_hbm [thread:$0]  %s8963_s28, 4096, %s17115_s2, [#allocation3], %s12109_s11, %s12109_s11, %s12110_s12  }
 0x3b2   :  { %v8809_v31 = vrot.slane %v8808_v2, 4  ;;  %v8944_v7 = vadd.f32 %v8943_v12, %v8881_v33  ;;  %s12111_s14 = smov [#allocation4]   ;;  %s12112_s2 = smov [#allocation6]  }
 0x3b3   :  { %s8975_s15 = sshll.u32 %s12111_s14, 4  ;;  %s8985_s16 = sshll.u32 %s12112_s2, 4  ;;  %s8976_s15 = int_to_ptr.vmem [resolvable:$true] %s8975_s15  ;;  %s17081_s16 = int_to_ptr.vmem [resolvable:$true] %s8985_s16 }
 0x3b4   :  { %v8810_v8 = vadd.f32 %v8809_v31, %v8808_v2  ;;  %v8945_v11 = vrot.slane %v8944_v7, 4  ;;  %s12059_s17 = scalar_lea.vmem %s8976_s15, 16  ;;  %s12063_s18 = scalar_lea.vmem %s8976_s15, 32 }
 0x3b5   :  { %p12060_p8 = scmp.ne.s32.totalorder %s8976_s15, %s12059_s17  ;;  %p12064_p9 = scmp.lt.s32.totalorder %s8976_s15, %s8976_s15 }
 0x3b6   :  { %v8811_v24 = vrot.slane %v8810_v8, 2  ;;  %v8946_v40 = vadd.f32 %v8945_v11, %v8944_v7  ;;  %p12065_p10 = scmp.lt.s32.totalorder %s12063_s18, %s12059_s17 }
 0x3b8   :  { %v8812_v10 = vadd.f32 %v8811_v24, %v8810_v8  ;;  %v8947_v63 = vrot.slane %v8946_v40, 2  ;;  %p12066_p11 = por %p12065_p10, %p12064_p9 }
 0x3ba   :  { %v8813_v1 = vrot.slane %v8812_v10, 1  ;;  %v8948_v36 = vadd.f32 %v8947_v63, %v8946_v40  ;;  %p12067_p12 = pnand %p12066_p11, %p12060_p8 }
 0x3bc   :  { %v8814_v14 = vadd.f32 %v8813_v1, %v8812_v10  ;;  %v8949_v46 = vrot.slane %v8948_v36, 1 }
 0x3be   :  { %v8815_v18 = vadd.f32 %v8814_v14, %v8745_v6  ;;  %v8950_v43 = vadd.f32 %v8949_v46, %v8948_v36 }
 0x3c0   :  { %8816 = vst [vmem:[#allocation4] sm:$0x1] %v8815_v18  ;;  %v8951_v55 = vadd.f32 %v8950_v43, %v8817_v47 }
 0x3c1   :  { %12070 = shalt.err (!%p12067_p12)
}
 0x3c2   :  { %s12071_s21 = scalar_lea.hbm %s17116_s3, 16 }
 0x3c3   :  { %p12072_p13 = scmp.ne.s32.totalorder %s17116_s3, %s12071_s21  ;;  %p12075_p0 = scmp.lt.u32.totalorder %s12071_s21, %s17116_s3 }
 0x3c5   :  { %p12077_p1 = pnand %p12075_p0, %p12072_p13 }
 0x3c7   :  { %12080 = shalt.err (!%p12077_p1)
}
 0x3c8   :  { %8978 = dma.vmem_to_hbm [thread:$0]  %s8976_s15, 16, %s17116_s3, [#allocation5]   ;;  %8952 = vst [vmem:[#allocation6] sm:$0x1] %v8951_v55 }
 0x3c9   :  { %s12081_s0 = scalar_lea.vmem %s17081_s16, 16  ;;  %s12085_s28 = scalar_lea.vmem %s17081_s16, 32 }
 0x3ca   :  { %p12082_p2 = scmp.ne.s32.totalorder %s17081_s16, %s12081_s0  ;;  %p12086_p3 = scmp.lt.s32.totalorder %s17081_s16, %s17081_s16 }
 0x3cb   :  { %p12087_p4 = scmp.lt.s32.totalorder %s12085_s28, %s12081_s0 }
 0x3cd   :  { %p12088_p5 = por %p12087_p4, %p12086_p3 }
 0x3cf   :  { %p12089_p6 = pnand %p12088_p5, %p12082_p2 }
 0x3d1   :  { %12092 = shalt.err (!%p12089_p6)
}
 0x3d2   :  { %s12093_s5 = scalar_lea.hbm %s17117_s4, 16 }
 0x3d3   :  { %p12094_p7 = scmp.ne.s32.totalorder %s17117_s4, %s12093_s5  ;;  %p12097_p8 = scmp.lt.u32.totalorder %s12093_s5, %s17117_s4 }
 0x3d5   :  { %p12099_p9 = pnand %p12097_p8, %p12094_p7 }
 0x3d7   :  { %12102 = shalt.err (!%p12099_p9)
}
 0x3d8   :  { %8988 = dma.vmem_to_hbm [thread:$0]  %s17081_s16, 16, %s17117_s4, [#allocation5]  }
 0x3d9   :  { %12103 = dma.done.wait [#allocation3], 4096  }
 0x3da   :  { %12104 = vsyncadd [#allocation3], 4294963200 }
 0x3db   :  { %12105 = dma.done.wait [#allocation5], 32  }
 0x3dc   :  { %12106 = vsyncadd [#allocation5], 4294967264 }
 0x3dd   :  { %8998 = vsyncpa [#allocation3], 1 }
 0x3de   :  { %8999 = vsyncpa [#allocation5], 1 }

</bundles_post_ra>
